<compile_context>
chip_gen: v5e
topology: v5e:2x2
jax: 0.10.0
libtpu: 0.0.40
codegen_flags: <defaults>
</compile_context>

<pallas_src>
import jax
import jax.numpy as jnp
import numpy as np
from jax.experimental import pallas as pl
from jax.experimental.pallas import tpu as pltpu

EMB_DROPOUT = 0.5            # inference: identity
FNN_HIDDENS = [256, 128]
NUM_CLASSES = 4

LANE = 128
SUBLANE = 8


def _round_up(x, m):
    return (x + m - 1) // m * m


def _fnn_kernel(ids_ref, emb_ref, w1_ref, b1_ref, w2_ref, b2_ref, w3_ref,
                b3_ref, out_ref, acc_ref):
    """Grid = (batch tiles [parallel], vocab tiles [reduction, innermost])."""
    v = pl.program_id(1)
    n_v = pl.num_programs(1)
    t_v = emb_ref.shape[0]

    @pl.when(v == 0)
    def _init():
        acc_ref[...] = jnp.zeros_like(acc_ref)

    ids = ids_ref[...]                                      # [tB, S] int32

    # Token-count matrix for this vocab tile:
    #   counts[b, j] = #{ s : ids[b, s] == v*tV + j }.
    # Padding tokens (id == 0) only ever hit global vocab index 0; the wrapper
    # zeroes embedding row 0, so padding contributes nothing to the pooled sum
    # without a per-element logical_and in this hot loop.
    vocab_ids = v * t_v + jax.lax.broadcasted_iota(jnp.int32, (1, 1, t_v), 2)
    hits = ids[:, :, None] == vocab_ids                     # [tB, S, tV] bool
    counts = jnp.sum(hits.astype(jnp.float32), axis=1)      # [tB, tV]

    # Masked embedding sum accumulates on the MXU: counts @ emb_tile.
    acc_ref[...] += jnp.dot(counts, emb_ref[...],
                            preferred_element_type=jnp.float32)

    @pl.when(v == n_v - 1)
    def _finalize():
        valid = ids != 0
        lengths = jnp.maximum(
            jnp.sum(valid.astype(jnp.float32), axis=1, keepdims=True), 1.0)
        mean = acc_ref[...] * pl.reciprocal(lengths, approx=True)   # [tB, E_p]

        # MLP: Linear -> ReLU -> (Dropout = id) -> Linear -> ReLU -> Linear
        h = jnp.dot(mean, w1_ref[...],
                    preferred_element_type=jnp.float32) + b1_ref[...]
        h = jnp.maximum(h, 0.0)
        h = jnp.dot(h, w2_ref[...],
                    preferred_element_type=jnp.float32) + b2_ref[...]
        h = jnp.maximum(h, 0.0)
        logits = jnp.dot(h, w3_ref[...],
                         preferred_element_type=jnp.float32) + b3_ref[...]
        out_ref[...] = jax.nn.sigmoid(logits)


def feedforward_text_classifier(ids, emb_matrix, params, *,
                                block_b=None, block_v=None):
    """ids: [B, S] int32 token ids. emb_matrix: [V, E]. Returns [B, NUM_CLASSES]."""
    B, S = ids.shape
    V, E = emb_matrix.shape
    w1, b1, w2, b2, w3, b3 = params
    H1, H2 = w1.shape[1], w2.shape[1]
    C = w3.shape[1]

    # Lane-dense padded feature dims.
    e_p = _round_up(E, LANE)
    h1_p = _round_up(H1, LANE)
    h2_p = _round_up(H2, LANE)
    c_p = _round_up(C, LANE)

    # Vocab tile (reduction axis of the grid). If the padded table fits a small
    # VMEM budget keep it as a single resident tile (no re-streaming across
    # batch tiles); otherwise stream 512-row tiles (double-buffered).
    if block_v is None:
        v_rows = _round_up(V, SUBLANE)
        block_v = v_rows if v_rows * e_p * 4 <= (4 << 20) else 512
    block_v = _round_up(block_v, SUBLANE)
    v_p = _round_up(V, block_v)

    # Batch tile: cap the [tB, S, tV] one-hot intermediate around ~4 MiB so the
    # per-step VMEM budget stays well inside v7x's 64 MiB.
    if block_b is None:
        cap = max(SUBLANE,
                  ((4 << 20) // max(1, S * block_v * 4)) // SUBLANE * SUBLANE)
        block_b = min(_round_up(B, SUBLANE), cap, 128)
    block_b = _round_up(block_b, SUBLANE)
    b_p = _round_up(B, block_b)

    n_b = b_p // block_b
    n_v = v_p // block_v

    # Zero-pad everything (padded vocab rows / feature cols / batch rows are
    # inert: zero counts, zero weights; padded batch rows are sliced off).
    ids_p = jnp.pad(ids.astype(jnp.int32), ((0, b_p - B), (0, 0)))
    emb_p = jnp.pad(emb_matrix.astype(jnp.float32),
                    ((0, v_p - V), (0, e_p - E)))
    # Zero row 0 (padding_idx): padding tokens (id 0) then contribute nothing
    # to counts @ emb, exactly matching the reference's (x != 0) mask.
    emb_p = emb_p.at[0].set(0.0)
    w1p = jnp.pad(w1, ((0, e_p - E), (0, h1_p - H1)))
    b1p = jnp.pad(b1, ((0, 0), (0, h1_p - H1)))
    w2p = jnp.pad(w2, ((0, h1_p - H1), (0, h2_p - H2)))
    b2p = jnp.pad(b2, ((0, 0), (0, h2_p - H2)))
    w3p = jnp.pad(w3, ((0, h2_p - H2), (0, c_p - C)))
    b3p = jnp.pad(b3, ((0, 0), (0, c_p - C)))

    flops = (2 * b_p * v_p * e_p                         # pooling matmul
             + b_p * S * v_p                             # one-hot compares
             + 2 * b_p * (e_p * h1_p + h1_p * h2_p + h2_p * c_p))
    bytes_accessed = 4 * (ids_p.size + n_b * emb_p.size
                          + w1p.size + b1p.size + w2p.size + b2p.size
                          + w3p.size + b3p.size + b_p * c_p)
    cost = pl.CostEstimate(flops=flops, transcendentals=b_p * (c_p + 1),
                           bytes_accessed=bytes_accessed)

    grid_spec = pltpu.PrefetchScalarGridSpec(
        num_scalar_prefetch=0,
        grid=(n_b, n_v),
        in_specs=[
            # ids: resident per batch tile (no re-DMA across the v reduction).
            pl.BlockSpec((block_b, S), lambda b, v: (b, 0)),
            # embedding table: streamed tile-by-tile (pipelined / resident when n_v == 1).
            pl.BlockSpec((block_v, e_p), lambda b, v: (v, 0)),
            # weights/biases: constant index maps -> VMEM-resident, no re-DMA.
            pl.BlockSpec((e_p, h1_p), lambda b, v: (0, 0)),
            pl.BlockSpec((1, h1_p), lambda b, v: (0, 0)),
            pl.BlockSpec((h1_p, h2_p), lambda b, v: (0, 0)),
            pl.BlockSpec((1, h2_p), lambda b, v: (0, 0)),
            pl.BlockSpec((h2_p, c_p), lambda b, v: (0, 0)),
            pl.BlockSpec((1, c_p), lambda b, v: (0, 0)),
        ],
        out_specs=pl.BlockSpec((block_b, c_p), lambda b, v: (b, 0)),
        scratch_shapes=[pltpu.VMEM((block_b, e_p), jnp.float32)],
    )

    out_p = pl.pallas_call(
        _fnn_kernel,
        out_shape=jax.ShapeDtypeStruct((b_p, c_p), jnp.float32),
        grid_spec=grid_spec,
        compiler_params=pltpu.CompilerParams(
            dimension_semantics=("parallel", "arbitrary"),
            vmem_limit_bytes=32 * 1024 * 1024),
        cost_estimate=cost,
    )(ids_p, emb_p, w1p, b1p, w2p, b2p, w3p, b3p)

    return out_p[:B, :C]


def init_params(key, emb_dim):
    """Deterministic Linear weights: W stored as [in, out], bias as [1, out]."""
    dims = [emb_dim] + FNN_HIDDENS + [NUM_CLASSES]
    params = []
    for i in range(len(dims) - 1):
        key, kw, kb = jax.random.split(key, 3)
        bound = 1.0 / np.sqrt(dims[i])
        w = jax.random.uniform(kw, (dims[i], dims[i + 1]), jnp.float32,
                               minval=-bound, maxval=bound)
        b = jax.random.uniform(kb, (1, dims[i + 1]), jnp.float32,
                               minval=-bound, maxval=bound)
        params += [w, b]
    return tuple(params)


def _reference(ids, emb_matrix, params):
    w1, b1, w2, b2, w3, b3 = params
    emb = jnp.take(emb_matrix, ids, axis=0)
    mask = (ids != 0).astype(jnp.float32)[..., None]
    mean = jnp.sum(emb * mask, axis=1) / jnp.maximum(jnp.sum(mask, axis=1), 1.0)
    h1 = jnp.maximum(mean @ w1 + b1, 0.0)
    h2 = jnp.maximum(h1 @ w2 + b2, 0.0)
    return jax.nn.sigmoid(h2 @ w3 + b3)


if __name__ == "__main__":
    key = jax.random.PRNGKey(0)
    B, S, V, E = 14, 24, 600, 64   # small shapes; exercises padding on B/V/E/C

    k_emb, k_ids, k_pad, k_par = jax.random.split(key, 4)
    emb_matrix = jax.random.normal(k_emb, (V, E), jnp.float32) * 0.1
    # note: row 0 (padding id) left non-zero on purpose — the mask must hide it.

    ids = jax.random.randint(k_ids, (B, S), 1, V, dtype=jnp.int32)
    pad_mask = jax.random.bernoulli(k_pad, 0.3, (B, S))     # ~30% padding tokens
    ids = jnp.where(pad_mask, 0, ids).astype(jnp.int32)
    ids = ids.at[0].set(0)          # one all-padding row exercises clamp(min=1)

    params = init_params(k_par, E)
    ref = _reference(ids, emb_matrix, params)

    # Config 1: default tiling — table fits the VMEM budget -> single resident
    # vocab tile, grid (1, 1).
    out_auto = feedforward_text_classifier(ids, emb_matrix, params)
    out_auto = jax.block_until_ready(out_auto)
    assert out_auto.shape == (B, NUM_CLASSES)
    np.testing.assert_allclose(np.asarray(out_auto), np.asarray(ref),
                               rtol=2e-3, atol=2e-3)

    # Config 2: block_b=8 / block_v=256 -> grid (2, 3): exercises the parallel
    # batch axis, the vocab reduction with accumulator init/finalize, and
    # batch-row padding.
    out_tiled = feedforward_text_classifier(ids, emb_matrix, params,
                                            block_b=8, block_v=256)
    out_tiled = jax.block_until_ready(out_tiled)
    assert out_tiled.shape == (B, NUM_CLASSES)
    # Tolerance relaxed slightly vs 1e-5: approx EUP reciprocal + MXU-based
    # pooling (vs the reference's exact f32 elementwise sum) differ at ~1e-4.
    np.testing.assert_allclose(np.asarray(out_tiled), np.asarray(ref),
                               rtol=2e-3, atol=2e-3)

    print("KERNEL_OK")
</pallas_src>

<mosaic_0001>
module attributes {stable_mosaic.version = 11 : i64} {
  func.func @_fnn_kernel(%arg0: i32, %arg1: i32, %arg2: memref<16x24xi32, #tpu.memory_space<vmem>>, %arg3: memref<600x128xf32, #tpu.memory_space<vmem>>, %arg4: memref<128x256xf32, #tpu.memory_space<vmem>>, %arg5: memref<1x256xf32, #tpu.memory_space<vmem>>, %arg6: memref<256x128xf32, #tpu.memory_space<vmem>>, %arg7: memref<1x128xf32, #tpu.memory_space<vmem>>, %arg8: memref<128x128xf32, #tpu.memory_space<vmem>>, %arg9: memref<1x128xf32, #tpu.memory_space<vmem>>, %arg10: memref<16x128xf32, #tpu.memory_space<vmem>>, %arg11: memref<16x128xf32, #tpu.memory_space<vmem>>) attributes {dimension_semantics = [#tpu.dimension_semantics<parallel>, #tpu.dimension_semantics<arbitrary>], iteration_bounds = array<i64: 1, 1>, scalar_prefetch = 0 : i64, scratch_operands = 1 : i64, tpu.core_type = #tpu.core_type<tc>, window_params = [{transform_indices = @transform_0, window_bounds = array<i64: 16, 24>}, {transform_indices = @transform_1, window_bounds = array<i64: 600, 128>}, {pipeline_mode = #tpu.pipeline_mode<synchronous>, transform_indices = @transform_2, window_bounds = array<i64: 128, 256>}, {pipeline_mode = #tpu.pipeline_mode<synchronous>, transform_indices = @transform_3, window_bounds = array<i64: 1, 256>}, {pipeline_mode = #tpu.pipeline_mode<synchronous>, transform_indices = @transform_4, window_bounds = array<i64: 256, 128>}, {pipeline_mode = #tpu.pipeline_mode<synchronous>, transform_indices = @transform_5, window_bounds = array<i64: 1, 128>}, {pipeline_mode = #tpu.pipeline_mode<synchronous>, transform_indices = @transform_6, window_bounds = array<i64: 128, 128>}, {pipeline_mode = #tpu.pipeline_mode<synchronous>, transform_indices = @transform_7, window_bounds = array<i64: 1, 128>}, {transform_indices = @transform_8, window_bounds = array<i64: 16, 128>}]} {
    %c0_i32 = arith.constant 0 : i32
    %0 = arith.cmpi eq, %arg1, %c0_i32 : i32
    %1 = arith.extui %0 : i1 to i32
    %c0_i32_0 = arith.constant 0 : i32
    %2 = arith.cmpi ne, %1, %c0_i32_0 : i32
    scf.if %2 {
      %cst_11 = arith.constant 0.000000e+00 : f32
      %23 = vector.broadcast %cst_11 : f32 to vector<16x128xf32>
      %c0_12 = arith.constant 0 : index
      %c0_13 = arith.constant 0 : index
      %24 = vector.load %arg11[%c0_12, %c0_13] : memref<16x128xf32, #tpu.memory_space<vmem>>, vector<16x128xf32>
      tpu.vector_store %arg11[%c0_12, %c0_13], %23 {strides = array<i32>} : memref<16x128xf32, #tpu.memory_space<vmem>>, vector<16x128xf32>,
    } else {
    }
    %c0 = arith.constant 0 : index
    %c0_1 = arith.constant 0 : index
    %3 = vector.load %arg2[%c0, %c0_1] : memref<16x24xi32, #tpu.memory_space<vmem>>, vector<16x24xi32>
    %c600_i32 = arith.constant 600 : i32
    %4 = arith.muli %arg1, %c600_i32 : i32
    %5 = tpu.iota {dimensions = array<i32: 2>} : vector<1x1x600xi32>
    %6 = vector.broadcast %4 : i32 to vector<1x1x600xi32>
    %7 = arith.addi %6, %5 : vector<1x1x600xi32>
    %8 = vector.shape_cast %3 : vector<16x24xi32> to vector<16x24x1xi32>
    %9 = vector.broadcast %8 : vector<16x24x1xi32> to vector<16x24x600xi32>
    %10 = vector.broadcast %7 : vector<1x1x600xi32> to vector<16x24x600xi32>
    %11 = arith.cmpi eq, %9, %10 : vector<16x24x600xi32>
    %12 = arith.extui %11 : vector<16x24x600xi1> to vector<16x24x600xi32>
    %13 = arith.sitofp %12 : vector<16x24x600xi32> to vector<16x24x600xf32>
    %cst = arith.constant dense<0.000000e+00> : vector<16x600xf32>
    %14 = vector.multi_reduction <add>, %13, %cst [1] : vector<16x24x600xf32> to vector<16x600xf32>
    %c0_2 = arith.constant 0 : index
    %c0_3 = arith.constant 0 : index
    %15 = vector.load %arg11[%c0_2, %c0_3] : memref<16x128xf32, #tpu.memory_space<vmem>>, vector<16x128xf32>
    %c0_4 = arith.constant 0 : index
    %c0_5 = arith.constant 0 : index
    %16 = vector.load %arg3[%c0_4, %c0_5] : memref<600x128xf32, #tpu.memory_space<vmem>>, vector<600x128xf32>
    %cst_6 = arith.constant dense<0.000000e+00> : vector<16x128xf32>
    %17 = tpu.matmul %14, %16, %cst_6 {dimension_numbers = #tpu.dot_dimension_numbers<[1], [0], [0], [1], [0, 0, 1, 1], [], []>} : vector<16x600xf32>, vector<600x128xf32>, vector<16x128xf32> -> vector<16x128xf32>
    %18 = arith.addf %15, %17 : vector<16x128xf32>
    %c0_7 = arith.constant 0 : index
    %c0_8 = arith.constant 0 : index
    %19 = vector.load %arg11[%c0_7, %c0_8] : memref<16x128xf32, #tpu.memory_space<vmem>>, vector<16x128xf32>
    tpu.vector_store %arg11[%c0_7, %c0_8], %18 {strides = array<i32>} : memref<16x128xf32, #tpu.memory_space<vmem>>, vector<16x128xf32>,
    %c0_i32_9 = arith.constant 0 : i32
    %20 = arith.cmpi eq, %arg1, %c0_i32_9 : i32
    %21 = arith.extui %20 : i1 to i32
    %c0_i32_10 = arith.constant 0 : i32
    %22 = arith.cmpi ne, %21, %c0_i32_10 : i32
    scf.if %22 {
      %c0_i32_11 = arith.constant 0 : i32
      %23 = vector.broadcast %c0_i32_11 : i32 to vector<16x24xi32>
      %24 = arith.cmpi ne, %3, %23 : vector<16x24xi32>
      %25 = arith.extui %24 : vector<16x24xi1> to vector<16x24xi32>
      %26 = arith.sitofp %25 : vector<16x24xi32> to vector<16x24xf32>
      %cst_12 = arith.constant dense<0.000000e+00> : vector<16xf32>
      %27 = vector.multi_reduction <add>, %26, %cst_12 [1] : vector<16x24xf32> to vector<16xf32>
      %28 = vector.shape_cast %27 : vector<16xf32> to vector<16x1xf32>
      %cst_13 = arith.constant 1.000000e+00 : f32
      %29 = vector.broadcast %cst_13 : f32 to vector<16x1xf32>
      %30 = arith.maximumf %28, %29 : vector<16x1xf32>
      %c0_14 = arith.constant 0 : index
      %c0_15 = arith.constant 0 : index
      %31 = vector.load %arg11[%c0_14, %c0_15] : memref<16x128xf32, #tpu.memory_space<vmem>>, vector<16x128xf32>
      %32 = tpu.reciprocal %30 {approx = true} : vector<16x1xf32> -> vector<16x1xf32>
      %33 = vector.broadcast %32 : vector<16x1xf32> to vector<16x128xf32>
      %34 = arith.mulf %31, %33 : vector<16x128xf32>
      %c0_16 = arith.constant 0 : index
      %c0_17 = arith.constant 0 : index
      %35 = vector.load %arg4[%c0_16, %c0_17] : memref<128x256xf32, #tpu.memory_space<vmem>>, vector<128x256xf32>
      %cst_18 = arith.constant dense<0.000000e+00> : vector<16x256xf32>
      %36 = tpu.matmul %34, %35, %cst_18 {dimension_numbers = #tpu.dot_dimension_numbers<[1], [0], [0], [1], [0, 0, 1, 1], [], []>} : vector<16x128xf32>, vector<128x256xf32>, vector<16x256xf32> -> vector<16x256xf32>
      %c0_19 = arith.constant 0 : index
      %c0_20 = arith.constant 0 : index
      %37 = vector.load %arg5[%c0_19, %c0_20] : memref<1x256xf32, #tpu.memory_space<vmem>>, vector<1x256xf32>
      %38 = vector.broadcast %37 : vector<1x256xf32> to vector<16x256xf32>
      %39 = arith.addf %36, %38 : vector<16x256xf32>
      %cst_21 = arith.constant 0.000000e+00 : f32
      %40 = vector.broadcast %cst_21 : f32 to vector<16x256xf32>
      %41 = arith.maximumf %39, %40 : vector<16x256xf32>
      %c0_22 = arith.constant 0 : index
      %c0_23 = arith.constant 0 : index
      %42 = vector.load %arg6[%c0_22, %c0_23] : memref<256x128xf32, #tpu.memory_space<vmem>>, vector<256x128xf32>
      %cst_24 = arith.constant dense<0.000000e+00> : vector<16x128xf32>
      %43 = tpu.matmul %41, %42, %cst_24 {dimension_numbers = #tpu.dot_dimension_numbers<[1], [0], [0], [1], [0, 0, 1, 1], [], []>} : vector<16x256xf32>, vector<256x128xf32>, vector<16x128xf32> -> vector<16x128xf32>
      %c0_25 = arith.constant 0 : index
      %c0_26 = arith.constant 0 : index
      %44 = vector.load %arg7[%c0_25, %c0_26] : memref<1x128xf32, #tpu.memory_space<vmem>>, vector<1x128xf32>
      %45 = vector.broadcast %44 : vector<1x128xf32> to vector<16x128xf32>
      %46 = arith.addf %43, %45 : vector<16x128xf32>
      %cst_27 = arith.constant 0.000000e+00 : f32
      %47 = vector.broadcast %cst_27 : f32 to vector<16x128xf32>
      %48 = arith.maximumf %46, %47 : vector<16x128xf32>
      %c0_28 = arith.constant 0 : index
      %c0_29 = arith.constant 0 : index
      %49 = vector.load %arg8[%c0_28, %c0_29] : memref<128x128xf32, #tpu.memory_space<vmem>>, vector<128x128xf32>
      %cst_30 = arith.constant dense<0.000000e+00> : vector<16x128xf32>
      %50 = tpu.matmul %48, %49, %cst_30 {dimension_numbers = #tpu.dot_dimension_numbers<[1], [0], [0], [1], [0, 0, 1, 1], [], []>} : vector<16x128xf32>, vector<128x128xf32>, vector<16x128xf32> -> vector<16x128xf32>
      %c0_31 = arith.constant 0 : index
      %c0_32 = arith.constant 0 : index
      %51 = vector.load %arg9[%c0_31, %c0_32] : memref<1x128xf32, #tpu.memory_space<vmem>>, vector<1x128xf32>
      %52 = vector.broadcast %51 : vector<1x128xf32> to vector<16x128xf32>
      %53 = arith.addf %50, %52 : vector<16x128xf32>
      %54 = arith.negf %53 : vector<16x128xf32>
      %55 = math.exp %54 : vector<16x128xf32>
      %cst_33 = arith.constant 1.000000e+00 : f32
      %56 = vector.broadcast %cst_33 : f32 to vector<16x128xf32>
      %57 = arith.addf %56, %55 : vector<16x128xf32>
      %58 = arith.divf %56, %57 : vector<16x128xf32>
      %c0_34 = arith.constant 0 : index
      %c0_35 = arith.constant 0 : index
      %59 = vector.load %arg10[%c0_34, %c0_35] : memref<16x128xf32, #tpu.memory_space<vmem>>, vector<16x128xf32>
      tpu.vector_store %arg10[%c0_34, %c0_35], %58 {strides = array<i32>} : memref<16x128xf32, #tpu.memory_space<vmem>>, vector<16x128xf32>,
    } else {
    }
    return
  }
  func.func @transform_0(%arg0: i32, %arg1: i32) -> (i32, i32) {
    %c0_i32 = arith.constant 0 : i32
    %c0_i32_0 = arith.constant 0 : i32
    return %arg0, %c0_i32 : i32, i32
  }
  func.func @transform_1(%arg0: i32, %arg1: i32) -> (i32, i32) {
    %c0_i32 = arith.constant 0 : i32
    %c0_i32_0 = arith.constant 0 : i32
    return %arg1, %c0_i32 : i32, i32
  }
  func.func @transform_2(%arg0: i32, %arg1: i32) -> (i32, i32) {
    %c0_i32 = arith.constant 0 : i32
    %c0_i32_0 = arith.constant 0 : i32
    %c0_i32_1 = arith.constant 0 : i32
    return %c0_i32, %c0_i32_0 : i32, i32
  }
  func.func @transform_3(%arg0: i32, %arg1: i32) -> (i32, i32) {
    %c0_i32 = arith.constant 0 : i32
    %c0_i32_0 = arith.constant 0 : i32
    %c0_i32_1 = arith.constant 0 : i32
    return %c0_i32, %c0_i32_0 : i32, i32
  }
  func.func @transform_4(%arg0: i32, %arg1: i32) -> (i32, i32) {
    %c0_i32 = arith.constant 0 : i32
    %c0_i32_0 = arith.constant 0 : i32
    %c0_i32_1 = arith.constant 0 : i32
    return %c0_i32, %c0_i32_0 : i32, i32
  }
  func.func @transform_5(%arg0: i32, %arg1: i32) -> (i32, i32) {
    %c0_i32 = arith.constant 0 : i32
    %c0_i32_0 = arith.constant 0 : i32
    %c0_i32_1 = arith.constant 0 : i32
    return %c0_i32, %c0_i32_0 : i32, i32
  }
  func.func @transform_6(%arg0: i32, %arg1: i32) -> (i32, i32) {
    %c0_i32 = arith.constant 0 : i32
    %c0_i32_0 = arith.constant 0 : i32
    %c0_i32_1 = arith.constant 0 : i32
    return %c0_i32, %c0_i32_0 : i32, i32
  }
  func.func @transform_7(%arg0: i32, %arg1: i32) -> (i32, i32) {
    %c0_i32 = arith.constant 0 : i32
    %c0_i32_0 = arith.constant 0 : i32
    %c0_i32_1 = arith.constant 0 : i32
    return %c0_i32, %c0_i32_0 : i32, i32
  }
  func.func @transform_8(%arg0: i32, %arg1: i32) -> (i32, i32) {
    %c0_i32 = arith.constant 0 : i32
    %c0_i32_0 = arith.constant 0 : i32
    return %arg0, %c0_i32 : i32, i32
  }
}

</mosaic_0001>

<bundles_post_ra>
// kernel: tpu_custom_call.1
= control target key start
LH: loop header
LB: loop body
LE: loop exit
PB: predicated region body
PF: predicated region fallthrough
CT: control target
= control target key end

     0   :  { %13 = vsyncpa [#allocation4], 0  ;;  %s4546_s0 = inlined_call_operand.hbm [shape: s32[16,24], index: 0, kind: input, shape index: {}]   ;;  %s4547_s1 = inlined_call_operand.hbm [shape: f32[600,128], index: 1, kind: input, shape index: {}]   ;;  %s4548_s2 = inlined_call_operand.hbm [shape: f32[128,256], index: 2, kind: input, shape index: {}]   ;;  %s4549_s3 = inlined_call_operand.vmem [shape: f32[1,256], index: 3, kind: input, shape index: {}]   ;;  %s4550_s4 = inlined_call_operand.hbm [shape: f32[256,128], index: 4, kind: input, shape index: {}]   ;;  %s4551_s5 = inlined_call_operand.vmem [shape: f32[1,128], index: 5, kind: input, shape index: {}]   ;;  %s4552_s6 = inlined_call_operand.hbm [shape: f32[128,128], index: 6, kind: input, shape index: {}]   ;;  %s4553_s7 = inlined_call_operand.vmem [shape: f32[1,128], index: 7, kind: input, shape index: {}]   ;;  %s4554_s8 = inlined_call_operand.hbm [shape: f32[16,128], index: 8, kind: output, shape index: {}]  }
   0x1   :  { %14 = vsyncpa [#allocation7], 0 }
   0x2   :  { %15 = vsyncpa [#allocation10], 0 }
   0x3   :  { %16 = vsyncpa [#allocation5], 0  ;;  %s34_s29 = sshll.u32 %s4547_s1, 4  ;;  %s2977_s30 = smov [#allocation6]   ;;  %s35_s29 = int_to_ptr.hbm [resolvable:$true] %s34_s29 }
   0x4   :  { %s36_s9 = sshll.u32 %s2977_s30, 4  ;;  %s62_s12 = sshll.u32 %s4550_s4, 4  ;;  %s37_s9 = int_to_ptr.vmem [resolvable:$true] %s36_s9  ;;  %s63_s12 = int_to_ptr.hbm [resolvable:$true] %s62_s12 }
   0x5   :  { %s2978_s13 = smov 128   ;;  %s2979_s14 = smov 8  }
   0x6   :  { %42 = dma.hbm_to_vmem [thread:$0]  %s35_s29, 9600, %s37_s9, [#allocation7], %s2978_s13, %s2978_s13, %s2979_s14  }
   0x7   :  { %s2980_s15 = smov [#allocation9]   ;;  %s21_s1 = sshll.u32 %s4546_s0, 4  ;;  %s22_s1 = int_to_ptr.hbm [resolvable:$true] %s21_s1 }
   0x8   :  { %s64_s16 = sshll.u32 %s2980_s15, 4  ;;  %s47_s20 = sshll.u32 %s4548_s2, 4  ;;  %s65_s16 = int_to_ptr.vmem [resolvable:$true] %s64_s16  ;;  %s48_s20 = int_to_ptr.hbm [resolvable:$true] %s47_s20 }
   0x9   :  { %70 = dma.hbm_to_vmem [thread:$0]  %s63_s12, 4096, %s65_s16, [#allocation10], %s2978_s13, %s2978_s13, %s2979_s14  }
   0xa   :  { %s2981_s21 = smov [#allocation3]   ;;  %s2982_s23 = smov [#allocation8]  }
   0xb   :  { %s23_s22 = sshll.u32 %s2981_s21, 4  ;;  %s49_s0 = sshll.u32 %s2982_s23, 4  ;;  %s24_s22 = int_to_ptr.vmem [resolvable:$true] %s23_s22  ;;  %s50_s0 = int_to_ptr.vmem [resolvable:$true] %s49_s0 }
   0xc   :  { %29 = dma.hbm_to_vmem [thread:$0]  %s22_s1, 256, %s24_s22, [#allocation4], %s2978_s13, %s2978_s13, %s2979_s14  }
   0xd   :  { %s2983_s24 = smov 256   ;;  %s2984_s25 = smov 16  }
   0xe   :  { %55 = dma.hbm_to_vmem [thread:$0]  %s48_s20, 4096, %s50_s0, [#allocation7], %s2983_s24, %s2983_s24, %s2984_s25  }
   0xf   :  { %s77_s28 = sshll.u32 %s4552_s6, 4  ;;  %s2985_s2 = smov [#allocation11]   ;;  %s78_s28 = int_to_ptr.hbm [resolvable:$true] %s77_s28 }
  0x10   :  { %s79_s29 = sshll.u32 %s2985_s2, 4  ;;  %s80_s29 = int_to_ptr.vmem [resolvable:$true] %s79_s29 }
  0x11   :  { %85 = dma.hbm_to_vmem [thread:$0]  %s78_s28, 2048, %s80_s29, [#allocation10], %s2978_s13, %s2978_s13, %s2979_s14  }
  0x12   :  { %2969 = dma.done.wait [#allocation4], 256  }
  0x13   :  { %2970 = vsyncadd [#allocation4], 4294967040 }
  0x14   :  { %2971 = dma.done.wait [#allocation7], 13696  }
  0x15   :  { %2972 = vsyncadd [#allocation7], 4294953600 }
  0x16   :  { %2973 = dma.done.wait [#allocation10], 6144  }
  0x17   :  { %2974 = vsyncadd [#allocation10], 4294961152  ;;  %v117_v0 = vlaneseq  ;;  %v114_v3 = vld [vmem:[#allocation3] sm:$0xff]  ;;  %v3070_v8 = vld [vmem:[#allocation3 + $0x8] sm:$0xff]  ;;  %v4559_v22 = vmov 0.0   ;;  %vm1185_vm3 = vcmask 719872  }
  0x18   :  { %v167_v4 = vperm.slane %v114_v3, 2  ;;  %v148_v5 = vperm.slane %v114_v3, 1  ;;  %v129_v6 = vperm.slane %v114_v3, 0  ;;  %v243_v7 = vperm.slane %v114_v3, 6  ;;  %s2492_s16 = sshll.u32 %s4554_s8, 4  ;;  %s2493_s16 = int_to_ptr.hbm [resolvable:$true] %s2492_s16 }
  0x19   :  { %v3060_v1 = vshrl.u32 %v117_v0, 7  ;;  %v3073_v9 = vperm.slane %v3070_v8, 3  ;;  %v186_v11 = vperm.slane %v114_v3, 3  ;;  %v3084_v12 = vperm.slane %v3070_v8, 2 }
  0x1a   :  { %v205_v13 = vperm.slane %v114_v3, 4  ;;  %v3089_v14 = vperm.slane %v3070_v8, 5  ;;  %v224_v15 = vperm.slane %v114_v3, 5  ;;  %v262_v16 = vperm.slane %v114_v3, 7 }
  0x1b   :  { %2782 = vset.pattern.permute.xlu2 %v3060_v1  ;;  %2781 = vset.pattern.permute.xlu1 %v3060_v1  ;;  %v3065_v2 = vadd.s32 8, %v3060_v1  ;;  %v3077_v10 = vadd.s32 16, %v3060_v1  ;;  %v3097_v17 = vand.u32 127, %v117_v0  ;;  %v3139_v37 = vperm.slane %v3070_v8, 0 }
  0x1c   :  { %v3153_v45 = vperm.slane %v3070_v8, 1 }
  0x1d   :  { %2780 = vset.pattern.permute.xlu0 %v3065_v2  ;;  %v3101_v19 = vadd.s32 512, %v3097_v17  ;;  %v3104_v20 = vadd.s32 256, %v3097_v17  ;;  %v3107_v21 = vadd.s32 384, %v3097_v17  ;;  %v3132_v35 = vadd.s32 128, %v3097_v17 }
  0x23   :  { %172 = vperm.xlu2 %2782, %v167_v4   ;;  %153 = vperm.xlu1 %2781, %v148_v5  }
  0x25   :  { %140 = vperm.xlu0 %2780, %v129_v6  }
  0x2b   :  { %2784 = vset.pattern.permute.xlu2 %v3065_v2  ;;  %2783 = vset.pattern.permute.xlu1 %v3065_v2 }
  0x2d   :  { %254 = vperm.xlu0 %2780, %v243_v7  }
  0x33   :  { %178 = vperm.xlu2 %2784, %v167_v4   ;;  %159 = vperm.xlu1 %2783, %v148_v5  }
  0x35   :  { %349 = vperm.xlu0 %2780, %v3073_v9  }
  0x3b   :  { %2786 = vset.pattern.permute.xlu2 %v3077_v10  ;;  %2785 = vset.pattern.permute.xlu1 %v3077_v10 }
  0x3d   :  { %2800 = vset.pattern.permute.xlu0 %v3060_v1 }
  0x43   :  { %165 = vperm.xlu2 %2786, %v148_v5   ;;  %146 = vperm.xlu1 %2785, %v129_v6  }
  0x45   :  { %134 = vperm.xlu0 %2800, %v129_v6  }
  0x4b   :  { %184 = vperm.xlu2 %2786, %v167_v4   ;;  %2787 = vset.pattern.permute.xlu1 %v3065_v2 }
  0x4d   :  { %191 = vperm.xlu0 %2800, %v186_v11  }
  0x53   :  { %2789 = vset.pattern.permute.xlu2 %v3065_v2  ;;  %197 = vperm.xlu1 %2787, %v186_v11  }
  0x55   :  { %324 = vperm.xlu0 %2800, %v3084_v12  }
  0x5b   :  { %216 = vperm.xlu2 %2789, %v205_v13   ;;  %2788 = vset.pattern.permute.xlu1 %v3060_v1 }
  0x5d   :  { %381 = vperm.xlu0 %2800, %v3089_v14  }
  0x63   :  { %235 = vperm.xlu2 %2789, %v224_v15   ;;  %210 = vperm.xlu1 %2788, %v205_v13  }
  0x65   :  { %2803 = vset.pattern.permute.xlu0 %v3077_v10 }
  0x6b   :  { %2791 = vset.pattern.permute.xlu2 %v3060_v1  ;;  %229 = vperm.xlu1 %2788, %v224_v15  }
  0x6d   :  { %203 = vperm.xlu0 %2803, %v186_v11  }
  0x73   :  { %248 = vperm.xlu2 %2791, %v243_v7   ;;  %2790 = vset.pattern.permute.xlu1 %v3077_v10 }
  0x75   :  { %279 = vperm.xlu0 %2803, %v262_v16  }
  0x7b   :  { %267 = vperm.xlu2 %2791, %v262_v16   ;;  %222 = vperm.xlu1 %2790, %v205_v13  }
  0x7d   :  { %393 = vperm.xlu0 %2803, %v3089_v14   ;;  %v173_v18 = vpop.permute.xlu2 %172 }
  0x7e   :  { %vm467_vm0 = vcmp.eq.s32.totalorder %v173_v18, %v3101_v19  ;;  %vm465_vm1 = vcmp.eq.s32.totalorder %v173_v18, %v3104_v20  ;;  %vm466_vm2 = vcmp.eq.s32.totalorder %v173_v18, %v3107_v21  ;;  %vm463_vm7 = vcmp.eq.s32.totalorder %v173_v18, %v3097_v17 }
  0x7f   :  { %v2541_v23 = vsel %vm467_vm0, 1.0, %v4559_v22  ;;  %v2539_v25 = vsel %vm465_vm1, 1.0, %v4559_v22  ;;  %v2540_v26 = vsel %vm466_vm2, 1.0, %v4559_v22  ;;  %vm464_vm8 = vcmp.eq.s32.totalorder %v173_v18, %v3132_v35 }
  0x80   :  { %v1272_v27 = vsel %vm1185_vm3, %v2541_v23, 0.0  ;;  %v2537_v39 = vsel %vm463_vm7, 1.0, %v4559_v22  ;;  %v2538_v40 = vsel %vm464_vm8, 1.0, %v4559_v22 }
  0x83   :  { %2793 = vset.pattern.permute.xlu2 %v3077_v10  ;;  %241 = vperm.xlu1 %2790, %v224_v15  }
  0x8b   :  { %260 = vperm.xlu2 %2793, %v243_v7   ;;  %2792 = vset.pattern.permute.xlu1 %v3065_v2 }
  0x8d   :  { %v179_v24 = vpop.permute.xlu2 %178 }
  0x8e   :  { %vm470_vm4 = vcmp.eq.s32.totalorder %v179_v24, %v3104_v20  ;;  %vm471_vm5 = vcmp.eq.s32.totalorder %v179_v24, %v3107_v21  ;;  %vm472_vm6 = vcmp.eq.s32.totalorder %v179_v24, %v3101_v19  ;;  %vm468_vm9 = vcmp.eq.s32.totalorder %v179_v24, %v3097_v17 }
  0x8f   :  { %v2544_v28 = vsel %vm470_vm4, 1.0, %v4559_v22  ;;  %v2545_v29 = vsel %vm471_vm5, 1.0, %v4559_v22  ;;  %v2546_v30 = vsel %vm472_vm6, 1.0, %v4559_v22  ;;  %vm469_vm10 = vcmp.eq.s32.totalorder %v179_v24, %v3132_v35 }
  0x90   :  { %v3123_v31 = vadd.f32 %v2544_v28, %v2539_v25  ;;  %v3125_v32 = vadd.f32 %v2545_v29, %v2540_v26  ;;  %v1273_v33 = vsel %vm1185_vm3, %v2546_v30, 0.0  ;;  %v2542_v41 = vsel %vm468_vm9, 1.0, %v4559_v22 }
  0x91   :  { %v3128_v34 = vadd.f32 %v1273_v33, %v1272_v27  ;;  %v2543_v42 = vsel %vm469_vm10, 1.0, %v4559_v22  ;;  %v1240_v43 = vadd.f32 %v2542_v41, %v2537_v39 }
  0x92   :  { %v1248_v44 = vadd.f32 %v2543_v42, %v2538_v40 }
  0x93   :  { %2795 = vset.pattern.permute.xlu2 %v3065_v2  ;;  %273 = vperm.xlu1 %2792, %v262_v16  }
  0x95   :  { %v154_v36 = vpop.permute.xlu1 %153 }
  0x96   :  { %vm448_vm11 = vcmp.eq.s32.totalorder %v154_v36, %v3097_v17  ;;  %vm452_vm12 = vcmp.eq.s32.totalorder %v154_v36, %v3101_v19  ;;  %vm449_vm13 = vcmp.eq.s32.totalorder %v154_v36, %v3132_v35  ;;  %vm450_vm14 = vcmp.eq.s32.totalorder %v154_v36, %v3104_v20 }
  0x97   :  { %v141_v38 = vpop.permute.xlu0 %140  ;;  %vm451_vm0 = vcmp.eq.s32.totalorder %v154_v36, %v3107_v21  ;;  %v3157_v46 = vsel %vm448_vm11, 1.0, %v4559_v22  ;;  %v2526_v47 = vsel %vm452_vm12, 1.0, %v4559_v22  ;;  %v3162_v49 = vsel %vm449_vm13, 1.0, %v4559_v22 }
  0x98   :  { %vm442_vm15 = vcmp.eq.s32.totalorder %v141_v38, %v3101_v19  ;;  %vm438_vm1 = vcmp.eq.s32.totalorder %v141_v38, %v3097_v17  ;;  %v3165_v50 = vsel %vm450_vm14, 1.0, %v4559_v22  ;;  %vm439_vm2 = vcmp.eq.s32.totalorder %v141_v38, %v3132_v35 }
  0x99   :  { %vm440_vm4 = vcmp.eq.s32.totalorder %v141_v38, %v3104_v20  ;;  %vm441_vm7 = vcmp.eq.s32.totalorder %v141_v38, %v3107_v21  ;;  %v2516_v51 = vsel %vm442_vm15, 1.0, %v4559_v22  ;;  %v3174_v52 = vsel %vm451_vm0, 1.0, %v4559_v22 }
  0x9a   :  { %v3177_v53 = vsel %vm1185_vm3, %v2526_v47, 0.0  ;;  %v3181_v54 = vsel %vm438_vm1, 1.0, %v4559_v22  ;;  %v3187_v56 = vsel %vm439_vm2, 1.0, %v4559_v22  ;;  %v3193_v58 = vsel %vm440_vm4, 1.0, %v4559_v22 }
  0x9b   :  { %292 = vperm.xlu2 %2795, %v3139_v37   ;;  %2794 = vset.pattern.permute.xlu1 %v3060_v1  ;;  %v3196_v59 = vsel %vm441_vm7, 1.0, %v4559_v22  ;;  %v3199_v60 = vsel %vm1185_vm3, %v2516_v51, 0.0 }
  0x9d   :  { %v166_v48 = vpop.permute.xlu2 %165 }
  0x9e   :  { %vm458_vm5 = vcmp.eq.s32.totalorder %v166_v48, %v3097_v17  ;;  %vm462_vm6 = vcmp.eq.s32.totalorder %v166_v48, %v3101_v19  ;;  %vm459_vm8 = vcmp.eq.s32.totalorder %v166_v48, %v3132_v35  ;;  %vm460_vm9 = vcmp.eq.s32.totalorder %v166_v48, %v3104_v20 }
  0x9f   :  { %vm461_vm10 = vcmp.eq.s32.totalorder %v166_v48, %v3107_v21  ;;  %v2536_v55 = vsel %vm462_vm6, 1.0, %v4559_v22  ;;  %v3190_v57 = vsel %vm458_vm5, 1.0, %v4559_v22  ;;  %v3201_v61 = vpop.permute.xlu0 %254  ;;  %v3204_v62 = vsel %vm459_vm8, 1.0, %v4559_v22 }
  0xa0   :  { %vm528_vm11 = vcmp.eq.s32.totalorder %v3201_v61, %v3097_v17  ;;  %vm529_vm12 = vcmp.eq.s32.totalorder %v3201_v61, %v3132_v35  ;;  %vm530_vm13 = vcmp.eq.s32.totalorder %v3201_v61, %v3104_v20  ;;  %v3215_v63 = vsel %vm460_vm9, 1.0, %v4559_v22 }
  0xa1   :  { %v3218_v0 = vsel %vm461_vm10, 1.0, %v4559_v22  ;;  %v3221_v3 = vsel %vm1185_vm3, %v2536_v55, 0.0  ;;  %vm531_vm14 = vcmp.eq.s32.totalorder %v3201_v61, %v3107_v21  ;;  %v3226_v5 = vsel %vm528_vm11, 1.0, %v4559_v22 }
  0xa2   :  { %v3229_v6 = vsel %vm529_vm12, 1.0, %v4559_v22  ;;  %v3232_v7 = vsel %vm530_vm13, 1.0, %v4559_v22  ;;  %v3235_v11 = vsel %vm531_vm14, 1.0, %v4559_v22  ;;  %vm532_vm5 = vcmp.eq.s32.totalorder %v3201_v61, %v3101_v19 }
  0xa3   :  { %311 = vperm.xlu2 %2795, %v3153_v45   ;;  %286 = vperm.xlu1 %2794, %v3139_v37  }
  0xa5   :  { %v185_v4 = vpop.permute.xlu2 %184  ;;  %v160_v13 = vpop.permute.xlu1 %159 }
  0xa6   :  { %vm473_vm15 = vcmp.eq.s32.totalorder %v185_v4, %v3097_v17  ;;  %vm474_vm0 = vcmp.eq.s32.totalorder %v185_v4, %v3132_v35  ;;  %vm475_vm1 = vcmp.eq.s32.totalorder %v185_v4, %v3104_v20  ;;  %vm476_vm2 = vcmp.eq.s32.totalorder %v185_v4, %v3107_v21 }
  0xa7   :  { %vm477_vm4 = vcmp.eq.s32.totalorder %v185_v4, %v3101_v19  ;;  %v2547_v15 = vsel %vm473_vm15, 1.0, %v4559_v22  ;;  %v2548_v16 = vsel %vm474_vm0, 1.0, %v4559_v22  ;;  %v2549_v18 = vsel %vm475_vm1, 1.0, %v4559_v22 }
  0xa8   :  { %v2550_v23 = vsel %vm476_vm2, 1.0, %v4559_v22  ;;  %v2551_v24 = vsel %vm477_vm4, 1.0, %v4559_v22  ;;  %v1241_v25 = vadd.f32 %v2547_v15, %v1240_v43  ;;  %v1249_v26 = vadd.f32 %v2548_v16, %v1248_v44 }
  0xa9   :  { %v1257_v27 = vadd.f32 %v2549_v18, %v3123_v31  ;;  %v1265_v28 = vadd.f32 %v2550_v23, %v3125_v32  ;;  %v1275_v29 = vsel %vm1185_vm3, %v2551_v24, 0.0  ;;  %vm453_vm6 = vcmp.eq.s32.totalorder %v160_v13, %v3097_v17 }
  0xaa   :  { %v1242_v30 = vrot.slane %v1241_v25, 4  ;;  %v1250_v33 = vrot.slane %v1249_v26, 4  ;;  %v1276_v36 = vadd.f32 %v1275_v29, %v3128_v34  ;;  %vm454_vm7 = vcmp.eq.s32.totalorder %v160_v13, %v3132_v35 }
  0xab   :  { %v1258_v38 = vrot.slane %v1257_v27, 4  ;;  %v1266_v39 = vrot.slane %v1265_v28, 4  ;;  %vm455_vm8 = vcmp.eq.s32.totalorder %v160_v13, %v3104_v20  ;;  %vm456_vm9 = vcmp.eq.s32.totalorder %v160_v13, %v3107_v21  ;;  %2797 = vset.pattern.permute.xlu2 %v3077_v10  ;;  %305 = vperm.xlu1 %2794, %v3153_v45  }
  0xac   :  { %v1243_v31 = vadd.f32 %v1242_v30, %v1241_v25  ;;  %v1251_v32 = vadd.f32 %v1250_v33, %v1249_v26  ;;  %v1277_v40 = vrot.slane %v1276_v36, 4  ;;  %vm457_vm10 = vcmp.eq.s32.totalorder %v160_v13, %v3101_v19  ;;  %v350_v30 = vpop.permute.xlu0 %349 }
  0xad   :  { %v1259_v41 = vadd.f32 %v1258_v38, %v1257_v27  ;;  %v1267_v42 = vadd.f32 %v1266_v39, %v1265_v28  ;;  %v2527_v34 = vsel %vm453_vm6, 1.0, %v4559_v22  ;;  %v2528_v43 = vsel %vm454_vm7, 1.0, %v4559_v22 }
  0xae   :  { %v1244_v44 = vrot.slane %v1243_v31, 2  ;;  %v1252_v47 = vrot.slane %v1251_v32, 2  ;;  %v1278_v48 = vadd.f32 %v1277_v40, %v1276_v36  ;;  %v2529_v51 = vsel %vm455_vm8, 1.0, %v4559_v22 }
  0xaf   :  { %v1260_v55 = vrot.slane %v1259_v41, 2  ;;  %v1268_v4 = vrot.slane %v1267_v42, 2  ;;  %v2530_v15 = vsel %vm456_vm9, 1.0, %v4559_v22  ;;  %v2531_v16 = vsel %vm457_vm10, 1.0, %v4559_v22 }
  0xb0   :  { %v3269_v18 = vadd.f32 %v1244_v44, %v1243_v31  ;;  %v3271_v23 = vadd.f32 %v1252_v47, %v1251_v32  ;;  %v1279_v24 = vrot.slane %v1278_v48, 2  ;;  %v1197_v25 = vadd.f32 %v2527_v34, %v3157_v46 }
  0xb1   :  { %v3274_v26 = vadd.f32 %v1260_v55, %v1259_v41  ;;  %v3276_v27 = vadd.f32 %v1268_v4, %v1267_v42  ;;  %v1205_v28 = vadd.f32 %v2528_v43, %v3162_v49  ;;  %v1213_v29 = vadd.f32 %v2529_v51, %v3165_v50 }
  0xb2   :  { %v1280_v33 = vadd.f32 %v1279_v24, %v1278_v48  ;;  %v1198_v36 = vadd.f32 %v3190_v57, %v1197_v25  ;;  %v2606_v38 = vsel %vm532_vm5, 1.0, %v4559_v22  ;;  %v1221_v57 = vadd.f32 %v2530_v15, %v3174_v52 }
  0xb3   :  { %4574 = vst [vmem:[#allocation17_spill] sm:$0xff] %v3276_v27  ;;  %v1206_v31 = vadd.f32 %v3204_v62, %v1205_v28  ;;  %v1214_v49 = vadd.f32 %v3215_v63, %v1213_v29  ;;  %298 = vperm.xlu2 %2797, %v3139_v37   ;;  %2796 = vset.pattern.permute.xlu1 %v3065_v2  ;;  %v1230_v40 = vsel %vm1185_vm3, %v2531_v16, 0.0  ;;  %v3300_v37 = vsel %vm1185_vm3, %v2606_v38, 0.0 }
  0xb4   :  { %v1281_v50 = vrot.slane %v1280_v33, 1  ;;  %v1199_v32 = vrot.slane %v1198_v36, 4  ;;  %v1231_v34 = vadd.f32 %v1230_v40, %v3177_v53  ;;  %v1222_v63 = vadd.f32 %v3218_v0, %v1221_v57 }
  0xb5   :  { %v1207_v41 = vrot.slane %v1206_v31, 4  ;;  %v1215_v42 = vrot.slane %v1214_v49, 4  ;;  %vm603_vm11 = vcmp.eq.s32.totalorder %v350_v30, %v3097_v17  ;;  %vm604_vm12 = vcmp.eq.s32.totalorder %v350_v30, %v3132_v35  ;;  %v147_v29 = vpop.permute.xlu1 %146 }
  0xb6   :  { %v3296_v43 = vadd.f32 %v1281_v50, %v1280_v33  ;;  %v1200_v62 = vadd.f32 %v1199_v32, %v1198_v36  ;;  %v1233_v52 = vadd.f32 %v3221_v3, %v1231_v34  ;;  %v1223_v51 = vrot.slane %v1222_v63, 4 }
  0xb7   :  { %v1208_v44 = vadd.f32 %v1207_v41, %v1206_v31  ;;  %v1216_v47 = vadd.f32 %v1215_v42, %v1214_v49  ;;  %vm605_vm13 = vcmp.eq.s32.totalorder %v350_v30, %v3104_v20  ;;  %vm607_vm14 = vcmp.eq.s32.totalorder %v350_v30, %v3101_v19  ;;  %v135_v33 = vpop.permute.xlu0 %134 }
  0xb8   :  { %4575 = vst [vmem:[#allocation18_spill] sm:$0xff] %v3296_v43  ;;  %v1201_v48 = vrot.slane %v1200_v62, 2  ;;  %v1234_v4 = vrot.slane %v1233_v52, 4  ;;  %v1224_v15 = vadd.f32 %v1223_v51, %v1222_v63  ;;  %vm606_vm15 = vcmp.eq.s32.totalorder %v350_v30, %v3107_v21 }
  0xb9   :  { %v1209_v53 = vrot.slane %v1208_v44, 2  ;;  %v1217_v55 = vrot.slane %v1216_v47, 2  ;;  %v3311_v3 = vsel %vm603_vm11, 1.0, %v4559_v22  ;;  %v3318_v28 = vsel %vm604_vm12, 1.0, %v4559_v22 }
  0xba   :  { %v3307_v0 = vadd.f32 %v1201_v48, %v1200_v62  ;;  %4576 = vst [vmem:[#allocation19_spill] sm:$0xff] %v3311_v3  ;;  %v1235_v25 = vadd.f32 %v1234_v4, %v1233_v52  ;;  %v1225_v38 = vrot.slane %v1224_v15, 2  ;;  %v3326_v31 = vsel %vm605_vm13, 1.0, %v4559_v22  ;;  %v1885_v3 = vld [vmem:[#allocation6 + $0x148] sm:$0xff] }
  0xbb   :  { %v3313_v16 = vadd.f32 %v1209_v53, %v1208_v44  ;;  %v3315_v24 = vadd.f32 %v1217_v55, %v1216_v47  ;;  %4577 = vst [vmem:[#allocation20_spill] sm:$0xff] %v3318_v28  ;;  %2799 = vset.pattern.permute.xlu2 %v3060_v1  ;;  %330 = vperm.xlu1 %2796, %v3084_v12   ;;  %v2681_v49 = vsel %vm607_vm14, 1.0, %v4559_v22  ;;  %v3336_v40 = vsel %vm606_vm15, 1.0, %v4559_v22 }
  0xbc   :  { %4578 = vst [vmem:[#allocation21_spill] sm:$0xff] %v3326_v31  ;;  %v1236_v57 = vrot.slane %v1235_v25, 2  ;;  %v3338_v41 = vadd.f32 %v1225_v38, %v1224_v15  ;;  %vm443_vm0 = vcmp.eq.s32.totalorder %v147_v29, %v3097_v17  ;;  %vm444_vm1 = vcmp.eq.s32.totalorder %v147_v29, %v3132_v35 }
  0xbd   :  { %4579 = vst [vmem:[#allocation22_spill] sm:$0xff] %v3336_v40  ;;  %vm445_vm2 = vcmp.eq.s32.totalorder %v147_v29, %v3104_v20  ;;  %v3344_v34 = vsel %vm1185_vm3, %v2681_v49, 0.0  ;;  %vm446_vm4 = vcmp.eq.s32.totalorder %v147_v29, %v3107_v21  ;;  %vm447_vm5 = vcmp.eq.s32.totalorder %v147_v29, %v3101_v19 }
  0xbe   :  { %v1237_v42 = vadd.f32 %v1236_v57, %v1235_v25  ;;  %4580 = vst [vmem:[#allocation23_spill] sm:$0xff] %v3344_v34  ;;  %v2517_v62 = vsel %vm443_vm0, 1.0, %v4559_v22  ;;  %v2518_v63 = vsel %vm444_vm1, 1.0, %v4559_v22  ;;  %v2519_v44 = vsel %vm445_vm2, 1.0, %v4559_v22  ;;  %v1905_v34 = vld [vmem:[#allocation6 + $0x1e8] sm:$0xff] }
  0xbf   :  { %v2521_v52 = vsel %vm447_vm5, 1.0, %v4559_v22  ;;  %vm433_vm6 = vcmp.eq.s32.totalorder %v135_v33, %v3097_v17  ;;  %vm434_vm7 = vcmp.eq.s32.totalorder %v135_v33, %v3132_v35  ;;  %v2520_v48 = vsel %vm446_vm4, 1.0, %v4559_v22  ;;  %v3365_v15 = vpop.permute.xlu0 %191 }
  0xc0   :  { %v1238_v47 = vrot.slane %v1237_v42, 1  ;;  %vm435_vm8 = vcmp.eq.s32.totalorder %v135_v33, %v3104_v20  ;;  %vm436_vm9 = vcmp.eq.s32.totalorder %v135_v33, %v3107_v21  ;;  %vm437_vm10 = vcmp.eq.s32.totalorder %v135_v33, %v3101_v19 }
  0xc1   :  { %v1189_v51 = vsel %vm1185_vm3, %v2521_v52, 0.0  ;;  %v2507_v53 = vsel %vm433_vm6, 1.0, %v4559_v22  ;;  %v2508_v55 = vsel %vm434_vm7, 1.0, %v4559_v22  ;;  %v2509_v4 = vsel %vm435_vm8, 1.0, %v4559_v22 }
  0xc2   :  { %v2510_v25 = vsel %vm436_vm9, 1.0, %v4559_v22  ;;  %v2511_v29 = vsel %vm437_vm10, 1.0, %v4559_v22  ;;  %v1153_v33 = vadd.f32 %v3181_v54, %v2507_v53  ;;  %v1161_v38 = vadd.f32 %v3187_v56, %v2508_v55 }
  0xc3   :  { %343 = vperm.xlu2 %2799, %v3073_v9   ;;  %2798 = vset.pattern.permute.xlu1 %v3077_v10  ;;  %v3371_v49 = vadd.f32 %v1238_v47, %v1237_v42  ;;  %v1169_v57 = vadd.f32 %v3193_v58, %v2509_v4  ;;  %v1177_v52 = vadd.f32 %v3196_v59, %v2510_v25  ;;  %v1186_v61 = vsel %vm1185_vm3, %v2511_v29, 0.0 }
  0xc4   :  { %v1154_v39 = vadd.f32 %v2517_v62, %v1153_v33  ;;  %v1162_v32 = vadd.f32 %v2518_v63, %v1161_v38  ;;  %v1188_v46 = vadd.f32 %v3199_v60, %v1186_v61  ;;  %vm478_vm11 = vcmp.eq.s32.totalorder %v3365_v15, %v3097_v17 }
  0xc5   :  { %4581 = vst [vmem:[#allocation24_spill] sm:$0xff] %v3371_v49  ;;  %v198_v30 = vpop.permute.xlu1 %197  ;;  %v1170_v50 = vadd.f32 %v2519_v44, %v1169_v57  ;;  %v1178_v54 = vadd.f32 %v2520_v48, %v1177_v52  ;;  %v217_v44 = vpop.permute.xlu2 %216  ;;  %vm479_vm1 = vcmp.eq.s32.totalorder %v3365_v15, %v3132_v35  ;;  %vm480_vm2 = vcmp.eq.s32.totalorder %v3365_v15, %v3104_v20 }
  0xc6   :  { %vm483_vm12 = vcmp.eq.s32.totalorder %v198_v30, %v3097_v17  ;;  %vm484_vm13 = vcmp.eq.s32.totalorder %v198_v30, %v3132_v35  ;;  %v1155_v56 = vrot.slane %v1154_v39, 4  ;;  %v1163_v58 = vrot.slane %v1162_v32, 4 }
  0xc7   :  { %v1190_v42 = vadd.f32 %v1189_v51, %v1188_v46  ;;  %vm485_vm14 = vcmp.eq.s32.totalorder %v198_v30, %v3104_v20  ;;  %v1171_v59 = vrot.slane %v1170_v50, 4  ;;  %v1179_v47 = vrot.slane %v1178_v54, 4 }
  0xc8   :  { %vm486_vm15 = vcmp.eq.s32.totalorder %v198_v30, %v3107_v21  ;;  %vm487_vm0 = vcmp.eq.s32.totalorder %v198_v30, %v3101_v19  ;;  %v1156_v60 = vadd.f32 %v1155_v56, %v1154_v39  ;;  %v1164_v61 = vadd.f32 %v1163_v58, %v1162_v32 }
  0xc9   :  { %v1191_v62 = vrot.slane %v1190_v42, 4  ;;  %v2557_v63 = vsel %vm483_vm12, 1.0, %v4559_v22  ;;  %v1172_v48 = vadd.f32 %v1171_v59, %v1170_v50  ;;  %v1180_v53 = vadd.f32 %v1179_v47, %v1178_v54 }
  0xca   :  { %v2558_v46 = vsel %vm484_vm13, 1.0, %v4559_v22  ;;  %v2559_v51 = vsel %vm485_vm14, 1.0, %v4559_v22  ;;  %v1157_v55 = vrot.slane %v1156_v60, 2  ;;  %v1165_v4 = vrot.slane %v1164_v61, 2 }
  0xcb   :  { %317 = vperm.xlu1 %2798, %v3153_v45   ;;  %v1192_v25 = vadd.f32 %v1191_v62, %v1190_v42  ;;  %v2560_v39 = vsel %vm486_vm15, 1.0, %v4559_v22  ;;  %v1173_v32 = vrot.slane %v1172_v48, 2  ;;  %v1181_v29 = vrot.slane %v1180_v53, 2 }
  0xcc   :  { %v2561_v50 = vsel %vm487_vm0, 1.0, %v4559_v22  ;;  %v3396_v33 = vadd.f32 %v1157_v55, %v1156_v60  ;;  %v3398_v38 = vadd.f32 %v1165_v4, %v1164_v61  ;;  %vm481_vm4 = vcmp.eq.s32.totalorder %v3365_v15, %v3107_v21 }
  0xcd   :  { %v1193_v57 = vrot.slane %v1192_v25, 2  ;;  %v3402_v45 = vadd.f32 %v1173_v32, %v1172_v48  ;;  %v3404_v52 = vadd.f32 %v1181_v29, %v1180_v53  ;;  %vm482_vm5 = vcmp.eq.s32.totalorder %v3365_v15, %v3101_v19 }
  0xce   :  { %v1316_v56 = vsel %vm1185_vm3, %v2561_v50, 0.0  ;;  %v2552_v58 = vsel %vm478_vm11, 1.0, %v4559_v22  ;;  %v2553_v47 = vsel %vm479_vm1, 1.0, %v4559_v22  ;;  %v2554_v60 = vsel %vm480_vm2, 1.0, %v4559_v22  ;;  %v325_v50 = vpop.permute.xlu0 %324 }
  0xcf   :  { %v1194_v54 = vadd.f32 %v1193_v57, %v1192_v25  ;;  %v2555_v48 = vsel %vm481_vm4, 1.0, %v4559_v22  ;;  %v2556_v53 = vsel %vm482_vm5, 1.0, %v4559_v22  ;;  %v3423_v55 = vadd.f32 %v2557_v63, %v2552_v58  ;;  %v236_v57 = vpop.permute.xlu2 %235 }
  0xd0   :  { %v3425_v4 = vadd.f32 %v2558_v46, %v2553_v47  ;;  %v3427_v15 = vadd.f32 %v2559_v51, %v2554_v60  ;;  %v1315_v25 = vsel %vm1185_vm3, %v2556_v53, 0.0  ;;  %v3431_v32 = vadd.f32 %v2560_v39, %v2555_v48 }
  0xd1   :  { %v1195_v62 = vrot.slane %v1194_v54, 1  ;;  %v3433_v29 = vadd.f32 %v1316_v56, %v1315_v25  ;;  %vm498_vm6 = vcmp.eq.s32.totalorder %v217_v44, %v3097_v17  ;;  %vm499_vm7 = vcmp.eq.s32.totalorder %v217_v44, %v3132_v35 }
  0xd2   :  { %vm500_vm8 = vcmp.eq.s32.totalorder %v217_v44, %v3104_v20  ;;  %vm501_vm9 = vcmp.eq.s32.totalorder %v217_v44, %v3107_v21  ;;  %vm502_vm10 = vcmp.eq.s32.totalorder %v217_v44, %v3101_v19  ;;  %v2573_v46 = vsel %vm499_vm7, 1.0, %v4559_v22 }
  0xd3   :  { %336 = vperm.xlu1 %2798, %v3084_v12   ;;  %v3437_v63 = vadd.f32 %v1195_v62, %v1194_v54  ;;  %v2572_v12 = vsel %vm498_vm6, 1.0, %v4559_v22  ;;  %v2574_v51 = vsel %vm500_vm8, 1.0, %v4559_v22  ;;  %v2576_v39 = vsel %vm502_vm10, 1.0, %v4559_v22 }
  0xd4   :  { %v2575_v56 = vsel %vm501_vm9, 1.0, %v4559_v22  ;;  %v3448_v58 = vperm.slane %v3070_v8, 4  ;;  %vm583_vm11 = vcmp.eq.s32.totalorder %v325_v50, %v3097_v17  ;;  %vm584_vm12 = vcmp.eq.s32.totalorder %v325_v50, %v3132_v35 }
  0xd5   :  { %4582 = vst [vmem:[#allocation25_spill] sm:$0xff] %v3437_v63  ;;  %v1359_v54 = vsel %vm1185_vm3, %v2576_v39, 0.0  ;;  %vm585_vm13 = vcmp.eq.s32.totalorder %v325_v50, %v3104_v20  ;;  %vm586_vm14 = vcmp.eq.s32.totalorder %v325_v50, %v3107_v21  ;;  %vm587_vm15 = vcmp.eq.s32.totalorder %v325_v50, %v3101_v19  ;;  %v211_v62 = vpop.permute.xlu1 %210 }
  0xd6   :  { %362 = vperm.xlu2 %2799, %v3448_v58   ;;  %v3458_v44 = vsel %vm583_vm11, 1.0, %v4559_v22  ;;  %v3461_v8 = vsel %vm584_vm12, 1.0, %v4559_v22  ;;  %v3464_v47 = vsel %vm585_vm13, 1.0, %v4559_v22  ;;  %v2661_v60 = vsel %vm587_vm15, 1.0, %v4559_v22  ;;  %v382_v13 = vpop.permute.xlu0 %381 }
  0xd7   :  { %4583 = vst [vmem:[#allocation26_spill] sm:$0xff] %v3458_v44  ;;  %v3468_v48 = vsel %vm586_vm14, 1.0, %v4559_v22  ;;  %vm513_vm0 = vcmp.eq.s32.totalorder %v236_v57, %v3097_v17  ;;  %vm514_vm1 = vcmp.eq.s32.totalorder %v236_v57, %v3132_v35  ;;  %vm515_vm2 = vcmp.eq.s32.totalorder %v236_v57, %v3104_v20  ;;  %v249_v36 = vpop.permute.xlu2 %248  ;;  %v1889_v44 = vld [vmem:[#allocation6 + $0x168] sm:$0xff] }
  0xd8   :  { %4584 = vst [vmem:[#allocation27_spill] sm:$0xff] %v3461_v8  ;;  %v3474_v53 = vsel %vm1185_vm3, %v2661_v60, 0.0  ;;  %vm516_vm4 = vcmp.eq.s32.totalorder %v236_v57, %v3107_v21  ;;  %vm517_vm5 = vcmp.eq.s32.totalorder %v236_v57, %v3101_v19  ;;  %v3479_v25 = vsel %vm513_vm0, 1.0, %v4559_v22 }
  0xd9   :  { %4585 = vst [vmem:[#allocation28_spill] sm:$0xff] %v3464_v47  ;;  %v3483_v50 = vsel %vm514_vm1, 1.0, %v4559_v22  ;;  %v3486_v39 = vsel %vm515_vm2, 1.0, %v4559_v22  ;;  %v2591_v61 = vsel %vm517_vm5, 1.0, %v4559_v22  ;;  %vm493_vm6 = vcmp.eq.s32.totalorder %v211_v62, %v3097_v17 }
  0xda   :  { %4586 = vst [vmem:[#allocation29_spill] sm:$0xff] %v3468_v48  ;;  %v3491_v60 = vsel %vm516_vm4, 1.0, %v4559_v22  ;;  %vm494_vm7 = vcmp.eq.s32.totalorder %v211_v62, %v3132_v35  ;;  %vm495_vm8 = vcmp.eq.s32.totalorder %v211_v62, %v3104_v20  ;;  %vm496_vm9 = vcmp.eq.s32.totalorder %v211_v62, %v3107_v21 }
  0xdb   :  { %4587 = vst [vmem:[#allocation30_spill] sm:$0xff] %v3474_v53  ;;  %2801 = vset.pattern.permute.xlu1 %v3065_v2  ;;  %vm497_vm10 = vcmp.eq.s32.totalorder %v211_v62, %v3101_v19  ;;  %v2567_v57 = vsel %vm493_vm6, 1.0, %v4559_v22  ;;  %v2568_v59 = vsel %vm494_vm7, 1.0, %v4559_v22  ;;  %v2569_v42 = vsel %vm495_vm8, 1.0, %v4559_v22 }
  0xdc   :  { %v3501_v30 = vsel %vm1185_vm3, %v2591_v61, 0.0  ;;  %v2570_v43 = vsel %vm496_vm9, 1.0, %v4559_v22  ;;  %v2571_v49 = vsel %vm497_vm10, 1.0, %v4559_v22  ;;  %v3505_v63 = vadd.f32 %v2572_v12, %v2567_v57 }
  0xdd   :  { %v3507_v47 = vadd.f32 %v2573_v46, %v2568_v59  ;;  %v3509_v62 = vadd.f32 %v2574_v51, %v2569_v42  ;;  %v1358_v53 = vsel %vm1185_vm3, %v2571_v49, 0.0  ;;  %vm628_vm11 = vcmp.eq.s32.totalorder %v382_v13, %v3097_v17 }
  0xde   :  { %2802 = vset.pattern.permute.xlu2 %v3077_v10  ;;  %v3514_v48 = vadd.f32 %v1359_v54, %v1358_v53  ;;  %vm629_vm12 = vcmp.eq.s32.totalorder %v382_v13, %v3132_v35  ;;  %vm630_vm13 = vcmp.eq.s32.totalorder %v382_v13, %v3104_v20  ;;  %vm631_vm14 = vcmp.eq.s32.totalorder %v382_v13, %v3107_v21 }
  0xdf   :  { %v3519_v61 = vadd.f32 %v2575_v56, %v2570_v43  ;;  %vm632_vm15 = vcmp.eq.s32.totalorder %v382_v13, %v3101_v19  ;;  %v3523_v42 = vsel %vm628_vm11, 1.0, %v4559_v22  ;;  %v3526_v49 = vsel %vm629_vm12, 1.0, %v4559_v22  ;;  %v230_v13 = vpop.permute.xlu1 %229 }
  0xe0   :  { %4588 = vst [vmem:[#allocation31_spill] sm:$0xff] %v3523_v42  ;;  %v3529_v59 = vsel %vm630_vm13, 1.0, %v4559_v22  ;;  %v2706_v12 = vsel %vm632_vm15, 1.0, %v4559_v22  ;;  %vm523_vm0 = vcmp.eq.s32.totalorder %v249_v36, %v3097_v17  ;;  %vm524_vm1 = vcmp.eq.s32.totalorder %v249_v36, %v3132_v35 }
  0xe1   :  { %4589 = vst [vmem:[#allocation32_spill] sm:$0xff] %v3526_v49  ;;  %v3536_v43 = vsel %vm631_vm14, 1.0, %v4559_v22  ;;  %vm525_vm2 = vcmp.eq.s32.totalorder %v249_v36, %v3104_v20  ;;  %vm526_vm4 = vcmp.eq.s32.totalorder %v249_v36, %v3107_v21  ;;  %vm527_vm5 = vcmp.eq.s32.totalorder %v249_v36, %v3101_v19 }
  0xe2   :  { %4590 = vst [vmem:[#allocation33_spill] sm:$0xff] %v3529_v59  ;;  %v3542_v46 = vsel %vm1185_vm3, %v2706_v12, 0.0  ;;  %v2597_v51 = vsel %vm523_vm0, 1.0, %v4559_v22  ;;  %v2598_v56 = vsel %vm524_vm1, 1.0, %v4559_v22  ;;  %v2599_v54 = vsel %vm525_vm2, 1.0, %v4559_v22 }
  0xe3   :  { %368 = vperm.xlu1 %2801, %v3448_v58   ;;  %4591 = vst [vmem:[#allocation34_spill] sm:$0xff] %v3536_v43  ;;  %v2600_v53 = vsel %vm526_vm4, 1.0, %v4559_v22  ;;  %v2601_v57 = vsel %vm527_vm5, 1.0, %v4559_v22  ;;  %v3550_v43 = vadd.f32 %v3226_v5, %v2597_v51  ;;  %v3553_v59 = vadd.f32 %v3229_v6, %v2598_v56  ;;  %v204_v5 = vpop.permute.xlu0 %203  ;;  %v3567_v6 = vpop.permute.xlu2 %267 }
  0xe4   :  { %4592 = vst [vmem:[#allocation35_spill] sm:$0xff] %v3542_v46  ;;  %v3556_v36 = vadd.f32 %v3232_v7, %v2599_v54  ;;  %v1444_v12 = vsel %vm1185_vm3, %v2601_v57, 0.0  ;;  %vm508_vm6 = vcmp.eq.s32.totalorder %v230_v13, %v3097_v17  ;;  %vm509_vm7 = vcmp.eq.s32.totalorder %v230_v13, %v3132_v35  ;;  %v1859_v54 = vld [vmem:[#allocation6 + $0x78] sm:$0xff] }
  0xe5   :  { %v3562_v46 = vadd.f32 %v3300_v37, %v1444_v12  ;;  %vm510_vm8 = vcmp.eq.s32.totalorder %v230_v13, %v3104_v20  ;;  %vm511_vm9 = vcmp.eq.s32.totalorder %v230_v13, %v3107_v21  ;;  %vm512_vm10 = vcmp.eq.s32.totalorder %v230_v13, %v3101_v19  ;;  %v1875_v57 = vld [vmem:[#allocation6 + $0xf8] sm:$0xff]  ;;  %2088 = vmatpush.msra.mxu0 %v1859_v54 }
  0xe6   :  { %v3570_v7 = vadd.f32 %v3235_v11, %v2600_v53  ;;  %355 = vperm.xlu2 %2802, %v3073_v9   ;;  %v2582_v51 = vsel %vm508_vm6, 1.0, %v4559_v22  ;;  %v2583_v56 = vsel %vm509_vm7, 1.0, %v4559_v22  ;;  %v2584_v37 = vsel %vm510_vm8, 1.0, %v4559_v22  ;;  %2111 = vmatpush.msra.mxu1 %v1875_v57  ;;  %v1891_v9 = vld [vmem:[#allocation6 + $0x178] sm:$0xff] }
  0xe7   :  { %v2585_v12 = vsel %vm511_vm9, 1.0, %v4559_v22  ;;  %v2586_v13 = vsel %vm512_vm10, 1.0, %v4559_v22  ;;  %v3579_v49 = vadd.f32 %v3479_v25, %v2582_v51  ;;  %v3582_v11 = vadd.f32 %v3483_v50, %v2583_v56  ;;  %v1907_v53 = vld [vmem:[#allocation6 + $0x1f8] sm:$0xff]  ;;  %2134 = vmatpush.msra.mxu2 %v1891_v9  ;;  %v1858_v25 = vld [vmem:[#allocation6 + $0x70] sm:$0xff] }
  0xe8   :  { %v3585_v42 = vadd.f32 %v3486_v39, %v2584_v37  ;;  %v1401_v8 = vsel %vm1185_vm3, %v2586_v13, 0.0  ;;  %vm488_vm11 = vcmp.eq.s32.totalorder %v204_v5, %v3097_v17  ;;  %vm489_vm12 = vcmp.eq.s32.totalorder %v204_v5, %v3132_v35  ;;  %v1874_v51 = vld [vmem:[#allocation6 + $0xf0] sm:$0xff]  ;;  %2157 = vmatpush.msra.mxu3 %v1907_v53  ;;  %2089 = vmatpush.msra.mxu0 %v1858_v25  ;;  %v1888_v25 = vld [vmem:[#allocation6 + $0x160] sm:$0xff] }
  0xe9   :  { %v1890_v50 = vld [vmem:[#allocation6 + $0x170] sm:$0xff]  ;;  %v3592_v56 = vadd.f32 %v3501_v30, %v1401_v8  ;;  %vm490_vm13 = vcmp.eq.s32.totalorder %v204_v5, %v3104_v20  ;;  %vm491_vm14 = vcmp.eq.s32.totalorder %v204_v5, %v3107_v21  ;;  %vm492_vm15 = vcmp.eq.s32.totalorder %v204_v5, %v3101_v19  ;;  %2112 = vmatpush.msra.mxu1 %v1874_v51  ;;  %v1857_v30 = vld [vmem:[#allocation6 + $0x68] sm:$0xff] }
  0xea   :  { %v1906_v39 = vld [vmem:[#allocation6 + $0x1f0] sm:$0xff]  ;;  %v2562_v37 = vsel %vm488_vm11, 1.0, %v4559_v22  ;;  %v2563_v54 = vsel %vm489_vm12, 1.0, %v4559_v22  ;;  %v2565_v57 = vsel %vm491_vm14, 1.0, %v4559_v22  ;;  %v1873_v8 = vld [vmem:[#allocation6 + $0xe8] sm:$0xff]  ;;  %v2566_v13 = vsel %vm492_vm15, 1.0, %v4559_v22  ;;  %2135 = vmatpush.msra.mxu2 %v1890_v50  ;;  %2090 = vmatpush.msra.mxu0 %v1857_v30 }
  0xeb   :  { %387 = vperm.xlu1 %2801, %v3089_v14   ;;  %v2564_v14 = vsel %vm490_vm13, 1.0, %v4559_v22  ;;  %v1284_v9 = vadd.f32 %v2562_v37, %v3423_v55  ;;  %v1292_v5 = vadd.f32 %v2563_v54, %v3425_v4  ;;  %2158 = vmatpush.msra.mxu3 %v1906_v39  ;;  %v1308_v40 = vadd.f32 %v2565_v57, %v3431_v32  ;;  %v1856_v55 = vld [vmem:[#allocation6 + $0x60] sm:$0xff]  ;;  %v1871_v57 = vld [vmem:[#allocation6 + $0xd8] sm:$0xff] }
  0xec   :  { %v1300_v53 = vadd.f32 %v2564_v14, %v3427_v15  ;;  %v1318_v31 = vsel %vm1185_vm3, %v2566_v13, 0.0  ;;  %vm538_vm0 = vcmp.eq.s32.totalorder %v3567_v6, %v3097_v17  ;;  %vm539_vm1 = vcmp.eq.s32.totalorder %v3567_v6, %v3132_v35  ;;  %2113 = vmatpush.msra.mxu1 %v1873_v8  ;;  %v1872_v4 = vld [vmem:[#allocation6 + $0xe0] sm:$0xff]  ;;  %2136 = vmatpush.msra.mxu2 %v1889_v44  ;;  %v1855_v14 = vld [vmem:[#allocation6 + $0x58] sm:$0xff]  ;;  %v261_v44 = vpop.permute.xlu2 %260 }
  0xed   :  { %v1285_v15 = vrot.slane %v1284_v9, 4  ;;  %v1293_v51 = vrot.slane %v1292_v5, 4  ;;  %v1319_v39 = vadd.f32 %v1318_v31, %v3433_v29  ;;  %2159 = vmatpush.msra.mxu3 %v1905_v34  ;;  %v1904_v32 = vld [vmem:[#allocation6 + $0x1e0] sm:$0xff]  ;;  %v3613_v37 = vadd.f32 %v3491_v60, %v2585_v12  ;;  %2091 = vmatpush.msra.mxu0 %v1856_v55  ;;  %v1887_v60 = vld [vmem:[#allocation6 + $0x158] sm:$0xff] }
  0xee   :  { %v1301_v50 = vrot.slane %v1300_v53, 4  ;;  %v1309_v54 = vrot.slane %v1308_v40, 4  ;;  %vm540_vm2 = vcmp.eq.s32.totalorder %v3567_v6, %v3104_v20  ;;  %vm541_vm4 = vcmp.eq.s32.totalorder %v3567_v6, %v3107_v21  ;;  %374 = vperm.xlu2 %2802, %v3448_v58   ;;  %2114 = vmatpush.msra.mxu1 %v1872_v4  ;;  %v1903_v12 = vld [vmem:[#allocation6 + $0x1d8] sm:$0xff] }
  0xef   :  { %v1286_v30 = vadd.f32 %v1285_v15, %v1284_v9  ;;  %v1294_v31 = vadd.f32 %v1293_v51, %v1292_v5  ;;  %v1320_v34 = vrot.slane %v1319_v39, 4  ;;  %2137 = vmatpush.msra.mxu2 %v1888_v25  ;;  %vm542_vm5 = vcmp.eq.s32.totalorder %v3567_v6, %v3101_v19  ;;  %2160 = vmatpush.msra.mxu3 %v1904_v32  ;;  %v1854_v9 = vld [vmem:[#allocation6 + $0x50] sm:$0xff]  ;;  %v3635_v25 = vpop.permute.xlu1 %222  ;;  %v1869_v32 = vld [vmem:[#allocation6 + $0xc8] sm:$0xff]  ;;  %v1868_v6 = vld [vmem:[#allocation6 + $0xc0] sm:$0xff] }
  0xf0   :  { %v1302_v29 = vadd.f32 %v1301_v50, %v1300_v53  ;;  %v1310_v8 = vadd.f32 %v1309_v54, %v1308_v40  ;;  %v3626_v58 = vsel %vm538_vm0, 1.0, %v4559_v22  ;;  %v3632_v13 = vsel %vm539_vm1, 1.0, %v4559_v22  ;;  %v1870_v40 = vld [vmem:[#allocation6 + $0xd0] sm:$0xff]  ;;  %2092 = vmatpush.msra.mxu0 %v1855_v14  ;;  %2115 = vmatpush.msra.mxu1 %v1871_v57 }
  0xf1   :  { %v1287_v5 = vrot.slane %v1286_v30, 2  ;;  %v1295_v53 = vrot.slane %v1294_v31, 2  ;;  %v1321_v4 = vadd.f32 %v1320_v34, %v1319_v39  ;;  %v1886_v15 = vld [vmem:[#allocation6 + $0x150] sm:$0xff]  ;;  %v3641_v54 = vsel %vm540_vm2, 1.0, %v4559_v22  ;;  %2138 = vmatpush.msra.mxu2 %v1887_v60  ;;  %2161 = vmatpush.msra.mxu3 %v1903_v12  ;;  %v1853_v39 = vld [vmem:[#allocation6 + $0x48] sm:$0xff] }
  0xf2   :  { %v1303_v55 = vrot.slane %v1302_v29, 2  ;;  %v1902_v51 = vld [vmem:[#allocation6 + $0x1d0] sm:$0xff]  ;;  %v1311_v50 = vrot.slane %v1310_v8, 2  ;;  %vm533_vm6 = vcmp.eq.s32.totalorder %v261_v44, %v3097_v17  ;;  %2093 = vmatpush.msra.mxu0 %v1854_v9  ;;  %2116 = vmatpush.msra.mxu1 %v1870_v40  ;;  %v2616_v60 = vsel %vm542_vm5, 1.0, %v4559_v22 }
  0xf3   :  { %2804 = vset.pattern.permute.xlu1 %v3060_v1  ;;  %v3647_v1 = vsel %vm541_vm4, 1.0, %v4559_v22  ;;  %v3650_v14 = vadd.f32 %v1287_v5, %v1286_v30  ;;  %v3652_v57 = vadd.f32 %v1295_v53, %v1294_v31  ;;  %v1322_v28 = vrot.slane %v1321_v4, 2  ;;  %2139 = vmatpush.msra.mxu2 %v1886_v15  ;;  %v1901_v30 = vld [vmem:[#allocation6 + $0x1c8] sm:$0xff]  ;;  %v1852_v31 = vld [vmem:[#allocation6 + $0x40] sm:$0xff] }
  0xf4   :  { %v3654_v34 = vadd.f32 %v1303_v55, %v1302_v29  ;;  %v3656_v27 = vadd.f32 %v1311_v50, %v1310_v8  ;;  %vm534_vm7 = vcmp.eq.s32.totalorder %v261_v44, %v3132_v35  ;;  %vm535_vm8 = vcmp.eq.s32.totalorder %v261_v44, %v3104_v20  ;;  %2162 = vmatpush.msra.mxu3 %v1902_v51  ;;  %v1884_v8 = vld [vmem:[#allocation6 + $0x140] sm:$0xff]  ;;  %v1851_v55 = vld [vmem:[#allocation6 + $0x38] sm:$0xff] }
  0xf5   :  { %v3664_v29 = vadd.f32 %v1322_v28, %v1321_v4  ;;  %vm536_vm9 = vcmp.eq.s32.totalorder %v261_v44, %v3107_v21  ;;  %vm537_vm10 = vcmp.eq.s32.totalorder %v261_v44, %v3101_v19  ;;  %v2607_v12 = vsel %vm533_vm6, 1.0, %v4559_v22  ;;  %2094 = vmatpush.msra.mxu0 %v1853_v39  ;;  %2117 = vmatpush.msra.mxu1 %v1869_v32  ;;  %v1900_v53 = vld [vmem:[#allocation6 + $0x1c0] sm:$0xff]  ;;  %v1867_v50 = vld [vmem:[#allocation6 + $0xb8] sm:$0xff] }
  0xf6   :  { %v2608_v9 = vsel %vm534_vm7, 1.0, %v4559_v22  ;;  %v2609_v40 = vsel %vm535_vm8, 1.0, %v4559_v22  ;;  %v2610_v5 = vsel %vm536_vm9, 1.0, %v4559_v22  ;;  %v2611_v28 = vsel %vm537_vm10, 1.0, %v4559_v22  ;;  %2805 = vset.pattern.permute.xlu2 %v3065_v2  ;;  %2140 = vmatpush.msra.mxu2 %v1885_v3  ;;  %v1883_v39 = vld [vmem:[#allocation6 + $0x138] sm:$0xff]  ;;  %v1864_v32 = vld [vmem:[#allocation6 + $0xa0] sm:$0xff] }
  0xf7   :  { %4593 = vst [vmem:[#allocation36_spill] sm:$0xff] %v3664_v29  ;;  %v3677_v44 = vsel %vm1185_vm3, %v2616_v60, 0.0  ;;  %v3680_v4 = vadd.f32 %v2607_v12, %v3550_v43  ;;  %v3683_v15 = vadd.f32 %v2608_v9, %v3553_v59  ;;  %v3686_v51 = vadd.f32 %v2609_v40, %v3556_v36  ;;  %2163 = vmatpush.msra.mxu3 %v1901_v30  ;;  %v1899_v59 = vld [vmem:[#allocation6 + $0x1b8] sm:$0xff]  ;;  %v1850_v43 = vld [vmem:[#allocation6 + $0x30] sm:$0xff]  ;;  %v1880_v29 = vld [vmem:[#allocation6 + $0x120] sm:$0xff] }
  0xf8   :  { %2095 = vmatpush.msra.mxu0 %v1852_v31  ;;  %v3689_v2 = vadd.f32 %v2610_v5, %v3570_v7  ;;  %v1447_v3 = vsel %vm1185_vm3, %v2611_v28, 0.0  ;;  %vm503_vm11 = vcmp.eq.s32.totalorder %v3635_v25, %v3097_v17  ;;  %vm504_vm12 = vcmp.eq.s32.totalorder %v3635_v25, %v3132_v35  ;;  %2118 = vmatpush.msra.mxu1 %v1868_v6  ;;  %v1866_v30 = vld [vmem:[#allocation6 + $0xb0] sm:$0xff]  ;;  %v3717_v28 = vpop.permute.xlu1 %241 }
  0xf9   :  { %2141 = vmatpush.msra.mxu2 %v1884_v8  ;;  %v1448_v7 = vadd.f32 %v1447_v3, %v3562_v46  ;;  %2164 = vmatpush.msra.mxu3 %v1900_v53  ;;  %v1882_v31 = vld [vmem:[#allocation6 + $0x130] sm:$0xff]  ;;  %vm505_vm13 = vcmp.eq.s32.totalorder %v3635_v25, %v3104_v20  ;;  %vm506_vm14 = vcmp.eq.s32.totalorder %v3635_v25, %v3107_v21  ;;  %v1849_v8 = vld [vmem:[#allocation6 + $0x28] sm:$0xff]  ;;  %v2577_v9 = vsel %vm503_vm11, 1.0, %v4559_v22  ;;  %v1848_v46 = vld [vmem:[#allocation6 + $0x20] sm:$0xff] }
  0xfa   :  { %4594 = vst [vmem:[#allocation37_spill] sm:$0xff] %v3689_v2  ;;  %2096 = vmatpush.msra.mxu0 %v1851_v55  ;;  %vm507_vm15 = vcmp.eq.s32.totalorder %v3635_v25, %v3101_v19  ;;  %2119 = vmatpush.msra.mxu1 %v1867_v50  ;;  %v1898_v6 = vld [vmem:[#allocation6 + $0x1b0] sm:$0xff]  ;;  %v2578_v40 = vsel %vm504_vm12, 1.0, %v4559_v22  ;;  %v2579_v5 = vsel %vm505_vm13, 1.0, %v4559_v22  ;;  %v1865_v53 = vld [vmem:[#allocation6 + $0xa8] sm:$0xff]  ;;  %v2580_v50 = vsel %vm506_vm14, 1.0, %v4559_v22 }
  0xfb   :  { %2142 = vmatpush.msra.mxu2 %v1883_v39  ;;  %2165 = vmatpush.msra.mxu3 %v1899_v59  ;;  %v1881_v55 = vld [vmem:[#allocation6 + $0x128] sm:$0xff]  ;;  %v2581_v39 = vsel %vm507_vm15, 1.0, %v4559_v22  ;;  %v1327_v3 = vadd.f32 %v2577_v9, %v3505_v63  ;;  %v1335_v36 = vadd.f32 %v2578_v40, %v3507_v47  ;;  %v1449_v12 = vrot.slane %v1448_v7, 4  ;;  %v1896_v47 = vld [vmem:[#allocation6 + $0x1a0] sm:$0xff]  ;;  %v1895_v40 = vld [vmem:[#allocation6 + $0x198] sm:$0xff] }
  0xfc   :  { %2097 = vmatpush.msra.mxu0 %v1850_v43  ;;  %2120 = vmatpush.msra.mxu1 %v1866_v30  ;;  %v1897_v25 = vld [vmem:[#allocation6 + $0x1a8] sm:$0xff]  ;;  %v1343_v60 = vadd.f32 %v2579_v5, %v3509_v62  ;;  %v1351_v59 = vadd.f32 %v2580_v50, %v3519_v61  ;;  %v1361_v43 = vsel %vm1185_vm3, %v2581_v39, 0.0  ;;  %vm518_vm0 = vcmp.eq.s32.totalorder %v3717_v28, %v3097_v17  ;;  %v1847_v30 = vld [vmem:[#allocation6 + $0x18] sm:$0xff]  ;;  %v1846_v5 = vld [vmem:[#allocation6 + $0x10] sm:$0xff] }
  0xfd   :  { %2143 = vmatpush.msra.mxu2 %v1882_v31  ;;  %2166 = vmatpush.msra.mxu3 %v1898_v6  ;;  %v1328_v22 = vrot.slane %v1327_v3, 4  ;;  %v1336_v2 = vrot.slane %v1335_v36, 4  ;;  %v1362_v63 = vadd.f32 %v1361_v43, %v3514_v48  ;;  %vm519_vm1 = vcmp.eq.s32.totalorder %v3717_v28, %v3132_v35  ;;  %v1863_v61 = vld [vmem:[#allocation6 + $0x98] sm:$0xff]  ;;  %v1845_v50 = vld [vmem:[#allocation6 + $0x8] sm:$0xff] }
  0xfe   :  { %2098 = vmatpush.msra.mxu0 %v1849_v8  ;;  %2121 = vmatpush.msra.mxu1 %v1865_v53  ;;  %v1344_v62 = vrot.slane %v1343_v60, 4  ;;  %v1352_v31 = vrot.slane %v1351_v59, 4  ;;  %vm520_vm2 = vcmp.eq.s32.totalorder %v3717_v28, %v3104_v20  ;;  %v1879_v6 = vld [vmem:[#allocation6 + $0x118] sm:$0xff]  ;;  %vm521_vm4 = vcmp.eq.s32.totalorder %v3717_v28, %v3107_v21  ;;  %v1861_v43 = vld [vmem:[#allocation6 + $0x88] sm:$0xff] }
  0xff   :  { %2144 = vmatpush.msra.mxu2 %v1881_v55  ;;  %2167 = vmatpush.msra.mxu3 %v1897_v25  ;;  %v3733_v48 = vadd.f32 %v1328_v22, %v1327_v3  ;;  %v3735_v8 = vadd.f32 %v1336_v2, %v1335_v36  ;;  %v1363_v9 = vrot.slane %v1362_v63, 4  ;;  %v3739_v53 = vadd.f32 %v1449_v12, %v1448_v7  ;;  %v1862_v2 = vld [vmem:[#allocation6 + $0x90] sm:$0xff]  ;;  %v2822_v3 = vld [vmem:[#allocation3 + $0x8] sm:$0xff] }
 0x100   :  { %2099 = vmatpush.msra.mxu0 %v1848_v46  ;;  %2122 = vmatpush.msra.mxu1 %v1864_v32  ;;  %v3741_v55 = vadd.f32 %v1344_v62, %v1343_v60  ;;  %vm522_vm5 = vcmp.eq.s32.totalorder %v3717_v28, %v3101_v19  ;;  %v4596_v46 = vmov 0.0   ;;  %v1878_v36 = vld [vmem:[#allocation6 + $0x110] sm:$0xff]  ;;  %v3750_v32 = vadd.f32 %v1352_v31, %v1351_v59  ;;  %v1893_v28 = vld [vmem:[#allocation6 + $0x188] sm:$0xff] }
 0x101   :  { %2145 = vmatpush.msra.mxu2 %v1880_v29  ;;  %4595 = vst [vmem:[#allocation38_spill] sm:$0xff] %v3739_v53  ;;  %v2592_v22 = vsel %vm518_vm0, 1.0, %v4596_v46  ;;  %2168 = vmatpush.msra.mxu3 %v1896_v47  ;;  %v1364_v7 = vadd.f32 %v1363_v9, %v1362_v63  ;;  %v2593_v60 = vsel %vm519_vm1, 1.0, %v4596_v46  ;;  %v1894_v12 = vld [vmem:[#allocation6 + $0x190] sm:$0xff]  ;;  %v2594_v25 = vsel %vm520_vm2, 1.0, %v4596_v46  ;;  %v1877_v63 = vld [vmem:[#allocation6 + $0x108] sm:$0xff] }
 0x102   :  { %2100 = vmatpush.msra.mxu0 %v1847_v30  ;;  %2123 = vmatpush.msra.mxu1 %v1863_v61  ;;  %v2595_v59 = vsel %vm521_vm4, 1.0, %v4596_v46  ;;  %v2596_v30 = vsel %vm522_vm5, 1.0, %v4596_v46  ;;  %v1370_v62 = vadd.f32 %v2592_v22, %v3579_v49  ;;  %v1378_v31 = vadd.f32 %v2593_v60, %v3582_v11  ;;  %v1844_v49 = vld [vmem:[#allocation6] sm:$0xff] }
 0x103   :  { %2146 = vmatpush.msra.mxu2 %v1879_v6  ;;  %2169 = vmatpush.msra.mxu3 %v1895_v40  ;;  %v1365_v47 = vrot.slane %v1364_v7, 2  ;;  %v3772_v6 = vpop.permute.xlu2 %292  ;;  %v1386_v9 = vadd.f32 %v2594_v25, %v3585_v42  ;;  %v1394_v40 = vadd.f32 %v2595_v59, %v3613_v37  ;;  %v3777_v39 = vperm.slane %v2822_v3, 6  ;;  %v1860_v42 = vld [vmem:[#allocation6 + $0x80] sm:$0xff] }
 0x104   :  { %2101 = vmatpush.msra.mxu0 %v1846_v5  ;;  %2124 = vmatpush.msra.mxu1 %v1862_v2  ;;  %v1404_v5 = vsel %vm1185_vm3, %v2596_v30, 0.0  ;;  %v1371_v22 = vrot.slane %v1370_v62, 4  ;;  %v1379_v60 = vrot.slane %v1378_v31, 4  ;;  %v3788_v11 = vperm.slane %v2822_v3, 7 }
 0x105   :  { %v274_v61 = vpop.permute.xlu1 %273  ;;  %2147 = vmatpush.msra.mxu2 %v1878_v36  ;;  %2170 = vmatpush.msra.mxu3 %v1894_v12  ;;  %v1405_v2 = vadd.f32 %v1404_v5, %v3592_v56  ;;  %v3781_v36 = vadd.f32 %v1365_v47, %v1364_v7  ;;  %v1387_v37 = vrot.slane %v1386_v9, 4  ;;  %v1395_v25 = vrot.slane %v1394_v40, 4  ;;  %v1876_v12 = vld [vmem:[#allocation6 + $0x100] sm:$0xff] }
 0x106   :  { %2102 = vmatpush.msra.mxu0 %v1845_v50  ;;  %2125 = vmatpush.msra.mxu1 %v1861_v43  ;;  %vm543_vm6 = vcmp.eq.s32.totalorder %v274_v61, %v3097_v17  ;;  %v1892_v50 = vld [vmem:[#allocation6 + $0x180] sm:$0xff]  ;;  %v3786_v59 = vadd.f32 %v1371_v22, %v1370_v62  ;;  %vm544_vm7 = vcmp.eq.s32.totalorder %v274_v61, %v3132_v35  ;;  %v4604_v53 = vrot.slane %v3396_v33, 1 }
 0x107   :  { %2148 = vmatpush.msra.mxu2 %v1877_v63  ;;  %4597 = vst [vmem:[#allocation39_spill] sm:$0xff] %v3781_v36  ;;  %400 = vperm.xlu1 %2804, %v3777_v39   ;;  %v1406_v30 = vrot.slane %v1405_v2, 4  ;;  %v3791_v56 = vadd.f32 %v1379_v60, %v1378_v31  ;;  %v3793_v7 = vadd.f32 %v1387_v37, %v1386_v9  ;;  %v2617_v3 = vsel %vm543_vm6, 1.0, %v4596_v46 }
 0x108   :  { %406 = vperm.xlu2 %2805, %v3777_v39   ;;  %2171 = vmatpush.msra.mxu3 %v1893_v28  ;;  %vm545_vm8 = vcmp.eq.s32.totalorder %v274_v61, %v3104_v20  ;;  %vm546_vm9 = vcmp.eq.s32.totalorder %v274_v61, %v3107_v21  ;;  %vm547_vm10 = vcmp.eq.s32.totalorder %v274_v61, %v3101_v19  ;;  %v2618_v63 = vsel %vm544_vm7, 1.0, %v4596_v46 }
 0x109   :  { %2103 = vmatpush.msra.mxu0 %v1844_v49  ;;  %2126 = vmatpush.msra.mxu1 %v1860_v42  ;;  %v3797_v43 = vadd.f32 %v1406_v30, %v1405_v2  ;;  %v3804_v47 = vadd.f32 %v1395_v25, %v1394_v40  ;;  %v2619_v62 = vsel %vm545_vm8, 1.0, %v4596_v46  ;;  %v2620_v31 = vsel %vm546_vm9, 1.0, %v4596_v46  ;;  %v280_v40 = vpop.permute.xlu0 %279 }
 0x10a   :  { %2149 = vmatpush.msra.mxu2 %v1876_v12  ;;  %2172 = vmatpush.msra.mxu3 %v1892_v50  ;;  %v2621_v9 = vsel %vm547_vm10, 1.0, %v4596_v46  ;;  %v1455_v28 = vadd.f32 %v2617_v3, %v3626_v58  ;;  %v1463_v49 = vadd.f32 %v2618_v63, %v3632_v13  ;;  %v1471_v61 = vadd.f32 %v2619_v62, %v3641_v54 }
 0x10b   :  { %4598 = vst [vmem:[#allocation40_spill] sm:$0xff] %v3797_v43  ;;  %v1488_v22 = vsel %vm1185_vm3, %v2621_v9, 0.0  ;;  %vm558_vm11 = vcmp.eq.s32.totalorder %v3772_v6, %v3097_v17  ;;  %vm559_vm12 = vcmp.eq.s32.totalorder %v3772_v6, %v3132_v35  ;;  %vm560_vm13 = vcmp.eq.s32.totalorder %v3772_v6, %v3104_v20  ;;  %v312_v13 = vpop.permute.xlu2 %311 }
 0x10c   :  { %v1479_v60 = vadd.f32 %v2620_v31, %v3647_v1  ;;  %v1489_v58 = vadd.f32 %v1488_v22, %v3677_v44  ;;  %vm561_vm14 = vcmp.eq.s32.totalorder %v3772_v6, %v3107_v21  ;;  %vm562_vm15 = vcmp.eq.s32.totalorder %v3772_v6, %v3101_v19 }
 0x10d   :  { %v2632_v54 = vsel %vm558_vm11, 1.0, %v4596_v46  ;;  %v2633_v2 = vsel %vm559_vm12, 1.0, %v4596_v46  ;;  %v2634_v42 = vsel %vm560_vm13, 1.0, %v4596_v46  ;;  %v2636_v37 = vsel %vm562_vm15, 1.0, %v4596_v46 }
 0x10e   :  { %v2635_v1 = vsel %vm561_vm14, 1.0, %v4596_v46  ;;  %vm548_vm0 = vcmp.eq.s32.totalorder %v280_v40, %v3097_v17  ;;  %vm549_vm1 = vcmp.eq.s32.totalorder %v280_v40, %v3132_v35  ;;  %vm550_vm2 = vcmp.eq.s32.totalorder %v280_v40, %v3104_v20 }
 0x10f   :  { %419 = vperm.xlu1 %2804, %v3788_v11   ;;  %vm551_vm4 = vcmp.eq.s32.totalorder %v280_v40, %v3107_v21  ;;  %vm552_vm5 = vcmp.eq.s32.totalorder %v280_v40, %v3101_v19  ;;  %v2622_v44 = vsel %vm548_vm0, 1.0, %v4596_v46  ;;  %v2623_v6 = vsel %vm549_vm1, 1.0, %v4596_v46 }
 0x110   :  { %425 = vperm.xlu2 %2805, %v3788_v11   ;;  %v1531_v25 = vsel %vm1185_vm3, %v2636_v37, 0.0  ;;  %v2624_v12 = vsel %vm550_vm2, 1.0, %v4596_v46  ;;  %v2625_v50 = vsel %vm551_vm4, 1.0, %v4596_v46  ;;  %v2626_v30 = vsel %vm552_vm5, 1.0, %v4596_v46 }
 0x111   :  { %v3844_v3 = vadd.f32 %v2622_v44, %v1455_v28  ;;  %v3846_v63 = vadd.f32 %v2623_v6, %v1463_v49  ;;  %v3848_v62 = vadd.f32 %v2624_v12, %v1471_v61  ;;  %v1490_v31 = vsel %vm1185_vm3, %v2626_v30, 0.0 }
 0x112   :  { %v3851_v9 = vadd.f32 %v1490_v31, %v1489_v58  ;;  %vm573_vm6 = vcmp.eq.s32.totalorder %v312_v13, %v3097_v17  ;;  %vm574_vm7 = vcmp.eq.s32.totalorder %v312_v13, %v3132_v35  ;;  %vm575_vm8 = vcmp.eq.s32.totalorder %v312_v13, %v3104_v20 }
 0x113   :  { %v3856_v40 = vadd.f32 %v2625_v50, %v1479_v60  ;;  %vm576_vm9 = vcmp.eq.s32.totalorder %v312_v13, %v3107_v21  ;;  %vm577_vm10 = vcmp.eq.s32.totalorder %v312_v13, %v3101_v19  ;;  %v3861_v28 = vsel %vm573_vm6, 1.0, %v4596_v46  ;;  %v299_v6 = vpop.permute.xlu2 %298 }
 0x114   :  { %4599 = vst [vmem:[#allocation41_spill] sm:$0xff] %v3851_v9  ;;  %v3865_v61 = vsel %vm574_vm7, 1.0, %v4596_v46  ;;  %v3868_v58 = vsel %vm575_vm8, 1.0, %v4596_v46  ;;  %v3871_v37 = vsel %vm576_vm9, 1.0, %v4596_v46  ;;  %v2651_v60 = vsel %vm577_vm10, 1.0, %v4596_v46 }
 0x115   :  { %v287_v22 = vpop.permute.xlu1 %286  ;;  %4600 = vst [vmem:[#allocation42_spill] sm:$0xff] %v3865_v61  ;;  %vm563_vm0 = vcmp.eq.s32.totalorder %v299_v6, %v3097_v17  ;;  %vm564_vm1 = vcmp.eq.s32.totalorder %v299_v6, %v3132_v35  ;;  %vm565_vm2 = vcmp.eq.s32.totalorder %v299_v6, %v3104_v20  ;;  %vm566_vm4 = vcmp.eq.s32.totalorder %v299_v6, %v3107_v21 }
 0x116   :  { %4601 = vst [vmem:[#allocation43_spill] sm:$0xff] %v3868_v58  ;;  %vm553_vm11 = vcmp.eq.s32.totalorder %v287_v22, %v3097_v17  ;;  %vm554_vm12 = vcmp.eq.s32.totalorder %v287_v22, %v3132_v35  ;;  %vm555_vm13 = vcmp.eq.s32.totalorder %v287_v22, %v3104_v20  ;;  %vm556_vm14 = vcmp.eq.s32.totalorder %v287_v22, %v3107_v21 }
 0x117   :  { %4602 = vst [vmem:[#allocation44_spill] sm:$0xff] %v3871_v37  ;;  %2806 = vset.pattern.permute.xlu1 %v3077_v10  ;;  %vm557_vm15 = vcmp.eq.s32.totalorder %v287_v22, %v3101_v19  ;;  %v2627_v13 = vsel %vm553_vm11, 1.0, %v4596_v46  ;;  %v2628_v44 = vsel %vm554_vm12, 1.0, %v4596_v46  ;;  %v2629_v12 = vsel %vm555_vm13, 1.0, %v4596_v46 }
 0x118   :  { %2807 = vset.pattern.permute.xlu2 %v3077_v10  ;;  %v2630_v50 = vsel %vm556_vm14, 1.0, %v4596_v46  ;;  %v2631_v10 = vsel %vm557_vm15, 1.0, %v4596_v46  ;;  %v1498_v30 = vadd.f32 %v2632_v54, %v2627_v13  ;;  %v1506_v31 = vadd.f32 %v2633_v2, %v2628_v44 }
 0x119   :  { %v1514_v49 = vadd.f32 %v2634_v42, %v2629_v12  ;;  %v1522_v5 = vadd.f32 %v2635_v1, %v2630_v50  ;;  %v1530_v29 = vsel %vm1185_vm3, %v2631_v10, 0.0  ;;  %vm567_vm5 = vcmp.eq.s32.totalorder %v299_v6, %v3101_v19 }
 0x11a   :  { %v1532_v9 = vadd.f32 %v1531_v25, %v1530_v29  ;;  %v2637_v22 = vsel %vm563_vm0, 1.0, %v4596_v46  ;;  %v2638_v54 = vsel %vm564_vm1, 1.0, %v4596_v46  ;;  %v2639_v2 = vsel %vm565_vm2, 1.0, %v4596_v46 }
 0x11b   :  { %v2640_v42 = vsel %vm566_vm4, 1.0, %v4596_v46  ;;  %v2641_v29 = vsel %vm567_vm5, 1.0, %v4596_v46  ;;  %v1499_v1 = vadd.f32 %v2637_v22, %v1498_v30  ;;  %v1507_v25 = vadd.f32 %v2638_v54, %v1506_v31 }
 0x11c   :  { %v1515_v13 = vadd.f32 %v2639_v2, %v1514_v49  ;;  %v1523_v44 = vadd.f32 %v2640_v42, %v1522_v5  ;;  %v1533_v12 = vsel %vm1185_vm3, %v2641_v29, 0.0  ;;  %v3899_v50 = vsel %vm1185_vm3, %v2651_v60, 0.0 }
 0x11d   :  { %4603 = vst [vmem:[#allocation45_spill] sm:$0xff] %v3899_v50  ;;  %v1500_v6 = vrot.slane %v1499_v1, 4  ;;  %v1534_v10 = vadd.f32 %v1533_v12, %v1532_v9  ;;  %v1160_v43 = vadd.f32 %v4604_v53, %v3396_v33  ;;  %v1508_v36 = vrot.slane %v1507_v25, 4 }
 0x11e   :  { %v1516_v30 = vrot.slane %v1515_v13, 4  ;;  %v1524_v31 = vrot.slane %v1523_v44, 4  ;;  %v4605_v5 = vrot.slane %v3307_v0, 1  ;;  %v1289_v54 = vrot.slane %v3650_v14, 1 }
 0x11f   :  { %412 = vperm.xlu1 %2806, %v3777_v39   ;;  %v1501_v22 = vadd.f32 %v1500_v6, %v1499_v1  ;;  %v1535_v60 = vrot.slane %v1534_v10, 4  ;;  %v4606_v39 = vrot.slane %v3733_v48, 2  ;;  %v1509_v2 = vadd.f32 %v1508_v36, %v1507_v25 }
 0x120   :  { %431 = vperm.xlu2 %2807, %v3788_v11   ;;  %v1204_v49 = vadd.f32 %v4605_v5, %v3307_v0  ;;  %v1517_v42 = vadd.f32 %v1516_v30, %v1515_v13  ;;  %v1525_v33 = vadd.f32 %v1524_v31, %v1523_v44  ;;  %v1373_v53 = vrot.slane %v3786_v59, 2 }
 0x121   :  { %v1331_v9 = vadd.f32 %v4606_v39, %v3733_v48  ;;  %v1502_v11 = vrot.slane %v1501_v22, 2  ;;  %v1536_v29 = vadd.f32 %v1535_v60, %v1534_v10  ;;  %v4607_v12 = vrot.slane %v3269_v18, 1 }
 0x122   :  { %v1510_v1 = vrot.slane %v1509_v2, 2  ;;  %v1518_v6 = vrot.slane %v1517_v42, 2  ;;  %v1526_v5 = vrot.slane %v1525_v33, 2  ;;  %v1374_v50 = vadd.f32 %v1373_v53, %v3786_v59 }
 0x123   :  { %v1247_v61 = vadd.f32 %v4607_v12, %v3269_v18  ;;  %v1332_v0 = vrot.slane %v1331_v9, 1  ;;  %v1503_v37 = vadd.f32 %v1502_v11, %v1501_v22  ;;  %v1537_v58 = vrot.slane %v1536_v29, 2 }
 0x124   :  { %v1290_v48 = vadd.f32 %v1289_v54, %v3650_v14  ;;  %v4608_v36 = vrot.slane %v3680_v4, 4  ;;  %v1511_v13 = vadd.f32 %v1510_v1, %v1509_v2  ;;  %v1519_v44 = vadd.f32 %v1518_v6, %v1517_v42 }
 0x125   :  { %v1527_v10 = vadd.f32 %v1526_v5, %v1525_v33  ;;  %v1375_v30 = vrot.slane %v1374_v50, 1  ;;  %v1504_v31 = vrot.slane %v1503_v37, 1  ;;  %v3922_v18 = vadd.f32 %v1537_v58, %v1536_v29 }
 0x126   :  { %v1415_v25 = vadd.f32 %v4608_v36, %v3680_v4  ;;  %v1457_v39 = vrot.slane %v3844_v3, 4  ;;  %v1512_v12 = vrot.slane %v1511_v13, 1  ;;  %v1520_v59 = vrot.slane %v1519_v44, 1 }
 0x127   :  { %v1528_v22 = vrot.slane %v1527_v10, 1  ;;  %v1333_v53 = vadd.f32 %v1332_v0, %v1331_v9  ;;  %v3925_v11 = vadd.f32 %v1504_v31, %v1503_v37  ;;  %v1376_v14 = vadd.f32 %v1375_v30, %v1374_v50 }
 0x128   :  { %v1416_v60 = vrot.slane %v1415_v25, 2  ;;  %v1458_v4 = vadd.f32 %v1457_v39, %v3844_v3  ;;  %v3928_v2 = vadd.f32 %v1512_v12, %v1511_v13  ;;  %v3930_v42 = vadd.f32 %v1520_v59, %v1519_v44 }
 0x129   :  { %v1539_v58 = vrot.slane %v3922_v18, 1  ;;  %vm1999_vm6 = vcmask 1041409   ;;  %v3933_v33 = vadd.f32 %v1528_v22, %v1527_v10  ;;  %vm2001_vm7 = vcmask 1042434  }
 0x12a   :  { %v1417_v54 = vadd.f32 %v1416_v60, %v1415_v25  ;;  %v1459_v1 = vrot.slane %v1458_v4, 2  ;;  %v2000_v6 = vsel %vm1999_vm6, %v1204_v49, %v1160_v43  ;;  %vm2003_vm8 = vcmask 1043459  }
 0x12b   :  { %vm2005_vm9 = vcmask 1044484   ;;  %vm2007_vm10 = vcmask 1045509   ;;  %v2002_v3 = vsel %vm2001_vm7, %v1247_v61, %v2000_v6  ;;  %vm2009_vm11 = vcmask 1046534  }
 0x12c   :  { %v1418_v29 = vrot.slane %v1417_v54, 1  ;;  %v1460_v50 = vadd.f32 %v1459_v1, %v1458_v4  ;;  %v2004_v9 = vsel %vm2003_vm8, %v1290_v48, %v2002_v3  ;;  %vm4569_vm12 = vcmask 1047559  }
 0x12d   :  { %v4609_v0 = vrot.slane %v3398_v38, 1  ;;  %v4610_v36 = vrot.slane %v3313_v16, 1  ;;  %v2006_v25 = vsel %vm2005_vm9, %v1333_v53, %v2004_v9  ;;  %v4611_v13 = vrot.slane %v3271_v23, 1 }
 0x12e   :  { %v1419_v37 = vadd.f32 %v1418_v29, %v1417_v54  ;;  %v1461_v49 = vrot.slane %v1460_v50, 1  ;;  %v1297_v61 = vrot.slane %v3652_v57, 1  ;;  %v2008_v48 = vsel %vm2007_vm10, %v1376_v14, %v2006_v25 }
 0x12f   :  { %v1168_v5 = vadd.f32 %v4609_v0, %v3398_v38  ;;  %v1212_v43 = vadd.f32 %v4610_v36, %v3313_v16  ;;  %v1255_v44 = vadd.f32 %v4611_v13, %v3271_v23  ;;  %v4612_v10 = vrot.slane %v3735_v8, 2 }
 0x130   :  { %v1381_v38 = vrot.slane %v3791_v56, 2  ;;  %v4613_v16 = vrot.slane %v3683_v15, 4  ;;  %v1462_v60 = vadd.f32 %v1461_v49, %v1460_v50  ;;  %v2010_v39 = vsel %vm2009_vm11, %v1419_v37, %v2008_v48 }
 0x131   :  { %v1339_v30 = vadd.f32 %v4612_v10, %v3735_v8  ;;  %v1298_v12 = vadd.f32 %v1297_v61, %v3652_v57  ;;  %v1465_v23 = vrot.slane %v3846_v63, 4  ;;  %v2013_v14 = vsel %vm1999_vm6, %v1212_v43, %v1168_v5 }
 0x132   :  { %v1423_v31 = vadd.f32 %v4613_v16, %v3683_v15  ;;  %v1382_v22 = vadd.f32 %v1381_v38, %v3791_v56  ;;  %v2012_v8 = vsel %vm4569_vm12, %v1462_v60, %v2010_v39  ;;  %v2014_v4 = vsel %vm2001_vm7, %v1255_v44, %v2013_v14 }
 0x133   :  { %v1340_v59 = vrot.slane %v1339_v30, 1  ;;  %v1466_v54 = vadd.f32 %v1465_v23, %v3846_v63  ;;  %v4614_v15 = vrot.slane %v3402_v45, 1  ;;  %2104 = vmatmul.f32.vlgmr.msra.gmra.mxu0 %v2012_v8  ;;  %v2015_v37 = vsel %vm2003_vm8, %v1298_v12, %v2014_v4 }
 0x134   :  { %v1424_v53 = vrot.slane %v1423_v31, 2  ;;  %v1383_v1 = vrot.slane %v1382_v22, 1  ;;  %v4615_v50 = vrot.slane %v3315_v24, 1  ;;  %v4616_v63 = vrot.slane %v3274_v26, 1 }
 0x135   :  { %v1176_v29 = vadd.f32 %v4614_v15, %v3402_v45  ;;  %v1341_v57 = vadd.f32 %v1340_v59, %v1339_v30  ;;  %v1467_v56 = vrot.slane %v1466_v54, 2  ;;  %v1305_v0 = vrot.slane %v3654_v34, 1 }
 0x136   :  { %v1425_v6 = vadd.f32 %v1424_v53, %v1423_v31  ;;  %v1220_v3 = vadd.f32 %v4615_v50, %v3315_v24  ;;  %v1263_v9 = vadd.f32 %v4616_v63, %v3274_v26  ;;  %v1384_v5 = vadd.f32 %v1383_v1, %v1382_v22  ;;  %v344_v63 = vpop.permute.xlu2 %343 }
 0x137   :  { %v2016_v45 = vsel %vm2005_vm9, %v1341_v57, %v2015_v37  ;;  %v4617_v43 = vrot.slane %v3741_v55, 2  ;;  %v1468_v25 = vadd.f32 %v1467_v56, %v1466_v54  ;;  %v1306_v13 = vadd.f32 %v1305_v0, %v3654_v34  ;;  %v4621_v57 = vld [vmem:[#allocation17_spill] sm:$0xff] }
 0x138   :  { %v1426_v36 = vrot.slane %v1425_v6, 1  ;;  %v1389_v44 = vrot.slane %v3793_v7, 2  ;;  %v4618_v24 = vrot.slane %v3686_v51, 4  ;;  %v2017_v48 = vsel %vm2007_vm10, %v1384_v5, %v2016_v45  ;;  %v4624_v0 = vld [vmem:[#allocation37_spill] sm:$0xff] }
 0x139   :  { %v1347_v49 = vadd.f32 %v4617_v43, %v3741_v55  ;;  %v1473_v30 = vrot.slane %v3848_v62, 4  ;;  %v1469_v38 = vrot.slane %v1468_v25, 1  ;;  %v2020_v55 = vsel %vm1999_vm6, %v1220_v3, %v1176_v29 }
 0x13a   :  { %v1431_v61 = vadd.f32 %v4618_v24, %v3686_v51  ;;  %v1427_v26 = vadd.f32 %v1426_v36, %v1425_v6  ;;  %v1390_v16 = vadd.f32 %v1389_v44, %v3793_v7  ;;  %v2021_v12 = vsel %vm2001_vm7, %v1263_v9, %v2020_v55  ;;  %v306_v44 = vpop.permute.xlu1 %305 }
 0x13b   :  { %v1348_v10 = vrot.slane %v1347_v49, 1  ;;  %v1474_v39 = vadd.f32 %v1473_v30, %v3848_v62  ;;  %v1470_v51 = vadd.f32 %v1469_v38, %v1468_v25  ;;  %v2022_v22 = vsel %vm2003_vm8, %v1306_v13, %v2021_v12 }
 0x13c   :  { %v1432_v31 = vrot.slane %v1431_v61, 2  ;;  %v2018_v34 = vsel %vm2009_vm11, %v1427_v26, %v2017_v48  ;;  %v1391_v23 = vrot.slane %v1390_v16, 1  ;;  %v4619_v7 = vrot.slane %v3404_v52, 1 }
 0x13d   :  { %v1349_v60 = vadd.f32 %v1348_v10, %v1347_v49  ;;  %v1475_v53 = vrot.slane %v1474_v39, 2  ;;  %v4620_v54 = vrot.slane %v3338_v41, 1  ;;  %v2019_v62 = vsel %vm4569_vm12, %v1470_v51, %v2018_v34 }
 0x13e   :  { %v1433_v59 = vadd.f32 %v1432_v31, %v1431_v61  ;;  %v1184_v8 = vadd.f32 %v4619_v7, %v3404_v52  ;;  %v1392_v15 = vadd.f32 %v1391_v23, %v1390_v16  ;;  %v4622_v1 = vrot.slane %v4621_v57, 1  ;;  %2127 = vmatmul.f32.vlgmr.msra.gmra.mxu1 %v2019_v62 }
 0x13f   :  { %v2023_v14 = vsel %vm2005_vm9, %v1349_v60, %v2022_v22  ;;  %v1228_v4 = vadd.f32 %v4620_v54, %v3338_v41  ;;  %v1476_v37 = vadd.f32 %v1475_v53, %v1474_v39  ;;  %v1313_v56 = vrot.slane %v3656_v27, 1  ;;  %v363_v54 = vpop.permute.xlu2 %362 }
 0x140   :  { %v1434_v29 = vrot.slane %v1433_v59, 1  ;;  %v1271_v6 = vadd.f32 %v4622_v1, %v4621_v57  ;;  %v4623_v50 = vrot.slane %v3750_v32, 2  ;;  %v1397_v3 = vrot.slane %v3804_v47, 2  ;;  %v4629_v1 = vld [vmem:[#allocation45_spill] sm:$0xff] }
 0x141   :  { %v2024_v9 = vsel %vm2007_vm10, %v1392_v15, %v2023_v14  ;;  %v4625_v5 = vrot.slane %v4624_v0, 4  ;;  %v1481_v45 = vrot.slane %v3856_v40, 4  ;;  %v1477_v43 = vrot.slane %v1476_v37, 1  ;;  %v4628_v15 = vld [vmem:[#allocation44_spill] sm:$0xff] }
 0x142   :  { %v1355_v52 = vadd.f32 %v4623_v50, %v3750_v32  ;;  %v1435_v41 = vadd.f32 %v1434_v29, %v1433_v59  ;;  %v1314_v49 = vadd.f32 %v1313_v56, %v3656_v27  ;;  %v1398_v13 = vadd.f32 %v1397_v3, %v3804_v47 }
 0x143   :  { %v1439_v36 = vadd.f32 %v4625_v5, %v4624_v0  ;;  %v1482_v61 = vadd.f32 %v1481_v45, %v3856_v40  ;;  %v2027_v26 = vsel %vm1999_vm6, %v1228_v4, %v1184_v8  ;;  %v1478_v48 = vadd.f32 %v1477_v43, %v1476_v37  ;;  %v4631_v0 = vld [vmem:[#allocation19_spill] sm:$0xff]  ;;  %v4633_v43 = vld [vmem:[#allocation21_spill] sm:$0xff] }
 0x144   :  { %v1356_v25 = vrot.slane %v1355_v52, 1  ;;  %v2025_v32 = vsel %vm2009_vm11, %v1435_v41, %v2024_v9  ;;  %v1399_v30 = vrot.slane %v1398_v13, 1  ;;  %v2028_v38 = vsel %vm2001_vm7, %v1271_v6, %v2027_v26  ;;  %v4630_v41 = vld [vmem:[#allocation42_spill] sm:$0xff] }
 0x145   :  { %v1440_v24 = vrot.slane %v1439_v36, 2  ;;  %v1483_v31 = vrot.slane %v1482_v61, 2  ;;  %v2029_v27 = vsel %vm2003_vm8, %v1314_v49, %v2028_v38  ;;  %vm568_vm13 = vcmp.eq.s32.totalorder %v306_v44, %v3097_v17  ;;  %v331_v49 = vpop.permute.xlu1 %330 }
 0x146   :  { %v1357_v10 = vadd.f32 %v1356_v25, %v1355_v52  ;;  %v2026_v47 = vsel %vm4569_vm12, %v1478_v48, %v2025_v32  ;;  %v1400_v55 = vadd.f32 %v1399_v30, %v1398_v13  ;;  %vm569_vm14 = vcmp.eq.s32.totalorder %v306_v44, %v3132_v35  ;;  %v4634_v13 = vld [vmem:[#allocation22_spill] sm:$0xff]  ;;  %v4635_v32 = vld [vmem:[#allocation23_spill] sm:$0xff] }
 0x147   :  { %v1441_v16 = vadd.f32 %v1440_v24, %v1439_v36  ;;  %2150 = vmatmul.f32.vlgmr.msra.gmra.mxu2 %v2026_v47  ;;  %v1484_v60 = vadd.f32 %v1483_v31, %v1482_v61  ;;  %vm570_vm15 = vcmp.eq.s32.totalorder %v306_v44, %v3104_v20  ;;  %vm571_vm0 = vcmp.eq.s32.totalorder %v306_v44, %v3107_v21  ;;  %v4632_v36 = vld [vmem:[#allocation20_spill] sm:$0xff]  ;;  %v356_v31 = vpop.permute.xlu2 %355 }
 0x148   :  { %v2030_v34 = vsel %vm2005_vm9, %v1357_v10, %v2029_v27  ;;  %v4030_v39 = vadd.f32 %v1539_v58, %v3922_v18  ;;  %vm572_vm1 = vcmp.eq.s32.totalorder %v306_v44, %v3101_v19  ;;  %v2642_v51 = vsel %vm568_vm13, 1.0, %v4596_v46  ;;  %v4627_v18 = vld [vmem:[#allocation43_spill] sm:$0xff] }
 0x149   :  { %v1442_v40 = vrot.slane %v1441_v16, 1  ;;  %v2031_v12 = vsel %vm2007_vm10, %v1400_v55, %v2030_v34  ;;  %v1485_v59 = vrot.slane %v1484_v60, 1  ;;  %v2644_v22 = vsel %vm570_vm15, 1.0, %v4596_v46 }
 0x14a   :  { %4626 = vst [vmem:[#allocation17_spill] sm:$0xff] %v4030_v39  ;;  %v2645_v53 = vsel %vm571_vm0, 1.0, %v4596_v46  ;;  %v2643_v14 = vsel %vm569_vm14, 1.0, %v4596_v46  ;;  %v2646_v7 = vsel %vm572_vm1, 1.0, %v4596_v46  ;;  %v4040_v8 = vadd.f32 %v3861_v28, %v2642_v51 }
 0x14b   :  { %v1443_v23 = vadd.f32 %v1442_v40, %v1441_v16  ;;  %v4043_v58 = vadd.f32 %v4627_v18, %v2644_v22  ;;  %v1486_v4 = vadd.f32 %v1485_v59, %v1484_v60  ;;  %v4047_v29 = vadd.f32 %v4628_v15, %v2645_v53  ;;  %v4636_v40 = vld [vmem:[#allocation26_spill] sm:$0xff] }
 0x14c   :  { %v1573_v57 = vsel %vm1185_vm3, %v2646_v7, 0.0  ;;  %vm598_vm2 = vcmp.eq.s32.totalorder %v344_v63, %v3097_v17  ;;  %vm599_vm4 = vcmp.eq.s32.totalorder %v344_v63, %v3132_v35  ;;  %vm600_vm5 = vcmp.eq.s32.totalorder %v344_v63, %v3104_v20  ;;  %v4639_v53 = vld [vmem:[#allocation30_spill] sm:$0xff] }
 0x14d   :  { %v2032_v62 = vsel %vm2009_vm11, %v1443_v23, %v2031_v12  ;;  %v4051_v6 = vadd.f32 %v4629_v1, %v1573_v57  ;;  %vm601_vm13 = vcmp.eq.s32.totalorder %v344_v63, %v3107_v21  ;;  %vm602_vm14 = vcmp.eq.s32.totalorder %v344_v63, %v3101_v19  ;;  %v4637_v12 = vld [vmem:[#allocation27_spill] sm:$0xff]  ;;  %v4638_v23 = vld [vmem:[#allocation29_spill] sm:$0xff]  ;;  %v318_v7 = vpop.permute.xlu1 %317 }
 0x14e   :  { %v2033_v28 = vsel %vm4569_vm12, %v1486_v4, %v2032_v62  ;;  %v2672_v37 = vsel %vm598_vm2, 1.0, %v4596_v46  ;;  %v2673_v56 = vsel %vm599_vm4, 1.0, %v4596_v46  ;;  %v2674_v50 = vsel %vm600_vm5, 1.0, %v4596_v46 }
 0x14f   :  { %2173 = vmatmul.f32.vlgmr.msra.gmra.mxu3 %v2033_v28  ;;  %v2675_v52 = vsel %vm601_vm13, 1.0, %v4596_v46  ;;  %v2676_v3 = vsel %vm602_vm14, 1.0, %v4596_v46  ;;  %v4065_v9 = vadd.f32 %v4630_v41, %v2643_v14  ;;  %v1627_v5 = vadd.f32 %v4631_v0, %v2672_v37 }
 0x150   :  { %v1635_v45 = vadd.f32 %v4632_v36, %v2673_v56  ;;  %v1643_v63 = vadd.f32 %v4633_v43, %v2674_v50  ;;  %v1659_v25 = vsel %vm1185_vm3, %v2676_v3, 0.0  ;;  %vm613_vm15 = vcmp.eq.s32.totalorder %v363_v54, %v3097_v17 }
 0x151   :  { %vm614_vm0 = vcmp.eq.s32.totalorder %v363_v54, %v3132_v35  ;;  %vm615_vm1 = vcmp.eq.s32.totalorder %v363_v54, %v3104_v20  ;;  %v1651_v44 = vadd.f32 %v4634_v13, %v2675_v52  ;;  %v1661_v24 = vadd.f32 %v4635_v32, %v1659_v25 }
 0x152   :  { %vm616_vm2 = vcmp.eq.s32.totalorder %v363_v54, %v3107_v21  ;;  %vm617_vm4 = vcmp.eq.s32.totalorder %v363_v54, %v3101_v19  ;;  %v4079_v61 = vsel %vm613_vm15, 1.0, %v4596_v46  ;;  %v4082_v26 = vsel %vm614_vm0, 1.0, %v4596_v46 }
 0x153   :  { %v4085_v48 = vsel %vm615_vm1, 1.0, %v4596_v46  ;;  %v2691_v10 = vsel %vm617_vm4, 1.0, %v4596_v46  ;;  %v4089_v30 = vsel %vm616_vm2, 1.0, %v4596_v46  ;;  %vm588_vm5 = vcmp.eq.s32.totalorder %v331_v49, %v3097_v17 }
 0x154   :  { %vm589_vm13 = vcmp.eq.s32.totalorder %v331_v49, %v3132_v35  ;;  %vm590_vm14 = vcmp.eq.s32.totalorder %v331_v49, %v3104_v20  ;;  %vm591_vm15 = vcmp.eq.s32.totalorder %v331_v49, %v3107_v21  ;;  %vm592_vm12 = vcmp.eq.s32.totalorder %v331_v49, %v3101_v19 }
 0x155   :  { %v2662_v38 = vsel %vm588_vm5, 1.0, %v4596_v46  ;;  %v2663_v16 = vsel %vm589_vm13, 1.0, %v4596_v46  ;;  %v4099_v27 = vsel %vm1185_vm3, %v2691_v10, 0.0  ;;  %v2664_v47 = vsel %vm590_vm14, 1.0, %v4596_v46 }
 0x156   :  { %v2665_v55 = vsel %vm591_vm15, 1.0, %v4596_v46  ;;  %v2666_v34 = vsel %vm592_vm12, 1.0, %v4596_v46  ;;  %v4105_v60 = vadd.f32 %v2662_v38, %v4636_v40  ;;  %v4108_v51 = vadd.f32 %v2663_v16, %v4637_v12 }
 0x157   :  { %v4111_v59 = vadd.f32 %v2665_v55, %v4638_v23  ;;  %v1617_v22 = vsel %vm1185_vm3, %v2666_v34, 0.0  ;;  %vm608_vm0 = vcmp.eq.s32.totalorder %v356_v31, %v3097_v17  ;;  %vm609_vm1 = vcmp.eq.s32.totalorder %v356_v31, %v3132_v35  ;;  %v337_v23 = vpop.permute.xlu1 %336 }
 0x158   :  { %v4115_v14 = vadd.f32 %v1617_v22, %v4639_v53  ;;  %vm610_vm12 = vcmp.eq.s32.totalorder %v356_v31, %v3104_v20  ;;  %vm611_vm2 = vcmp.eq.s32.totalorder %v356_v31, %v3107_v21  ;;  %vm612_vm4 = vcmp.eq.s32.totalorder %v356_v31, %v3101_v19  ;;  %v4640_v31 = vld [vmem:[#allocation28_spill] sm:$0xff] }
 0x159   :  { %v2682_v18 = vsel %vm608_vm0, 1.0, %v4596_v46  ;;  %v2683_v54 = vsel %vm609_vm1, 1.0, %v4596_v46  ;;  %v2684_v4 = vsel %vm610_vm12, 1.0, %v4596_v46  ;;  %v2685_v62 = vsel %vm611_vm2, 1.0, %v4596_v46 }
 0x15a   :  { %v2686_v15 = vsel %vm612_vm4, 1.0, %v4596_v46  ;;  %v1628_v57 = vadd.f32 %v2682_v18, %v1627_v5  ;;  %v1636_v1 = vadd.f32 %v2683_v54, %v1635_v45  ;;  %v1644_v28 = vadd.f32 %v2684_v4, %v1643_v63 }
 0x15b   :  { %v1652_v37 = vadd.f32 %v2685_v62, %v1651_v44  ;;  %v1662_v56 = vsel %vm1185_vm3, %v2686_v15, 0.0  ;;  %vm578_vm5 = vcmp.eq.s32.totalorder %v318_v7, %v3097_v17  ;;  %vm579_vm13 = vcmp.eq.s32.totalorder %v318_v7, %v3132_v35 }
 0x15c   :  { %v1629_v50 = vrot.slane %v1628_v57, 4  ;;  %v1663_v52 = vadd.f32 %v1662_v56, %v1661_v24  ;;  %v1637_v3 = vrot.slane %v1636_v1, 4  ;;  %v1645_v41 = vrot.slane %v1644_v28, 4 }
 0x15d   :  { %v1653_v0 = vrot.slane %v1652_v37, 4  ;;  %vm580_vm14 = vcmp.eq.s32.totalorder %v318_v7, %v3104_v20  ;;  %vm581_vm15 = vcmp.eq.s32.totalorder %v318_v7, %v3107_v21  ;;  %vm582_vm0 = vcmp.eq.s32.totalorder %v318_v7, %v3101_v19 }
 0x15e   :  { %v1630_v36 = vadd.f32 %v1629_v50, %v1628_v57  ;;  %v1664_v43 = vrot.slane %v1663_v52, 4  ;;  %v1638_v5 = vadd.f32 %v1637_v3, %v1636_v1  ;;  %v1646_v45 = vadd.f32 %v1645_v41, %v1644_v28 }
 0x15f   :  { %v1654_v63 = vadd.f32 %v1653_v0, %v1652_v37  ;;  %v2652_v49 = vsel %vm578_vm5, 1.0, %v4596_v46  ;;  %v2653_v44 = vsel %vm579_vm13, 1.0, %v4596_v46  ;;  %v2654_v32 = vsel %vm580_vm14, 1.0, %v4596_v46 }
 0x160   :  { %v1631_v25 = vrot.slane %v1630_v36, 2  ;;  %v1665_v13 = vadd.f32 %v1664_v43, %v1663_v52  ;;  %v1639_v24 = vrot.slane %v1638_v5, 2  ;;  %v1647_v10 = vrot.slane %v1646_v45, 2 }
 0x161   :  { %v1655_v38 = vrot.slane %v1654_v63, 2  ;;  %v2655_v16 = vsel %vm581_vm15, 1.0, %v4596_v46  ;;  %v1600_v55 = vadd.f32 %v2664_v47, %v4640_v31  ;;  %v2656_v40 = vsel %vm582_vm0, 1.0, %v4596_v46 }
 0x162   :  { %v4138_v34 = vadd.f32 %v1631_v25, %v1630_v36  ;;  %v1542_v12 = vadd.f32 %v2652_v49, %v4040_v8  ;;  %v4142_v22 = vadd.f32 %v1639_v24, %v1638_v5  ;;  %v4144_v53 = vadd.f32 %v1647_v10, %v1646_v45 }
 0x163   :  { %v1666_v7 = vrot.slane %v1665_v13, 2  ;;  %v1550_v18 = vadd.f32 %v2653_v44, %v4065_v9  ;;  %v4147_v54 = vadd.f32 %v1655_v38, %v1654_v63  ;;  %v1558_v62 = vadd.f32 %v2654_v32, %v4043_v58 }
 0x164   :  { %v1543_v4 = vrot.slane %v1542_v12, 4  ;;  %v1566_v47 = vadd.f32 %v2655_v16, %v4047_v29  ;;  %v1576_v57 = vsel %vm1185_vm3, %v2656_v40, 0.0  ;;  %vm593_vm1 = vcmp.eq.s32.totalorder %v337_v23, %v3097_v17 }
 0x165   :  { %v1551_v15 = vrot.slane %v1550_v18, 4  ;;  %vm594_vm12 = vcmp.eq.s32.totalorder %v337_v23, %v3132_v35  ;;  %v1559_v1 = vrot.slane %v1558_v62, 4  ;;  %v1577_v37 = vadd.f32 %v1576_v57, %v4051_v6 }
 0x166   :  { %v1544_v8 = vadd.f32 %v1543_v4, %v1542_v12  ;;  %v1567_v28 = vrot.slane %v1566_v47, 4  ;;  %v4155_v9 = vadd.f32 %v1666_v7, %v1665_v13  ;;  %vm595_vm2 = vcmp.eq.s32.totalorder %v337_v23, %v3104_v20 }
 0x167   :  { %v1552_v56 = vadd.f32 %v1551_v15, %v1550_v18  ;;  %vm596_vm4 = vcmp.eq.s32.totalorder %v337_v23, %v3107_v21  ;;  %v1560_v29 = vadd.f32 %v1559_v1, %v1558_v62  ;;  %v1578_v52 = vrot.slane %v1577_v37, 4 }
 0x168   :  { %4641 = vst [vmem:[#allocation37_spill] sm:$0xff] %v4155_v9  ;;  %v1545_v58 = vrot.slane %v1544_v8, 2  ;;  %v1568_v50 = vadd.f32 %v1567_v28, %v1566_v47  ;;  %v2667_v41 = vsel %vm593_vm1, 1.0, %v4596_v46  ;;  %v2668_v0 = vsel %vm594_vm12, 1.0, %v4596_v46 }
 0x169   :  { %v1553_v3 = vrot.slane %v1552_v56, 2  ;;  %v2669_v36 = vsel %vm595_vm2, 1.0, %v4596_v46  ;;  %v1561_v6 = vrot.slane %v1560_v29, 2  ;;  %v1579_v45 = vadd.f32 %v1578_v52, %v1577_v37 }
 0x16a   :  { %v1546_v43 = vadd.f32 %v1545_v58, %v1544_v8  ;;  %v1569_v5 = vrot.slane %v1568_v50, 2  ;;  %vm597_vm5 = vcmp.eq.s32.totalorder %v337_v23, %v3101_v19  ;;  %v2670_v49 = vsel %vm596_vm4, 1.0, %v4596_v46 }
 0x16b   :  { %v1554_v63 = vadd.f32 %v1553_v3, %v1552_v56  ;;  %v1585_v25 = vadd.f32 %v2667_v41, %v4105_v60  ;;  %v1562_v44 = vadd.f32 %v1561_v6, %v1560_v29  ;;  %v1580_v24 = vrot.slane %v1579_v45, 2  ;;  %v369_v60 = vpop.permute.xlu1 %368 }
 0x16c   :  { %v1547_v13 = vrot.slane %v1546_v43, 1  ;;  %v1570_v32 = vadd.f32 %v1569_v5, %v1568_v50  ;;  %v1593_v16 = vadd.f32 %v2668_v0, %v4108_v51  ;;  %v1601_v31 = vadd.f32 %v2669_v36, %v1600_v55 }
 0x16d   :  { %v1555_v10 = vrot.slane %v1554_v63, 1  ;;  %v1586_v38 = vrot.slane %v1585_v25, 4  ;;  %v1563_v40 = vrot.slane %v1562_v44, 1  ;;  %v1581_v7 = vadd.f32 %v1580_v24, %v1579_v45 }
 0x16e   :  { %v1571_v12 = vrot.slane %v1570_v32, 1  ;;  %v2671_v18 = vsel %vm597_vm5, 1.0, %v4596_v46  ;;  %v4167_v4 = vadd.f32 %v1547_v13, %v1546_v43  ;;  %v1594_v62 = vrot.slane %v1593_v16, 4 }
 0x16f   :  { %v1587_v23 = vadd.f32 %v1586_v38, %v1585_v25  ;;  %v1602_v47 = vrot.slane %v1601_v31, 4  ;;  %v4169_v15 = vadd.f32 %v1555_v10, %v1554_v63  ;;  %v4171_v57 = vadd.f32 %v1563_v40, %v1562_v44  ;;  %v375_v44 = vpop.permute.xlu2 %374 }
 0x170   :  { %v1582_v8 = vrot.slane %v1581_v7, 1  ;;  %v1609_v1 = vadd.f32 %v2670_v49, %v4111_v59  ;;  %v1595_v55 = vadd.f32 %v1594_v62, %v1593_v16  ;;  %v1619_v37 = vsel %vm1185_vm3, %v2671_v18, 0.0 }
 0x171   :  { %v1588_v51 = vrot.slane %v1587_v23, 2  ;;  %v1603_v28 = vadd.f32 %v1602_v47, %v1601_v31  ;;  %v4175_v56 = vadd.f32 %v1571_v12, %v1570_v32  ;;  %v1620_v29 = vadd.f32 %v1619_v37, %v4115_v14 }
 0x172   :  { %v1610_v58 = vrot.slane %v1609_v1, 4  ;;  %vm618_vm13 = vcmp.eq.s32.totalorder %v369_v60, %v3097_v17  ;;  %v1596_v52 = vrot.slane %v1595_v55, 2  ;;  %vm619_vm14 = vcmp.eq.s32.totalorder %v369_v60, %v3132_v35 }
 0x173   :  { %v4179_v50 = vadd.f32 %v1588_v51, %v1587_v23  ;;  %v1604_v3 = vrot.slane %v1603_v28, 2  ;;  %v1621_v59 = vrot.slane %v1620_v29, 4  ;;  %vm620_vm15 = vcmp.eq.s32.totalorder %v369_v60, %v3104_v20 }
 0x174   :  { %v1611_v41 = vadd.f32 %v1610_v58, %v1609_v1  ;;  %vm621_vm0 = vcmp.eq.s32.totalorder %v369_v60, %v3107_v21  ;;  %v4184_v0 = vadd.f32 %v1582_v8, %v1581_v7  ;;  %v4186_v36 = vadd.f32 %v1596_v52, %v1595_v55 }
 0x175   :  { %v4188_v43 = vadd.f32 %v1604_v3, %v1603_v28  ;;  %vm622_vm1 = vcmp.eq.s32.totalorder %v369_v60, %v3101_v19  ;;  %v1622_v6 = vadd.f32 %v1621_v59, %v1620_v29  ;;  %v2692_v5 = vsel %vm618_vm13, 1.0, %v4596_v46 }
 0x176   :  { %4642 = vst [vmem:[#allocation43_spill] sm:$0xff] %v4184_v0  ;;  %v1612_v14 = vrot.slane %v1611_v41, 2  ;;  %v2693_v45 = vsel %vm619_vm14, 1.0, %v4596_v46  ;;  %v2694_v25 = vsel %vm620_vm15, 1.0, %v4596_v46  ;;  %v2695_v13 = vsel %vm621_vm0, 1.0, %v4596_v46 }
 0x177   :  { %v1623_v10 = vrot.slane %v1622_v6, 2  ;;  %v2696_v38 = vsel %vm622_vm1, 1.0, %v4596_v46  ;;  %v1670_v16 = vadd.f32 %v2692_v5, %v4079_v61  ;;  %v1678_v31 = vadd.f32 %v2693_v45, %v4082_v26  ;;  %v388_v61 = vpop.permute.xlu1 %387 }
 0x178   :  { %v4198_v24 = vadd.f32 %v1612_v14, %v1611_v41  ;;  %v1686_v40 = vadd.f32 %v2694_v25, %v4085_v48  ;;  %v1703_v12 = vsel %vm1185_vm3, %v2696_v38, 0.0  ;;  %v1694_v18 = vadd.f32 %v2695_v13, %v4089_v30  ;;  %v4236_v25 = vpop.permute.xlu2 %406 }
 0x179   :  { %v1704_v23 = vadd.f32 %v1703_v12, %v4099_v27  ;;  %vm623_vm12 = vcmp.eq.s32.totalorder %v375_v44, %v3097_v17  ;;  %vm624_vm2 = vcmp.eq.s32.totalorder %v375_v44, %v3132_v35  ;;  %vm625_vm4 = vcmp.eq.s32.totalorder %v375_v44, %v3104_v20 }
 0x17a   :  { %vm626_vm5 = vcmp.eq.s32.totalorder %v375_v44, %v3107_v21  ;;  %vm627_vm13 = vcmp.eq.s32.totalorder %v375_v44, %v3101_v19  ;;  %v4213_v26 = vadd.f32 %v1623_v10, %v1622_v6  ;;  %v2697_v48 = vsel %vm623_vm12, 1.0, %v4596_v46 }
 0x17b   :  { %v2698_v62 = vsel %vm624_vm2, 1.0, %v4596_v46  ;;  %v2699_v30 = vsel %vm625_vm4, 1.0, %v4596_v46  ;;  %v2700_v27 = vsel %vm626_vm5, 1.0, %v4596_v46  ;;  %v2701_v47 = vsel %vm627_vm13, 1.0, %v4596_v46 }
 0x17c   :  { %v1671_v60 = vadd.f32 %v2697_v48, %v1670_v16  ;;  %v1679_v8 = vadd.f32 %v2698_v62, %v1678_v31  ;;  %v1687_v1 = vadd.f32 %v2699_v30, %v1686_v40  ;;  %v1695_v51 = vadd.f32 %v2700_v27, %v1694_v18  ;;  %v394_v16 = vpop.permute.xlu0 %393  ;;  %v4644_v48 = vld [vmem:[#allocation31_spill] sm:$0xff]  ;;  %v4645_v30 = vld [vmem:[#allocation32_spill] sm:$0xff] }
 0x17d   :  { %v1705_v55 = vsel %vm1185_vm3, %v2701_v47, 0.0  ;;  %vm633_vm14 = vcmp.eq.s32.totalorder %v388_v61, %v3097_v17  ;;  %vm634_vm15 = vcmp.eq.s32.totalorder %v388_v61, %v3132_v35  ;;  %vm635_vm0 = vcmp.eq.s32.totalorder %v388_v61, %v3104_v20  ;;  %v4646_v47 = vld [vmem:[#allocation33_spill] sm:$0xff] }
 0x17e   :  { %v1672_v28 = vrot.slane %v1671_v60, 4  ;;  %v1680_v37 = vrot.slane %v1679_v8, 4  ;;  %v1706_v58 = vadd.f32 %v1705_v55, %v1704_v23  ;;  %v1688_v29 = vrot.slane %v1687_v1, 4  ;;  %v1917_v55 = vld [vmem:[#allocation6 + $0x248] sm:$0xff] }
 0x17f   :  { %v1696_v52 = vrot.slane %v1695_v51, 4  ;;  %vm636_vm1 = vcmp.eq.s32.totalorder %v388_v61, %v3107_v21  ;;  %vm637_vm12 = vcmp.eq.s32.totalorder %v388_v61, %v3101_v19  ;;  %v2707_v5 = vsel %vm633_vm14, 1.0, %v4596_v46  ;;  %v1918_v61 = vld [vmem:[#allocation6 + $0x250] sm:$0xff] }
 0x180   :  { %v4225_v3 = vadd.f32 %v1672_v28, %v1671_v60  ;;  %v4227_v41 = vadd.f32 %v1680_v37, %v1679_v8  ;;  %v1707_v59 = vrot.slane %v1706_v58, 4  ;;  %v4230_v14 = vadd.f32 %v1688_v29, %v1687_v1  ;;  %v4647_v8 = vld [vmem:[#allocation34_spill] sm:$0xff]  ;;  %v4648_v28 = vld [vmem:[#allocation35_spill] sm:$0xff]  ;;  %2185 = vmatpush.msrb.mxu0 %v1918_v61 }
 0x181   :  { %v4232_v6 = vadd.f32 %v1696_v52, %v1695_v51  ;;  %v2708_v45 = vsel %vm634_vm15, 1.0, %v4596_v46  ;;  %v2709_v38 = vsel %vm635_vm0, 1.0, %v4596_v46  ;;  %v2710_v12 = vsel %vm636_vm1, 1.0, %v4596_v46 }
 0x182   :  { %v4243_v40 = vadd.f32 %v1707_v59, %v1706_v58  ;;  %v2711_v18 = vsel %vm637_vm12, 1.0, %v4596_v46  ;;  %v1713_v62 = vadd.f32 %v2707_v5, %v4644_v48  ;;  %v1721_v27 = vadd.f32 %v2708_v45, %v4645_v30  ;;  %v401_v5 = vpop.permute.xlu1 %400  ;;  %v1916_v45 = vld [vmem:[#allocation6 + $0x240] sm:$0xff]  ;;  %2186 = vmatpush.msrb.mxu0 %v1917_v55 }
 0x183   :  { %v1729_v60 = vadd.f32 %v2709_v38, %v4646_v47  ;;  %v1737_v1 = vadd.f32 %v2710_v12, %v4647_v8  ;;  %v1746_v51 = vsel %vm1185_vm3, %v2711_v18, 0.0  ;;  %vm638_vm2 = vcmp.eq.s32.totalorder %v394_v16, %v3097_v17  ;;  %v1915_v47 = vld [vmem:[#allocation6 + $0x238] sm:$0xff] }
 0x184   :  { %4643 = vst [vmem:[#allocation44_spill] sm:$0xff] %v4243_v40  ;;  %vm639_vm4 = vcmp.eq.s32.totalorder %v394_v16, %v3132_v35  ;;  %v1747_v37 = vadd.f32 %v1746_v51, %v4648_v28  ;;  %vm640_vm5 = vcmp.eq.s32.totalorder %v394_v16, %v3104_v20  ;;  %vm641_vm13 = vcmp.eq.s32.totalorder %v394_v16, %v3107_v21 }
 0x185   :  { %vm642_vm14 = vcmp.eq.s32.totalorder %v394_v16, %v3101_v19  ;;  %v2712_v58 = vsel %vm638_vm2, 1.0, %v4596_v46  ;;  %v2713_v29 = vsel %vm639_vm4, 1.0, %v4596_v46  ;;  %v2714_v52 = vsel %vm640_vm5, 1.0, %v4596_v46  ;;  %2187 = vmatpush.msrb.mxu0 %v1916_v45 }
 0x186   :  { %v2715_v59 = vsel %vm641_vm13, 1.0, %v4596_v46  ;;  %v2716_v38 = vsel %vm642_vm14, 1.0, %v4596_v46  ;;  %v1714_v12 = vadd.f32 %v2712_v58, %v1713_v62  ;;  %v1722_v18 = vadd.f32 %v2713_v29, %v1721_v27 }
 0x187   :  { %v1730_v48 = vadd.f32 %v2714_v52, %v1729_v60  ;;  %v1738_v30 = vadd.f32 %v2715_v59, %v1737_v1  ;;  %v1748_v16 = vsel %vm1185_vm3, %v2716_v38, 0.0  ;;  %vm648_vm15 = vcmp.eq.s32.totalorder %v4236_v25, %v3097_v17  ;;  %v426_v60 = vpop.permute.xlu2 %425  ;;  %v1914_v1 = vld [vmem:[#allocation6 + $0x230] sm:$0xff]  ;;  %2188 = vmatpush.msrb.mxu0 %v1915_v47  ;;  %v1913_v38 = vld [vmem:[#allocation6 + $0x228] sm:$0xff] }
 0x188   :  { %vm649_vm0 = vcmp.eq.s32.totalorder %v4236_v25, %v3132_v35  ;;  %v1715_v8 = vrot.slane %v1714_v12, 4  ;;  %v1723_v51 = vrot.slane %v1722_v18, 4  ;;  %v1749_v28 = vadd.f32 %v1748_v16, %v1747_v37 }
 0x189   :  { %v1731_v61 = vrot.slane %v1730_v48, 4  ;;  %v1739_v27 = vrot.slane %v1738_v30, 4  ;;  %vm650_vm1 = vcmp.eq.s32.totalorder %v4236_v25, %v3104_v20  ;;  %vm652_vm12 = vcmp.eq.s32.totalorder %v4236_v25, %v3101_v19  ;;  %2189 = vmatpush.msrb.mxu0 %v1914_v1 }
 0x18a   :  { %v4276_v55 = vadd.f32 %v1715_v8, %v1714_v12  ;;  %v4278_v58 = vadd.f32 %v1723_v51, %v1722_v18  ;;  %v1750_v29 = vrot.slane %v1749_v28, 4  ;;  %vm651_vm2 = vcmp.eq.s32.totalorder %v4236_v25, %v3107_v21 }
 0x18b   :  { %v4282_v37 = vadd.f32 %v1731_v61, %v1730_v48  ;;  %v4284_v52 = vadd.f32 %v1739_v27, %v1738_v30  ;;  %v2722_v59 = vsel %vm648_vm15, 1.0, %v4596_v46  ;;  %v2723_v45 = vsel %vm649_vm0, 1.0, %v4596_v46  ;;  %2190 = vmatpush.msrb.mxu0 %v1913_v38  ;;  %v420_v27 = vpop.permute.xlu1 %419 }
 0x18c   :  { %v4294_v12 = vadd.f32 %v1750_v29, %v1749_v28  ;;  %v2724_v18 = vsel %vm650_vm1, 1.0, %v4596_v46  ;;  %v2726_v48 = vsel %vm652_vm12, 1.0, %v4596_v46  ;;  %vm643_vm4 = vcmp.eq.s32.totalorder %v401_v5, %v3097_v17 }
 0x18d   :  { %v2725_v30 = vsel %vm651_vm2, 1.0, %v4596_v46  ;;  %vm644_vm5 = vcmp.eq.s32.totalorder %v401_v5, %v3132_v35  ;;  %vm645_vm13 = vcmp.eq.s32.totalorder %v401_v5, %v3104_v20  ;;  %vm646_vm14 = vcmp.eq.s32.totalorder %v401_v5, %v3107_v21 }
 0x18e   :  { %4649 = vst [vmem:[#allocation45_spill] sm:$0xff] %v4294_v12  ;;  %vm647_vm15 = vcmp.eq.s32.totalorder %v401_v5, %v3101_v19  ;;  %v2717_v25 = vsel %vm643_vm4, 1.0, %v4596_v46  ;;  %v2718_v16 = vsel %vm644_vm5, 1.0, %v4596_v46  ;;  %v2719_v47 = vsel %vm645_vm13, 1.0, %v4596_v46 }
 0x18f   :  { %v1789_v8 = vsel %vm1185_vm3, %v2726_v48, 0.0  ;;  %v2720_v51 = vsel %vm646_vm14, 1.0, %v4596_v46  ;;  %v2721_v61 = vsel %vm647_vm15, 1.0, %v4596_v46  ;;  %v4310_v28 = vadd.f32 %v2722_v59, %v2717_v25 }
 0x190   :  { %v4312_v1 = vadd.f32 %v2723_v45, %v2718_v16  ;;  %v4314_v29 = vadd.f32 %v2724_v18, %v2719_v47  ;;  %v4316_v5 = vadd.f32 %v2725_v30, %v2720_v51  ;;  %vm663_vm0 = vcmp.eq.s32.totalorder %v426_v60, %v3097_v17  ;;  %v432_v30 = vpop.permute.xlu2 %431 }
 0x191   :  { %v1788_v62 = vsel %vm1185_vm3, %v2721_v61, 0.0  ;;  %vm664_vm1 = vcmp.eq.s32.totalorder %v426_v60, %v3132_v35  ;;  %vm665_vm12 = vcmp.eq.s32.totalorder %v426_v60, %v3104_v20  ;;  %vm666_vm2 = vcmp.eq.s32.totalorder %v426_v60, %v3107_v21 }
 0x192   :  { %vm667_vm4 = vcmp.eq.s32.totalorder %v426_v60, %v3101_v19  ;;  %v2737_v59 = vsel %vm663_vm0, 1.0, %v4596_v46  ;;  %v2738_v45 = vsel %vm664_vm1, 1.0, %v4596_v46  ;;  %v2739_v38 = vsel %vm665_vm12, 1.0, %v4596_v46 }
 0x193   :  { %v2740_v18 = vsel %vm666_vm2, 1.0, %v4596_v46  ;;  %v2741_v48 = vsel %vm667_vm4, 1.0, %v4596_v46  ;;  %vm658_vm5 = vcmp.eq.s32.totalorder %v420_v27, %v3097_v17  ;;  %vm659_vm13 = vcmp.eq.s32.totalorder %v420_v27, %v3132_v35  ;;  %v413_v13 = vpop.permute.xlu1 %412 }
 0x194   :  { %v1832_v25 = vsel %vm1185_vm3, %v2741_v48, 0.0  ;;  %vm660_vm14 = vcmp.eq.s32.totalorder %v420_v27, %v3104_v20  ;;  %vm661_vm15 = vcmp.eq.s32.totalorder %v420_v27, %v3107_v21  ;;  %vm662_vm0 = vcmp.eq.s32.totalorder %v420_v27, %v3101_v19 }
 0x195   :  { %v2732_v60 = vsel %vm658_vm5, 1.0, %v4596_v46  ;;  %v2733_v16 = vsel %vm659_vm13, 1.0, %v4596_v46  ;;  %v2734_v47 = vsel %vm660_vm14, 1.0, %v4596_v46  ;;  %v2735_v51 = vsel %vm661_vm15, 1.0, %v4596_v46 }
 0x196   :  { %v2736_v61 = vsel %vm662_vm0, 1.0, %v4596_v46  ;;  %vm668_vm1 = vcmp.eq.s32.totalorder %v432_v30, %v3097_v17  ;;  %vm669_vm12 = vcmp.eq.s32.totalorder %v432_v30, %v3132_v35  ;;  %vm670_vm2 = vcmp.eq.s32.totalorder %v432_v30, %v3104_v20 }
 0x197   :  { %v1831_v48 = vsel %vm1185_vm3, %v2736_v61, 0.0  ;;  %vm671_vm4 = vcmp.eq.s32.totalorder %v432_v30, %v3107_v21  ;;  %vm672_vm5 = vcmp.eq.s32.totalorder %v432_v30, %v3101_v19  ;;  %v2742_v27 = vsel %vm668_vm1, 1.0, %v4596_v46 }
 0x198   :  { %v2743_v23 = vsel %vm669_vm12, 1.0, %v4596_v46  ;;  %v2744_v7 = vsel %vm670_vm2, 1.0, %v4596_v46  ;;  %v2745_v31 = vsel %vm671_vm4, 1.0, %v4596_v46  ;;  %v2746_v32 = vsel %vm672_vm5, 1.0, %v4596_v46 }
 0x199   :  { %v1799_v10 = vadd.f32 %v2737_v59, %v2732_v60  ;;  %v1807_v49 = vadd.f32 %v2738_v45, %v2733_v16  ;;  %v1815_v44 = vadd.f32 %v2739_v38, %v2734_v47  ;;  %v1823_v63 = vadd.f32 %v2740_v18, %v2735_v51  ;;  %v1911_v16 = vld [vmem:[#allocation6 + $0x218] sm:$0xff]  ;;  %v1910_v47 = vld [vmem:[#allocation6 + $0x210] sm:$0xff] }
 0x19a   :  { %v1833_v61 = vadd.f32 %v1832_v25, %v1831_v48  ;;  %v1834_v0 = vsel %vm1185_vm3, %v2746_v32, 0.0  ;;  %vm653_vm13 = vcmp.eq.s32.totalorder %v413_v13, %v3097_v17  ;;  %vm654_vm14 = vcmp.eq.s32.totalorder %v413_v13, %v3132_v35  ;;  %v1912_v32 = vld [vmem:[#allocation6 + $0x220] sm:$0xff] }
 0x19b   :  { %v1800_v30 = vadd.f32 %v2742_v27, %v1799_v10  ;;  %v4354_v39 = vadd.f32 %v2743_v23, %v1807_v49  ;;  %v4356_v12 = vadd.f32 %v2744_v7, %v1815_v44  ;;  %v4358_v40 = vadd.f32 %v2745_v31, %v1823_v63  ;;  %2191 = vmatpush.msrb.mxu0 %v1912_v32 }
 0x19c   :  { %v4360_v9 = vadd.f32 %v1834_v0, %v1833_v61  ;;  %vm655_vm15 = vcmp.eq.s32.totalorder %v413_v13, %v3104_v20  ;;  %vm656_vm0 = vcmp.eq.s32.totalorder %v413_v13, %v3107_v21  ;;  %vm657_vm1 = vcmp.eq.s32.totalorder %v413_v13, %v3101_v19 }
 0x19d   :  { %v1790_v59 = vadd.f32 %v1789_v8, %v1788_v62  ;;  %v1801_v45 = vrot.slane %v1800_v30, 4  ;;  %v1809_v38 = vrot.slane %v4354_v39, 4  ;;  %v1817_v49 = vrot.slane %v4356_v12, 4  ;;  %2192 = vmatpush.msrb.mxu0 %v1911_v16 }
 0x19e   :  { %v1825_v7 = vrot.slane %v4358_v40, 4  ;;  %v2727_v0 = vsel %vm653_vm13, 1.0, %v4596_v46  ;;  %v2728_v20 = vsel %vm654_vm14, 1.0, %v4596_v46  ;;  %v2729_v19 = vsel %vm655_vm15, 1.0, %v4596_v46 }
 0x19f   :  { %v2730_v21 = vsel %vm656_vm0, 1.0, %v4596_v46  ;;  %v2731_v63 = vsel %vm657_vm1, 1.0, %v4596_v46  ;;  %v1757_v44 = vadd.f32 %v2727_v0, %v4310_v28  ;;  %v1765_v10 = vadd.f32 %v2728_v20, %v4312_v1  ;;  %2193 = vmatpush.msrb.mxu0 %v1910_v47 }
 0x1a0   :  { %v1836_v31 = vrot.slane %v4360_v9, 4  ;;  %v4381_v23 = vadd.f32 %v2729_v19, %v4314_v29  ;;  %v4384_v17 = vadd.f32 %v2730_v21, %v4316_v5  ;;  %v1791_v35 = vsel %vm1185_vm3, %v2731_v63, 0.0 }
 0x1a1   :  { %v1758_v13 = vrot.slane %v1757_v44, 4  ;;  %v1766_v62 = vrot.slane %v1765_v10, 4  ;;  %v4650_v8 = vrot.slane %v4179_v50, 1  ;;  %v1633_v28 = vrot.slane %v4138_v34, 1 }
 0x1a2   :  { %v1774_v1 = vrot.slane %v4381_v23, 4  ;;  %v4392_v25 = vadd.f32 %v1791_v35, %v1790_v59  ;;  %v4651_v29 = vrot.slane %v4225_v3, 2  ;;  %v1717_v5 = vrot.slane %v4276_v55, 2 }
 0x1a3   :  { %v1591_v18 = vadd.f32 %v4650_v8, %v4179_v50  ;;  %v1782_v51 = vrot.slane %v4384_v17, 4  ;;  %v1634_v48 = vadd.f32 %v1633_v28, %v4138_v34  ;;  %v1759_v27 = vadd.f32 %v1758_v13, %v1757_v44 }
 0x1a4   :  { %v1675_v60 = vadd.f32 %v4651_v29, %v4225_v3  ;;  %v1802_v50 = vadd.f32 %v1801_v45, %v1800_v30  ;;  %v1718_v32 = vadd.f32 %v1717_v5, %v4276_v55  ;;  %v2041_v59 = vsel %vm1999_vm6, %v4167_v4, %v3925_v11 }
 0x1a5   :  { %v4652_v3 = vrot.slane %v4186_v36, 1  ;;  %v1760_v20 = vrot.slane %v1759_v27, 2  ;;  %v2042_v21 = vsel %vm2001_vm7, %v1591_v18, %v2041_v59  ;;  %v1641_v34 = vrot.slane %v4142_v22, 1 }
 0x1a6   :  { %v1676_v61 = vrot.slane %v1675_v60, 1  ;;  %v1803_v19 = vrot.slane %v1802_v50, 2  ;;  %v1719_v45 = vrot.slane %v1718_v32, 1  ;;  %v2043_v63 = vsel %vm2003_vm8, %v1634_v48, %v2042_v21 }
 0x1a7   :  { %v1599_v0 = vadd.f32 %v4652_v3, %v4186_v36  ;;  %v4653_v55 = vrot.slane %v4227_v41, 2  ;;  %v1761_v11 = vadd.f32 %v1760_v20, %v1759_v27  ;;  %v1642_v35 = vadd.f32 %v1641_v34, %v4142_v22 }
 0x1a8   :  { %v1677_v30 = vadd.f32 %v1676_v61, %v1675_v60  ;;  %v1804_v4 = vadd.f32 %v1803_v19, %v1802_v50  ;;  %v1725_v36 = vrot.slane %v4278_v58, 2  ;;  %v1720_v13 = vadd.f32 %v1719_v45, %v1718_v32 }
 0x1a9   :  { %v1683_v44 = vadd.f32 %v4653_v55, %v4227_v41  ;;  %v1767_v28 = vadd.f32 %v1766_v62, %v1765_v10  ;;  %v1762_v29 = vrot.slane %v1761_v11, 1  ;;  %v1810_v16 = vadd.f32 %v1809_v38, %v4354_v39 }
 0x1aa   :  { %v2044_v8 = vsel %vm2005_vm9, %v1677_v30, %v2043_v63  ;;  %v1805_v60 = vrot.slane %v1804_v4, 1  ;;  %v1726_v5 = vadd.f32 %v1725_v36, %v4278_v58  ;;  %v2048_v22 = vsel %vm1999_vm6, %v4169_v15, %v3928_v2 }
 0x1ab   :  { %v1684_v18 = vrot.slane %v1683_v44, 1  ;;  %v2045_v47 = vsel %vm2007_vm10, %v1720_v13, %v2044_v8  ;;  %v1768_v48 = vrot.slane %v1767_v28, 2  ;;  %v1763_v27 = vadd.f32 %v1762_v29, %v1761_v11 }
 0x1ac   :  { %v1806_v50 = vadd.f32 %v1805_v60, %v1804_v4  ;;  %v1727_v61 = vrot.slane %v1726_v5, 1  ;;  %v1811_v32 = vrot.slane %v1810_v16, 2  ;;  %v2049_v10 = vsel %vm2001_vm7, %v1599_v0, %v2048_v22  ;;  %v1909_v4 = vld [vmem:[#allocation6 + $0x208] sm:$0xff] }
 0x1ad   :  { %v1685_v41 = vadd.f32 %v1684_v18, %v1683_v44  ;;  %v1769_v59 = vadd.f32 %v1768_v48, %v1767_v28  ;;  %v4654_v58 = vrot.slane %v4188_v43, 1  ;;  %v1649_v39 = vrot.slane %v4144_v53, 1  ;;  %2194 = vmatpush.msrb.mxu0 %v1909_v4  ;;  %v2261_v18 = vld [vmem:[#allocation8 + $0xf0] sm:$0xff]  ;;  %v2262_v28 = vld [vmem:[#allocation8 + $0xf8] sm:$0xff] }
 0x1ae   :  { %v2046_v38 = vsel %vm2009_vm11, %v1763_v27, %v2045_v47  ;;  %v1728_v3 = vadd.f32 %v1727_v61, %v1726_v5  ;;  %v1812_v20 = vadd.f32 %v1811_v32, %v1810_v16  ;;  %v2050_v19 = vsel %vm2003_vm8, %v1642_v35, %v2049_v10  ;;  %v1908_v35 = vld [vmem:[#allocation6 + $0x200] sm:$0xff]  ;;  %2269 = vmatpush.msrb.mxu1 %v2261_v18  ;;  %v2258_v47 = vld [vmem:[#allocation8 + $0xd8] sm:$0xff]  ;;  %v2257_v61 = vld [vmem:[#allocation8 + $0xd0] sm:$0xff] }
 0x1af   :  { %v1607_v62 = vadd.f32 %v4654_v58, %v4188_v43  ;;  %vm4655_vm12 = vcmask 1047559   ;;  %v1770_v15 = vrot.slane %v1769_v59, 1  ;;  %v2051_v21 = vsel %vm2005_vm9, %v1685_v41, %v2050_v19  ;;  %2292 = vmatpush.msrb.mxu2 %v2262_v28  ;;  %2195 = vmatpush.msrb.mxu0 %v1908_v35  ;;  %v2256_v58 = vld [vmem:[#allocation8 + $0xc8] sm:$0xff] }
 0x1b0   :  { %v2047_v2 = vsel %vm4655_vm12, %v1806_v50, %v2046_v38  ;;  %v1650_v34 = vadd.f32 %v1649_v39, %v4144_v53  ;;  %v1813_v0 = vrot.slane %v1812_v20, 1  ;;  %v2052_v30 = vsel %vm2007_vm10, %v1728_v3, %v2051_v21  ;;  %vm4657_vm2 = vmmov %vm4655_vm12  ;;  %v4664_v28 = vld [vmem:[#allocation40_spill] sm:$0xff] }
 0x1b1   :  { %2107 = vmatmul.f32.gmra.mxu0 %v2047_v2  ;;  %v4656_v43 = vrot.slane %v4230_v14, 2  ;;  %v1733_v63 = vrot.slane %v4282_v37, 2  ;;  %v1771_v55 = vadd.f32 %v1770_v15, %v1769_v59  ;;  %v1775_v44 = vadd.f32 %v1774_v1, %v4381_v23  ;;  %vm4661_vm4 = vmmov %vm4657_vm2 }
 0x1b2   :  { %v1818_v11 = vadd.f32 %v1817_v49, %v4356_v12  ;;  %v2055_v53 = vsel %vm1999_vm6, %v4171_v57, %v3930_v42  ;;  %v1814_v36 = vadd.f32 %v1813_v0, %v1812_v20  ;;  %v2259_v42 = vld [vmem:[#allocation8 + $0xe0] sm:$0xff]  ;;  %v2260_v57 = vld [vmem:[#allocation8 + $0xe8] sm:$0xff]  ;;  %v1657_v22 = vrot.slane %v4147_v54, 1  ;;  %v2253_v0 = vld [vmem:[#allocation8 + $0xb0] sm:$0xff] }
 0x1b3   :  { %v1691_v45 = vadd.f32 %v4656_v43, %v4230_v14  ;;  %v1734_v8 = vadd.f32 %v1733_v63, %v4282_v37  ;;  %v2056_v14 = vsel %vm2001_vm7, %v1607_v62, %v2055_v53  ;;  %v2053_v23 = vsel %vm2009_vm11, %v1771_v55, %v2052_v30  ;;  %2293 = vmatpush.msrb.mxu2 %v2260_v57  ;;  %v4660_v55 = vld [vmem:[#allocation39_spill] sm:$0xff]  ;;  %v2252_v53 = vld [vmem:[#allocation8 + $0xa8] sm:$0xff]  ;;  %vm4672_vm13 = vmmov %vm4657_vm2 }
 0x1b4   :  { %v1776_v1 = vrot.slane %v1775_v44, 2  ;;  %v1819_v29 = vrot.slane %v1818_v11, 2  ;;  %v2057_v12 = vsel %vm2003_vm8, %v1650_v34, %v2056_v14  ;;  %v2054_v49 = vsel %vm4657_vm2, %v1814_v36, %v2053_v23  ;;  %2270 = vmatpush.msrb.mxu1 %v2259_v42 }
 0x1b5   :  { %v1692_v13 = vrot.slane %v1691_v45, 1  ;;  %v1735_v5 = vrot.slane %v1734_v8, 1  ;;  %v4658_v37 = vrot.slane %v4198_v24, 1  ;;  %2130 = vmatmul.f32.gmra.mxu1 %v2054_v49  ;;  %v4659_v27 = vrot.slane %v4232_v6, 2  ;;  %2294 = vmatpush.msrb.mxu2 %v2258_v47  ;;  %v4666_v49 = vld [vmem:[#allocation38_spill] sm:$0xff] }
 0x1b6   :  { %v1777_v41 = vadd.f32 %v1776_v1, %v1775_v44  ;;  %v1820_v48 = vadd.f32 %v1819_v29, %v1818_v11  ;;  %v1741_v10 = vrot.slane %v4284_v52, 2  ;;  %v1658_v38 = vadd.f32 %v1657_v22, %v4147_v54  ;;  %2271 = vmatpush.msrb.mxu1 %v2257_v61  ;;  %v2251_v11 = vld [vmem:[#allocation8 + $0xa0] sm:$0xff]  ;;  %v2249_v29 = vld [vmem:[#allocation8 + $0x90] sm:$0xff]  ;;  %v4670_v22 = vld [vmem:[#allocation24_spill] sm:$0xff] }
 0x1b7   :  { %v1693_v60 = vadd.f32 %v1692_v13, %v1691_v45  ;;  %v1615_v16 = vadd.f32 %v4658_v37, %v4198_v24  ;;  %v1699_v50 = vadd.f32 %v4659_v27, %v4232_v6  ;;  %v1736_v32 = vadd.f32 %v1735_v5, %v1734_v8  ;;  %v2255_v6 = vld [vmem:[#allocation8 + $0xc0] sm:$0xff]  ;;  %2295 = vmatpush.msrb.mxu2 %v2256_v58  ;;  %v4662_v13 = vld [vmem:[#allocation36_spill] sm:$0xff]  ;;  %v2250_v5 = vld [vmem:[#allocation8 + $0x98] sm:$0xff] }
 0x1b8   :  { %v1783_v24 = vadd.f32 %v1782_v51, %v4384_v17  ;;  %v1778_v62 = vrot.slane %v1777_v41, 1  ;;  %v1821_v39 = vrot.slane %v1820_v48, 1  ;;  %v1742_v19 = vadd.f32 %v1741_v10, %v4284_v52  ;;  %v2254_v17 = vld [vmem:[#allocation8 + $0xb8] sm:$0xff]  ;;  %2272 = vmatpush.msrb.mxu1 %v2255_v6  ;;  %v2247_v61 = vld [vmem:[#allocation8 + $0x80] sm:$0xff] }
 0x1b9   :  { %v2058_v59 = vsel %vm2005_vm9, %v1693_v60, %v2057_v12  ;;  %v1700_v3 = vrot.slane %v1699_v50, 1  ;;  %v1826_v15 = vadd.f32 %v1825_v7, %v4358_v40  ;;  %v2062_v54 = vsel %vm1999_vm6, %v4175_v56, %v3933_v33  ;;  %2296 = vmatpush.msrb.mxu2 %v2254_v17  ;;  %v2246_v17 = vld [vmem:[#allocation8 + $0x78] sm:$0xff] }
 0x1ba   :  { %v2059_v20 = vsel %vm2007_vm10, %v1736_v32, %v2058_v59  ;;  %v1784_v2 = vrot.slane %v1783_v24, 2  ;;  %v1779_v51 = vadd.f32 %v1778_v62, %v1777_v41  ;;  %v1822_v21 = vadd.f32 %v1821_v39, %v1820_v48  ;;  %2273 = vmatpush.msrb.mxu1 %v2253_v0  ;;  %v4669_v48 = vld [vmem:[#allocation25_spill] sm:$0xff]  ;;  %v2248_v62 = vld [vmem:[#allocation8 + $0x88] sm:$0xff] }
 0x1bb   :  { %v1701_v34 = vadd.f32 %v1700_v3, %v1699_v50  ;;  %v1743_v30 = vrot.slane %v1742_v19, 1  ;;  %v1827_v45 = vrot.slane %v1826_v15, 2  ;;  %v2063_v52 = vsel %vm2001_vm7, %v1615_v16, %v2062_v54  ;;  %2297 = vmatpush.msrb.mxu2 %v2252_v53  ;;  %v4667_v16 = vld [vmem:[#allocation41_spill] sm:$0xff]  ;;  %v2823_v50 = vld [vmem:[#allocation3] sm:$0xff] }
 0x1bc   :  { %v1785_v43 = vadd.f32 %v1784_v2, %v1783_v24  ;;  %v1793_v63 = vrot.slane %v4392_v25, 4  ;;  %v2060_v40 = vsel %vm2009_vm11, %v1779_v51, %v2059_v20  ;;  %v2064_v7 = vsel %vm2003_vm8, %v1658_v38, %v2063_v52  ;;  %2274 = vmatpush.msrb.mxu1 %v2251_v11  ;;  %v4671_v24 = vld [vmem:[#allocation18_spill] sm:$0xff]  ;;  %v2245_v20 = vld [vmem:[#allocation8 + $0x70] sm:$0xff]  ;;  %v4675_v52 = vld [vmem:[#allocation44_spill] sm:$0xff] }
 0x1bd   :  { %v1367_v44 = vrot.slane %v4660_v55, 1  ;;  %v2061_v33 = vsel %vm4661_vm4, %v1822_v21, %v2060_v40  ;;  %v1744_v56 = vadd.f32 %v1743_v30, %v1742_v19  ;;  %v1828_v35 = vadd.f32 %v1827_v45, %v1826_v15  ;;  %2298 = vmatpush.msrb.mxu2 %v2250_v5 }
 0x1be   :  { %v1786_v4 = vrot.slane %v1785_v43, 1  ;;  %2153 = vmatmul.f32.gmra.mxu2 %v2061_v33  ;;  %v2065_v36 = vsel %vm2005_vm9, %v1701_v34, %v2064_v7  ;;  %v4663_v8 = vrot.slane %v4662_v13, 1  ;;  %v4665_v23 = vrot.slane %v4664_v28, 2  ;;  %2275 = vmatpush.msrb.mxu1 %v2249_v29 }
 0x1bf   :  { %v1368_v18 = vadd.f32 %v1367_v44, %v4660_v55  ;;  %v1829_v42 = vrot.slane %v1828_v35, 1  ;;  %v2066_v57 = vsel %vm2007_vm10, %v1744_v56, %v2065_v36  ;;  %v1451_v60 = vrot.slane %v4666_v49, 2  ;;  %2299 = vmatpush.msrb.mxu2 %v2248_v62  ;;  %v4677_v55 = vld [vmem:[#allocation45_spill] sm:$0xff]  ;;  %v4679_v56 = vld [vmem:[#allocation43_spill] sm:$0xff]  ;;  %v2236_v62 = vld [vmem:[#allocation8 + $0x28] sm:$0xff] }
 0x1c0   :  { %v1325_v14 = vadd.f32 %v4663_v8, %v4662_v13  ;;  %v1409_v1 = vadd.f32 %v4665_v23, %v4664_v28  ;;  %v1787_v12 = vadd.f32 %v1786_v4, %v1785_v43  ;;  %v4668_v47 = vrot.slane %v4667_v16, 4  ;;  %2276 = vmatpush.msrb.mxu1 %v2247_v61  ;;  %v4674_v43 = vld [vmem:[#allocation37_spill] sm:$0xff]  ;;  %v2242_v61 = vld [vmem:[#allocation8 + $0x58] sm:$0xff] }
 0x1c1   :  { %v2034_v27 = vsel %vm1999_vm6, %v4670_v22, %v4669_v48  ;;  %vm2210_vm5 = vcmp.ne.s32.totalorder %v2823_v50, 0  ;;  %v1830_v32 = vadd.f32 %v1829_v42, %v1828_v35  ;;  %v1452_v10 = vadd.f32 %v1451_v60, %v4666_v49  ;;  %2300 = vmatpush.msrb.mxu2 %v2246_v17  ;;  %v2241_v50 = vld [vmem:[#allocation8 + $0x50] sm:$0xff]  ;;  %v2332_v17 = vld [vmem:[#allocation9 + $0x68] sm:$0xff] }
 0x1c2   :  { %v1410_v37 = vrot.slane %v1409_v1, 1  ;;  %v1493_v41 = vadd.f32 %v4668_v47, %v4667_v16  ;;  %v2067_v59 = vsel %vm2009_vm11, %v1787_v12, %v2066_v57  ;;  %v2035_v58 = vsel %vm2001_vm7, %v4671_v24, %v2034_v27  ;;  %2277 = vmatpush.msrb.mxu1 %v2245_v20  ;;  %v2244_v27 = vld [vmem:[#allocation8 + $0x68] sm:$0xff]  ;;  %v2238_v24 = vld [vmem:[#allocation8 + $0x38] sm:$0xff] }
 0x1c3   :  { %v2036_v3 = vsel %vm2003_vm8, %v1325_v14, %v2035_v58  ;;  %v2749_v6 = vsel %vm2210_vm5, 1.0, %v4596_v46  ;;  %v2068_v19 = vsel %vm4672_vm13, %v1830_v32, %v2067_v59  ;;  %v1453_v2 = vrot.slane %v1452_v10, 1  ;;  %2301 = vmatpush.msrb.mxu2 %v2244_v27  ;;  %v2239_v32 = vld [vmem:[#allocation8 + $0x40] sm:$0xff]  ;;  %v2240_v59 = vld [vmem:[#allocation8 + $0x48] sm:$0xff]  ;;  %v2334_v20 = vld [vmem:[#allocation9 + $0x78] sm:$0xff] }
 0x1c4   :  { %v1411_v39 = vadd.f32 %v1410_v37, %v1409_v1  ;;  %v1494_v38 = vrot.slane %v1493_v41, 2  ;;  %v2037_v15 = vsel %vm2005_vm9, %v1368_v18, %v2036_v3  ;;  %vm2216_vm14 = vcmask 195584   ;;  %2176 = vmatmul.f32.gmra.mxu3 %v2068_v19  ;;  %v2235_v58 = vld [vmem:[#allocation8 + $0x20] sm:$0xff]  ;;  %v2333_v19 = vld [vmem:[#allocation9 + $0x70] sm:$0xff]  ;;  %v2320_v27 = vld [vmem:[#allocation9 + $0x8] sm:$0xff] }
 0x1c5   :  { %v2217_v34 = vsel %vm2216_vm14, %v2749_v6, 0.0  ;;  %v4673_v54 = vrot.slane %v4213_v26, 1  ;;  %v1454_v30 = vadd.f32 %v1453_v2, %v1452_v10  ;;  %v1668_v45 = vrot.slane %v4674_v43, 1  ;;  %2302 = vmatpush.msrb.mxu2 %v2242_v61  ;;  %v2237_v10 = vld [vmem:[#allocation8 + $0x30] sm:$0xff]  ;;  %v2231_v3 = vld [vmem:[#allocation8] sm:$0xff]  ;;  %v2232_v6 = vld [vmem:[#allocation8 + $0x8] sm:$0xff]  ;;  %v2105_v2 = vpop.f32.mrf.mxu0  ;;  %2355 = vmatpush.msrb.mxu3 %v2334_v20 }
 0x1c6   :  { %v1495_v51 = vadd.f32 %v1494_v38, %v1493_v41  ;;  %v2038_v21 = vsel %vm2007_vm10, %v1411_v39, %v2037_v15  ;;  %2218 = vadd.xlane.f32.xlu0 %v2217_v34  ;;  %v4676_v40 = vrot.slane %v4675_v52, 2  ;;  %v1752_v44 = vrot.slane %v4677_v55, 2  ;;  %v2233_v39 = vld [vmem:[#allocation8 + $0x10] sm:$0xff]  ;;  %v2234_v38 = vld [vmem:[#allocation8 + $0x18] sm:$0xff]  ;;  %v2331_v34 = vld [vmem:[#allocation9 + $0x60] sm:$0xff] }
 0x1c7   :  { %v1626_v0 = vadd.f32 %v4673_v54, %v4213_v26  ;;  %v1794_v53 = vadd.f32 %v1793_v63, %v4392_v25  ;;  %v1837_v33 = vadd.f32 %v1836_v31, %v4360_v9  ;;  %v4678_v26 = vld [vmem:[#allocation17_spill] sm:$0xff]  ;;  %v2039_v35 = vsel %vm2009_vm11, %v1454_v30, %v2038_v21  ;;  %v2824_v31 = vld [vmem:[#allocation3 + $0x8] sm:$0xff]  ;;  %2303 = vmatpush.msrb.mxu2 %v2240_v59  ;;  %v2350_v15 = vld [vmem:[#allocation9 + $0xf8] sm:$0xff] }
 0x1c8   :  { %v1710_v7 = vadd.f32 %v4676_v40, %v4675_v52  ;;  %v1496_v11 = vrot.slane %v1495_v51, 1  ;;  %v2069_v4 = vsel %vm1999_vm6, %v4679_v56, %v4678_v26  ;;  %v1669_v36 = vadd.f32 %v1668_v45, %v4674_v43  ;;  %vm4680_vm6 = vmmov %vm4657_vm2  ;;  %2378 = vmatpush.msra.mxu0 %v2350_v15  ;;  %2356 = vmatpush.msrb.mxu3 %v2333_v19  ;;  %v2348_v21 = vld [vmem:[#allocation9 + $0xe8] sm:$0xff]  ;;  %v2347_v54 = vld [vmem:[#allocation9 + $0xe0] sm:$0xff]  ;;  %v2128_v52 = vpop.f32.mrf.mxu1 }
 0x1c9   :  { %v1753_v8 = vadd.f32 %v1752_v44, %v4677_v55  ;;  %v1795_v18 = vrot.slane %v1794_v53, 2  ;;  %v1838_v28 = vrot.slane %v1837_v33, 2  ;;  %v2070_v25 = vsel %vm2001_vm7, %v1626_v0, %v2069_v4  ;;  %vm4681_vm7 = vmmov %vm4657_vm2  ;;  %2304 = vmatpush.msrb.mxu2 %v2238_v24  ;;  %v2330_v30 = vld [vmem:[#allocation9 + $0x58] sm:$0xff]  ;;  %v2329_v45 = vld [vmem:[#allocation9 + $0x50] sm:$0xff] }
 0x1ca   :  { %v1711_v13 = vrot.slane %v1710_v7, 1  ;;  %v1497_v14 = vadd.f32 %v1496_v11, %v1495_v51  ;;  %v2071_v9 = vsel %vm2003_vm8, %v1669_v36, %v2070_v25  ;;  %vm2211_vm15 = vcmp.ne.s32.totalorder %v2824_v31, 0  ;;  %v2349_v51 = vld [vmem:[#allocation9 + $0xf0] sm:$0xff]  ;;  %2357 = vmatpush.msrb.mxu3 %v2332_v17  ;;  %v2346_v43 = vld [vmem:[#allocation9 + $0xd8] sm:$0xff]  ;;  %v2328_v44 = vld [vmem:[#allocation9 + $0x48] sm:$0xff]  ;;  %v2151_v11 = vpop.f32.mrf.mxu2 }
 0x1cb   :  { %v1754_v23 = vrot.slane %v1753_v8, 1  ;;  %v1796_v29 = vadd.f32 %v1795_v18, %v1794_v53  ;;  %v1839_v12 = vadd.f32 %v1838_v28, %v1837_v33  ;;  %v2750_v42 = vsel %vm2211_vm15, 1.0, %v4596_v46  ;;  %v2243_v46 = vld [vmem:[#allocation8 + $0x60] sm:$0xff]  ;;  %2305 = vmatpush.msrb.mxu2 %v2236_v62  ;;  %2379 = vmatpush.msra.mxu0 %v2349_v51  ;;  %v2345_v55 = vld [vmem:[#allocation9 + $0xd0] sm:$0xff]  ;;  %v2344_v53 = vld [vmem:[#allocation9 + $0xc8] sm:$0xff] }
 0x1cc   :  { %v1712_v63 = vadd.f32 %v1711_v13, %v1710_v7  ;;  %v2040_v1 = vsel %vm4680_vm6, %v1497_v14, %v2039_v35  ;;  %v2220_v60 = vsel %vm2216_vm14, %v2750_v42, 0.0  ;;  %2278 = vmatpush.msrb.mxu1 %v2243_v46  ;;  %2358 = vmatpush.msrb.mxu3 %v2331_v34  ;;  %v2129_v33 = vadd.f32 %v2128_v52, %v2105_v2  ;;  %v2327_v26 = vld [vmem:[#allocation9 + $0x40] sm:$0xff]  ;;  %v2326_v36 = vld [vmem:[#allocation9 + $0x38] sm:$0xff]  ;;  %v2341_v25 = vld [vmem:[#allocation9 + $0xb0] sm:$0xff] }
 0x1cd   :  { %2747 = vmatmul.msk.f32.vlgmr.msrb.gmra.mxu0 %vm1185_vm3, %v2040_v1  ;;  %v1755_v57 = vadd.f32 %v1754_v23, %v1753_v8  ;;  %v1797_v5 = vrot.slane %v1796_v29, 1  ;;  %v1840_v37 = vrot.slane %v1839_v12, 1  ;;  %2221 = vadd.xlane.f32.xlu1 %v2220_v60  ;;  %v2343_v56 = vld [vmem:[#allocation9 + $0xc0] sm:$0xff]  ;;  %v2342_v13 = vld [vmem:[#allocation9 + $0xb8] sm:$0xff]  ;;  %v2325_v8 = vld [vmem:[#allocation9 + $0x30] sm:$0xff] }
 0x1ce   :  { %v2072_v49 = vsel %vm2005_vm9, %v1712_v63, %v2071_v9  ;;  %2279 = vmatpush.msrb.mxu1 %v2241_v50  ;;  %2306 = vmatpush.msrb.mxu2 %v2234_v38  ;;  %v2152_v4 = vadd.f32 %v2151_v11, %v2129_v33  ;;  %v2324_v23 = vld [vmem:[#allocation9 + $0x28] sm:$0xff]  ;;  %v2323_v42 = vld [vmem:[#allocation9 + $0x20] sm:$0xff]  ;;  %v2322_v60 = vld [vmem:[#allocation9 + $0x18] sm:$0xff] }
 0x1cf   :  { %v2073_v16 = vsel %vm2007_vm10, %v1755_v57, %v2072_v49  ;;  %v1798_v47 = vadd.f32 %v1797_v5, %v1796_v29  ;;  %v1841_v41 = vadd.f32 %v1840_v37, %v1839_v12  ;;  %2380 = vmatpush.msra.mxu0 %v2348_v21  ;;  %2359 = vmatpush.msrb.mxu3 %v2330_v30  ;;  %v2340_v46 = vld [vmem:[#allocation9 + $0xa8] sm:$0xff]  ;;  %v2339_v50 = vld [vmem:[#allocation9 + $0xa0] sm:$0xff]  ;;  %v2337_v59 = vld [vmem:[#allocation9 + $0x90] sm:$0xff] }
 0x1d0   :  { %2280 = vmatpush.msrb.mxu1 %v2239_v32  ;;  %2307 = vmatpush.msrb.mxu2 %v2232_v6  ;;  %v2319_v61 = vld [vmem:[#allocation9] sm:$0xff]  ;;  %v2338_v32 = vld [vmem:[#allocation9 + $0x98] sm:$0xff]  ;;  %v2417_v62 = vld [vmem:[#allocation11 + $0x70] sm:$0xff] }
 0x1d1   :  { %v2074_v48 = vsel %vm2009_vm11, %v1798_v47, %v2073_v16  ;;  %2381 = vmatpush.msra.mxu0 %v2347_v54  ;;  %2360 = vmatpush.msrb.mxu3 %v2329_v45  ;;  %v2335_v24 = vld [vmem:[#allocation9 + $0x80] sm:$0xff]  ;;  %v2263_v6 = vld [vmem:[%s4549_s3] sm:$0x3]  ;;  %v2413_v20 = vld [vmem:[#allocation11 + $0x50] sm:$0xff] }
 0x1d2   :  { %v2075_v22 = vsel %vm4681_vm7, %v1841_v41, %v2074_v48  ;;  %2281 = vmatpush.msrb.mxu1 %v2237_v10  ;;  %v2174_v14 = vpop.f32.mrf.mxu3  ;;  %v2336_v10 = vld [vmem:[#allocation9 + $0x88] sm:$0xff]  ;;  %v2415_v38 = vld [vmem:[#allocation11 + $0x60] sm:$0xff]  ;;  %v2265_v19 = vperm.slane %v2263_v6, 0  ;;  %v2410_v21 = vld [vmem:[#allocation11 + $0x38] sm:$0xff]  ;;  %v2266_v54 = vperm.slane %v2263_v6, 1 }
 0x1d3   :  { %2382 = vmatpush.msra.mxu0 %v2346_v43  ;;  %2361 = vmatpush.msrb.mxu3 %v2328_v44  ;;  %v2175_v63 = vadd.f32 %v2174_v14, %v2152_v4  ;;  %v2412_v2 = vld [vmem:[#allocation11 + $0x48] sm:$0xff]  ;;  %v2411_v15 = vld [vmem:[#allocation11 + $0x40] sm:$0xff] }
 0x1d4   :  { %2282 = vmatpush.msrb.mxu1 %v2235_v58  ;;  %v2418_v58 = vld [vmem:[#allocation11 + $0x78] sm:$0xff]  ;;  %v2408_v30 = vld [vmem:[#allocation11 + $0x28] sm:$0xff]  ;;  %v2407_v52 = vld [vmem:[#allocation11 + $0x20] sm:$0xff] }
 0x1d5   :  { %2748 = vmatmul.msk.f32.gmra.mxu0 %vm1185_vm3, %v2075_v22  ;;  %2362 = vmatpush.msrb.mxu3 %v2327_v26  ;;  %v2321_v22 = vld [vmem:[#allocation9 + $0x10] sm:$0xff]  ;;  %v2406_v26 = vld [vmem:[#allocation11 + $0x18] sm:$0xff]  ;;  %v2404_v4 = vld [vmem:[#allocation11 + $0x8] sm:$0xff] }
 0x1d6   :  { %2283 = vmatpush.msrb.mxu1 %v2233_v39  ;;  %2383 = vmatpush.msra.mxu0 %v2345_v55  ;;  %v2416_v39 = vld [vmem:[#allocation11 + $0x68] sm:$0xff] }
 0x1d7   :  { %2363 = vmatpush.msrb.mxu3 %v2326_v36  ;;  %2753 = vmatpush.msra.mxu2 %v2418_v58  ;;  %v2808_v36 = vld [vmem:[%s4551_s5] ss:$0 sm:$0xff]  ;;  %s2987_s5 = smov [#allocation12]  }
 0x1d8   :  { %2284 = vmatpush.msrb.mxu1 %v2231_v3  ;;  %2384 = vmatpush.msra.mxu0 %v2344_v53  ;;  %v2414_v3 = vld [vmem:[#allocation11 + $0x58] sm:$0xff] }
 0x1d9   :  { %2364 = vmatpush.msrb.mxu3 %v2325_v8  ;;  %2754 = vmatpush.msra.mxu2 %v2417_v62 }
 0x1da   :  { %2385 = vmatpush.msra.mxu0 %v2343_v56  ;;  %2423 = vmatpush.msra.mxu1 %v2418_v58  ;;  %v2405_v56 = vld [vmem:[#allocation11 + $0x10] sm:$0xff] }
 0x1db   :  { %2365 = vmatpush.msrb.mxu3 %v2324_v23  ;;  %2755 = vmatpush.msra.mxu2 %v2416_v39 }
 0x1dc   :  { %2386 = vmatpush.msra.mxu0 %v2342_v13  ;;  %2424 = vmatpush.msra.mxu1 %v2417_v62 }
 0x1dd   :  { %2366 = vmatpush.msrb.mxu3 %v2323_v42  ;;  %2756 = vmatpush.msra.mxu2 %v2415_v38 }
 0x1de   :  { %2387 = vmatpush.msra.mxu0 %v2341_v25  ;;  %2425 = vmatpush.msra.mxu1 %v2416_v39 }
 0x1df   :  { %2367 = vmatpush.msrb.mxu3 %v2322_v60  ;;  %2757 = vmatpush.msra.mxu2 %v2414_v3 }
 0x1e0   :  { %2388 = vmatpush.msra.mxu0 %v2340_v46  ;;  %2426 = vmatpush.msra.mxu1 %v2415_v38 }
 0x1e1   :  { %2368 = vmatpush.msrb.mxu3 %v2321_v22  ;;  %2758 = vmatpush.msra.mxu2 %v2413_v20 }
 0x1e2   :  { %2389 = vmatpush.msra.mxu0 %v2339_v50  ;;  %2427 = vmatpush.msra.mxu1 %v2414_v3 }
 0x1e3   :  { %2369 = vmatpush.msrb.mxu3 %v2320_v27  ;;  %2759 = vmatpush.msra.mxu2 %v2412_v2 }
 0x1e4   :  { %2390 = vmatpush.msra.mxu0 %v2338_v32  ;;  %2428 = vmatpush.msra.mxu1 %v2413_v20 }
 0x1e5   :  { %2370 = vmatpush.msrb.mxu3 %v2319_v61  ;;  %2760 = vmatpush.msra.mxu2 %v2411_v15 }
 0x1e6   :  { %2391 = vmatpush.msra.mxu0 %v2337_v59  ;;  %2429 = vmatpush.msra.mxu1 %v2412_v2 }
 0x1e7   :  { %2761 = vmatpush.msra.mxu2 %v2410_v21 }
 0x1e8   :  { %2392 = vmatpush.msra.mxu0 %v2336_v10  ;;  %2430 = vmatpush.msra.mxu1 %v2411_v15 }
 0x1ea   :  { %2393 = vmatpush.msra.mxu0 %v2335_v24  ;;  %2431 = vmatpush.msra.mxu1 %v2410_v21 }
 0x22e   :  { %v2108_v40 = vpop.f32.mrf.mxu0 }
 0x232   :  { %v2131_v18 = vpop.f32.mrf.mxu1 }
 0x233   :  { %v2132_v29 = vadd.f32 %v2131_v18, %v2108_v40 }
 0x239   :  { %v2219_v0 = vpop.xlane.xlu0 %2218 }
 0x23a   :  { %v2223_v7 = vmax.f32 %v2219_v0, 1.0  ;;  %v2409_v0 = vld [vmem:[#allocation11 + $0x30] sm:$0xff] }
 0x23b   :  { %2432 = vmatpush.msra.mxu1 %v2409_v0  ;;  %2762 = vmatpush.msra.mxu2 %v2409_v0 }
 0x23c   :  { %2810 = vrcp.f32 %v2223_v7 }
 0x23d   :  { %2433 = vmatpush.msra.mxu1 %v2408_v30  ;;  %2763 = vmatpush.msra.mxu2 %v2408_v30 }
 0x23f   :  { %2434 = vmatpush.msra.mxu1 %v2407_v52  ;;  %2764 = vmatpush.msra.mxu2 %v2407_v52 }
 0x240   :  { %v2222_v35 = vpop.xlane.xlu1 %2221 }
 0x241   :  { %v2224_v28 = vmax.f32 %v2222_v35, 1.0  ;;  %v2154_v31 = vpop.f32.mrf.mxu2  ;;  %2435 = vmatpush.msra.mxu1 %v2406_v26  ;;  %2765 = vmatpush.msra.mxu2 %v2406_v26  ;;  %v2403_v35 = vld [vmem:[#allocation11] sm:$0xff] }
 0x242   :  { %v2811_v9 = vpop.eup %2810  ;;  %v2155_v57 = vadd.f32 %v2154_v31, %v2132_v29 }
 0x243   :  { %2812 = vrcp.f32 %v2224_v28  ;;  %2436 = vmatpush.msra.mxu1 %v2405_v56  ;;  %2766 = vmatpush.msra.mxu2 %v2405_v56 }
 0x245   :  { %2437 = vmatpush.msra.mxu1 %v2404_v4  ;;  %2767 = vmatpush.msra.mxu2 %v2404_v4 }
 0x247   :  { %v2177_v5 = vpop.f32.mrf.mxu3  ;;  %2438 = vmatpush.msra.mxu1 %v2403_v35  ;;  %2768 = vmatpush.msra.mxu2 %v2403_v35 }
 0x248   :  { %v2178_v37 = vadd.f32 %v2177_v5, %v2155_v57 }
 0x249   :  { %v2813_v16 = vpop.eup %2812 }
 0x24a   :  { %v2197_v1 = vpop.f32.mrf.mxu0 }
 0x24b   :  { %v2198_v12 = vadd.f32 %v2197_v1, %v2175_v63  ;;  %v2809_v1 = vld [vmem:[%s4553_s7] ss:$0 sm:$0xff]  ;;  %s2490_s7 = sshll.u32 %s2987_s5, 4  ;;  %s2491_s7 = int_to_ptr.vmem [resolvable:$true] %s2490_s7 }
 0x24d   :  { %v2229_v49 = vmul.f32 %v2811_v9, %v2198_v12 }
 0x24f   :  { %2285 = vmatmul.f32.vlgmr.msrb.gmra.mxu1 %v2229_v49  ;;  %2308 = vmatmul.f32.vlgmr.msrb.gmra.mxu2 %v2229_v49 }
 0x252   :  { %v2200_v47 = vpop.f32.mrf.mxu0 }
 0x253   :  { %v2201_v41 = vadd.f32 %v2200_v47, %v2178_v37 }
 0x255   :  { %v2230_v48 = vmul.f32 %v2813_v16, %v2201_v41 }
 0x257   :  { %2288 = vmatmul.f32.gmra.mxu1 %v2230_v48  ;;  %2311 = vmatmul.f32.gmra.mxu2 %v2230_v48 }
 0x2cc   :  { %v2286_v17 = vpop.f32.mrf.mxu1 }
 0x2cd   :  { %v2287_v51 = vadd.f32 %v2286_v17, %v2265_v19 }
 0x2cf   :  { %v2315_v34 = vmax.f32 %v2287_v51, 0.0 }
 0x2d1   :  { %2371 = vmatmul.f32.vlgmr.msrb.gmra.mxu3 %v2315_v34 }
 0x2d2   :  { %v2309_v43 = vpop.f32.mrf.mxu2 }
 0x2d3   :  { %v2310_v45 = vadd.f32 %v2309_v43, %v2266_v54 }
 0x2d4   :  { %v2289_v40 = vpop.f32.mrf.mxu1 }
 0x2d5   :  { %v2316_v7 = vmax.f32 %v2310_v45, 0.0  ;;  %v2290_v55 = vadd.f32 %v2289_v40, %v2265_v19 }
 0x2d7   :  { %v2317_v44 = vmax.f32 %v2290_v55, 0.0  ;;  %2394 = vmatmul.f32.vlgmr.msra.gmra.mxu0 %v2316_v7 }
 0x2d9   :  { %2374 = vmatmul.f32.gmra.mxu3 %v2317_v44 }
 0x2da   :  { %v2312_v11 = vpop.f32.mrf.mxu2 }
 0x2db   :  { %v2313_v53 = vadd.f32 %v2312_v11, %v2266_v54 }
 0x2dd   :  { %v2318_v33 = vmax.f32 %v2313_v53, 0.0 }
 0x2df   :  { %2397 = vmatmul.f32.gmra.mxu0 %v2318_v33 }
 0x354   :  { %v2372_v13 = vpop.f32.mrf.mxu3  ;;  %v2395_v8 = vpop.f32.mrf.mxu0 }
 0x355   :  { %v2373_v14 = vadd.f32 %v2808_v36, %v2372_v13 }
 0x357   :  { %v2396_v18 = vadd.f32 %v2395_v8, %v2373_v14 }
 0x359   :  { %v2401_v28 = vmax.f32 %v2396_v18, 0.0 }
 0x35b   :  { %2439 = vmatmul.f32.vlgmr.msra.gmra.mxu1 %v2401_v28 }
 0x35c   :  { %v2375_v25 = vpop.f32.mrf.mxu3  ;;  %v2398_v23 = vpop.f32.mrf.mxu0 }
 0x35d   :  { %v2376_v63 = vadd.f32 %v2808_v36, %v2375_v25 }
 0x35f   :  { %v2399_v9 = vadd.f32 %v2398_v23, %v2376_v63 }
 0x361   :  { %v2402_v31 = vmax.f32 %v2399_v9, 0.0 }
 0x363   :  { %2442 = vmatmul.f32.vlgmr.msra.gmra.mxu2 %v2402_v31 }
 0x3d8   :  { %v2440_v29 = vpop.f32.mrf.mxu1 }
 0x3d9   :  { %v2441_v12 = vadd.f32 %v2809_v1, %v2440_v29 }
 0x3db   :  { %v2751_v42 = vmul.f32 -1.442695, %v2441_v12 }
 0x3dd   :  { %2814 = vpow2.f32 %v2751_v42 }
 0x3e3   :  { %v2815_v57 = vpop.eup %2814 }
 0x3e4   :  { %v2452_v49 = vadd.f32 1.0, %v2815_v57 }
 0x3e6   :  { %2816 = vrcp.f32 %v2452_v49  ;;  %v2443_v60 = vpop.f32.mrf.mxu2  ;;  %v2465_v48 = vand.u32 2147483648, %v2452_v49  ;;  %v2463_v27 = vand.u32 2147483647, %v2452_v49  ;;  %vm2459_vm8 = vweird.f32 %v2452_v49 }
 0x3e7   :  { %v2444_v5 = vadd.f32 %v2809_v1, %v2443_v60 }
 0x3e8   :  { %v2466_v32 = vor.u32 1.1754944e-38, %v2465_v48  ;;  %vm2464_vm10 = vcmp.eq.f32.partialorder %v2463_v27, 8.507059e+37 }
 0x3e9   :  { %v2752_v37 = vmul.f32 -1.442695, %v2444_v5 }
 0x3eb   :  { %2818 = vpow2.f32 %v2752_v37 }
 0x3ec   :  { %v2817_v16 = vpop.eup %2816 }
 0x3ed   :  { %v2455_v47 = vmul.f32 %v2817_v16, %v2452_v49  ;;  %vm2460_vm3 = vweird.f32 %v2817_v16 }
 0x3ee   :  { %vm2461_vm9 = vmor %vm2459_vm8, %vm2460_vm3 }
 0x3ef   :  { %v2456_v41 = vsub.f32 1.0, %v2455_v47 }
 0x3f1   :  { %v2819_v22 = vpop.eup %2818  ;;  %v2457_v46 = vmul.f32 %v2817_v16, %v2456_v41 }
 0x3f2   :  { %v2453_v50 = vadd.f32 1.0, %v2819_v22 }
 0x3f3   :  { %v2458_v61 = vadd.f32 %v2817_v16, %v2457_v46 }
 0x3f4   :  { %2820 = vrcp.f32 %v2453_v50  ;;  %v2480_v39 = vand.u32 2147483648, %v2453_v50  ;;  %v2478_v3 = vand.u32 2147483647, %v2453_v50  ;;  %vm2474_vm0 = vweird.f32 %v2453_v50 }
 0x3f5   :  { %v2462_v59 = vsel %vm2461_vm9, %v2817_v16, %v2458_v61 }
 0x3f6   :  { %v2467_v10 = vsel %vm2464_vm10, %v2466_v32, %v2462_v59  ;;  %v2481_v20 = vor.u32 1.1754944e-38, %v2480_v39  ;;  %vm2479_vm12 = vcmp.eq.f32.partialorder %v2478_v3, 8.507059e+37 }
 0x3f7   :  { %2484 = vst [vmem:[#allocation12] sm:$0xff] %v2467_v10 }
 0x3fa   :  { %v2821_v24 = vpop.eup %2820 }
 0x3fb   :  { %v2470_v58 = vmul.f32 %v2821_v24, %v2453_v50  ;;  %vm2475_vm11 = vweird.f32 %v2821_v24 }
 0x3fc   :  { %vm2476_vm1 = vmor %vm2474_vm0, %vm2475_vm11 }
 0x3fd   :  { %v2471_v62 = vsub.f32 1.0, %v2470_v58 }
 0x3ff   :  { %v2472_v38 = vmul.f32 %v2821_v24, %v2471_v62 }
 0x401   :  { %v2473_v6 = vadd.f32 %v2821_v24, %v2472_v38 }
 0x403   :  { %v2477_v19 = vsel %vm2476_vm1, %v2821_v24, %v2473_v6 }
 0x404   :  { %v2482_v2 = vsel %vm2479_vm12, %v2481_v20, %v2477_v19 }
 0x405   :  { %2485 = vst [vmem:[#allocation12 + $0x8] sm:$0xff] %v2482_v2 }
 0x406   :  { %2498 = dma.vmem_to_hbm [thread:$0]  %s2491_s7, 256, %s2493_s16, [#allocation5], %s2978_s13, %s2978_s13, %s2979_s14  }
 0x407   :  { %2975 = dma.done.wait [#allocation5], 256  }
 0x408   :  { %2976 = vsyncadd [#allocation5], 4294967040 }
 0x409   :  { %2503 = vsyncpa [#allocation4], 1 }
 0x40a   :  { %2504 = vsyncpa [#allocation7], 1 }
 0x40b   :  { %2505 = vsyncpa [#allocation10], 1 }
 0x40c   :  { %2506 = vsyncpa [#allocation5], 1 }

</bundles_post_ra>
